<compile_context>
chip_gen: v7x
topology: tpu7x:2x2x1
jax: 0.10.0
libtpu: 0.0.40
codegen_flags: <defaults>
</compile_context>

<pallas_src>
import functools
import math

import numpy as np

import jax
import jax.numpy as jnp
from jax.experimental import pallas as pl
from jax.experimental.pallas import tpu as pltpu


def _sine_encoding_kernel(mask_ref, w_idx_ref, h_idx_ref, inv_dim_t_ref,
                          phase_ref, out_ref, *, num_pos_feats, height, width):
    # mask_ref : (1, 1, H*W) int32        w_idx_ref / h_idx_ref : (1, H*W) int32
    # inv_dim_t_ref / phase_ref : (P, 1) float32
    # out_ref  : (1, 2P, H*W) float32   -- [0:P] = pos_y, [P:2P] = pos_x
    H, W = height, width
    HW = H * W
    P = num_pos_feats
    eps = 1e-6
    scale = 2.0 * math.pi

    not_mask = (1 - mask_ref[0]).astype(jnp.float32)            # (1, HW)
    w_idx = w_idx_ref[...]                                      # column in (H, W)
    h_idx = h_idx_ref[...]                                      # row    in (H, W)

    # ---- segmented inclusive prefix sums (Hillis-Steele, log-step roll+add) ----
    # cumsum along W (within each row of the original (H, W) layout)
    x_c = not_mask
    s = 1
    while s < W:
        shifted = pltpu.roll(x_c, shift=s, axis=1)              # shifted[j] = x_c[j - s]
        x_c = x_c + jnp.where(w_idx >= s, shifted, 0.0)
        s *= 2

    # cumsum along H (stride W in the flat layout)
    y_c = not_mask
    s = 1
    while s < H:
        shifted = pltpu.roll(y_c, shift=s * W, axis=1)
        y_c = y_c + jnp.where(h_idx >= s, shifted, 0.0)
        s *= 2

    # ---- broadcast the row-end / column-end totals (segmented copy-from-right) ----
    x_last = x_c                                                # -> cumsum at last column of row
    s = 1
    while s < W:
        shifted = pltpu.roll(x_last, shift=HW - s, axis=1)      # shifted[j] = x_last[j + s]
        x_last = jnp.where(w_idx < W - s, shifted, x_last)
        s *= 2

    y_last = y_c                                                # -> cumsum at last row of column
    s = 1
    while s < H:
        shifted = pltpu.roll(y_last, shift=HW - s * W, axis=1)
        y_last = jnp.where(h_idx < H - s, shifted, y_last)
        s *= 2

    # normalize: divide only H*W elements (off the hot path), then multiply through.
    x_norm = x_c * (scale / (x_last + eps))                     # (1, HW)
    y_norm = y_c * (scale / (y_last + eps))                     # (1, HW)

    inv_dim_t = inv_dim_t_ref[...]                              # (P, 1) == 1/dim_t
    phase = phase_ref[...]                                      # (P, 1): 0 or pi/2

    # ---- chunked sin + store: one transcendental per output element ----------
    # cos(v) == sin(v + pi/2); chunks of 8 sublanes cap the live intermediate
    # at (8, HW) f32 and interleave EUP sin with the vector-store stream.
    chunk = 8 if P % 8 == 0 else P
    for c0 in range(0, P, chunk):
        inv_c = inv_dim_t[c0:c0 + chunk]                        # (chunk, 1)
        ph_c = phase[c0:c0 + chunk]                             # (chunk, 1)
        out_ref[0, c0:c0 + chunk, :] = jnp.sin(
            y_norm * inv_c + ph_c).astype(out_ref.dtype)        # pos_y channels
        out_ref[0, P + c0:P + c0 + chunk, :] = jnp.sin(
            x_norm * inv_c + ph_c).astype(out_ref.dtype)        # pos_x channels


def sine_encoding(x, mask, *, num_pos_feats=32, temperature=10000.0):
    """Pallas implementation of SineEncoding.forward(x, mask); `x` is unused."""
    del x  # only supplies device/dtype in the PyTorch module; output is f32 like torch.
    B, H, W = mask.shape
    P = num_pos_feats
    HW = H * W

    # Mask DMA is tiny (B*H*W words) vs the (B, 2P, H*W) f32 output; flatten to a
    # lane-dense (B, 1, H*W) slab so the kernel never reshapes internally.
    mask_flat = mask.reshape(B, 1, HW).astype(jnp.int32)

    # Hoisted (static) per-lane index maps and per-channel constants.
    lane = np.arange(HW, dtype=np.int32)
    w_idx = jnp.asarray((lane % W).reshape(1, HW))
    h_idx = jnp.asarray((lane // W).reshape(1, HW))

    p_idx = np.arange(P)
    exponent = (2.0 / float(P)) * (p_idx // 2).astype(np.float64)
    inv_dim_t = jnp.asarray(
        np.exp(-math.log(float(temperature)) * exponent).astype(np.float32).reshape(P, 1))
    phase = jnp.asarray(
        np.where(p_idx % 2 == 1, np.pi / 2.0, 0.0).astype(np.float32).reshape(P, 1))

    kernel = functools.partial(
        _sine_encoding_kernel,
        num_pos_feats=P,
        height=H,
        width=W,
    )

    out_flat = pl.pallas_call(
        kernel,
        out_shape=jax.ShapeDtypeStruct((B, 2 * P, HW), jnp.float32),
        grid=(B,),
        in_specs=[
            pl.BlockSpec((1, 1, HW), lambda b: (b, 0, 0)),       # mask
            pl.BlockSpec((1, HW), lambda b: (0, 0)),             # w_idx
            pl.BlockSpec((1, HW), lambda b: (0, 0)),             # h_idx
            pl.BlockSpec((P, 1), lambda b: (0, 0)),              # 1/dim_t
            pl.BlockSpec((P, 1), lambda b: (0, 0)),              # phase
        ],
        out_specs=pl.BlockSpec((1, 2 * P, HW), lambda b: (b, 0, 0)),
        compiler_params=pltpu.CompilerParams(
            dimension_semantics=("parallel",)),
    )(mask_flat, w_idx, h_idx, inv_dim_t, phase)

    # free contiguous reshape back to NCHW
    return out_flat.reshape(B, 2 * P, H, W)


def sine_encoding_ref(mask, *, num_pos_feats=32, temperature=10000.0):
    """Pure-JAX reference mirroring the PyTorch forward exactly."""
    not_mask = (~mask).astype(jnp.float32)
    x_embed = jnp.cumsum(not_mask, axis=2)
    y_embed = jnp.cumsum(not_mask, axis=1)
    eps = 1e-6
    scale = 2.0 * math.pi
    x_embed = x_embed / (x_embed[:, :, -1:] + eps) * scale
    y_embed = y_embed / (y_embed[:, -1:, :] + eps) * scale
    dim_t = jnp.arange(num_pos_feats, dtype=jnp.float32)
    dim_t = temperature ** (2.0 * jnp.floor(dim_t / 2.0) / num_pos_feats)
    pos_x = x_embed[..., None] / dim_t
    pos_y = y_embed[..., None] / dim_t
    B, H, W = mask.shape
    pos_x = jnp.stack(
        [jnp.sin(pos_x[..., 0::2]), jnp.cos(pos_x[..., 1::2])], axis=4
    ).reshape(B, H, W, num_pos_feats)
    pos_y = jnp.stack(
        [jnp.sin(pos_y[..., 0::2]), jnp.cos(pos_y[..., 1::2])], axis=4
    ).reshape(B, H, W, num_pos_feats)
    pos = jnp.concatenate([pos_y, pos_x], axis=3).transpose(0, 3, 1, 2)
    return pos


if __name__ == "__main__":
    B, Cin, H, W = 2, 4, 16, 16
    NUM_POS_FEATS = 32

    key = jax.random.PRNGKey(0)
    kx, km = jax.random.split(key)
    x = jax.random.normal(kx, (B, Cin, H, W), dtype=jnp.float32)  # unused by forward
    mask = jax.random.bernoulli(km, 0.3, (B, H, W))
    # keep at least one unmasked entry per row/column (normalization divisor > eps)
    mask = mask.at[:, 0, :].set(False).at[:, :, 0].set(False)

    out = sine_encoding(x, mask, num_pos_feats=NUM_POS_FEATS, temperature=10000.0)
    out = jax.block_until_ready(out)

    ref = sine_encoding_ref(mask, num_pos_feats=NUM_POS_FEATS, temperature=10000.0)
    assert out.shape == (B, 2 * NUM_POS_FEATS, H, W), out.shape
    max_err = float(jnp.max(jnp.abs(out - ref)))
    assert max_err < 1e-4, max_err
    print("KERNEL_OK")
</pallas_src>

<mosaic_0001>
module attributes {stable_mosaic.version = 11 : i64} {
  func.func @_sine_encoding_kernel(%arg0: i32, %arg1: memref<1x1x256xi32, #tpu.memory_space<vmem>>, %arg2: memref<1x256xi32, #tpu.memory_space<vmem>>, %arg3: memref<1x256xi32, #tpu.memory_space<vmem>>, %arg4: memref<32x1xf32, #tpu.memory_space<vmem>>, %arg5: memref<32x1xf32, #tpu.memory_space<vmem>>, %arg6: memref<1x64x256xf32, #tpu.memory_space<vmem>>) attributes {dimension_semantics = [#tpu.dimension_semantics<parallel>], iteration_bounds = array<i64: 2>, scalar_prefetch = 0 : i64, scratch_operands = 0 : i64, tpu.core_type = #tpu.core_type<tc>, window_params = [{transform_indices = @transform_0, window_bounds = array<i64: 1, 1, 256>}, {pipeline_mode = #tpu.pipeline_mode<synchronous>, transform_indices = @transform_1, window_bounds = array<i64: 1, 256>}, {pipeline_mode = #tpu.pipeline_mode<synchronous>, transform_indices = @transform_2, window_bounds = array<i64: 1, 256>}, {pipeline_mode = #tpu.pipeline_mode<synchronous>, transform_indices = @transform_3, window_bounds = array<i64: 32, 1>}, {pipeline_mode = #tpu.pipeline_mode<synchronous>, transform_indices = @transform_4, window_bounds = array<i64: 32, 1>}, {transform_indices = @transform_5, window_bounds = array<i64: 1, 64, 256>}]} {
    %c0 = arith.constant 0 : index
    %c0_0 = arith.constant 0 : index
    %c0_1 = arith.constant 0 : index
    %0 = vector.load %arg1[%c0, %c0_0, %c0_1] : memref<1x1x256xi32, #tpu.memory_space<vmem>>, vector<1x1x256xi32>
    %1 = vector.shape_cast %0 : vector<1x1x256xi32> to vector<1x256xi32>
    %c1_i32 = arith.constant 1 : i32
    %2 = vector.broadcast %c1_i32 : i32 to vector<1x256xi32>
    %3 = arith.subi %2, %1 : vector<1x256xi32>
    %4 = arith.sitofp %3 : vector<1x256xi32> to vector<1x256xf32>
    %c0_2 = arith.constant 0 : index
    %c0_3 = arith.constant 0 : index
    %5 = vector.load %arg2[%c0_2, %c0_3] : memref<1x256xi32, #tpu.memory_space<vmem>>, vector<1x256xi32>
    %c0_4 = arith.constant 0 : index
    %c0_5 = arith.constant 0 : index
    %6 = vector.load %arg3[%c0_4, %c0_5] : memref<1x256xi32, #tpu.memory_space<vmem>>, vector<1x256xi32>
    %c1_i32_6 = arith.constant 1 : i32
    %7 = tpu.dynamic_rotate %4 by %c1_i32_6 dim 1 : vector<1x256xf32>, i32 -> vector<1x256xf32>
    %c1_i32_7 = arith.constant 1 : i32
    %8 = vector.broadcast %c1_i32_7 : i32 to vector<1x256xi32>
    %9 = arith.cmpi sge, %5, %8 : vector<1x256xi32>
    %cst = arith.constant 0.000000e+00 : f32
    %10 = vector.broadcast %cst : f32 to vector<1x256xf32>
    %11 = arith.select %9, %7, %10 : vector<1x256xi1>, vector<1x256xf32>
    %12 = arith.addf %4, %11 : vector<1x256xf32>
    %c2_i32 = arith.constant 2 : i32
    %13 = tpu.dynamic_rotate %12 by %c2_i32 dim 1 : vector<1x256xf32>, i32 -> vector<1x256xf32>
    %c2_i32_8 = arith.constant 2 : i32
    %14 = vector.broadcast %c2_i32_8 : i32 to vector<1x256xi32>
    %15 = arith.cmpi sge, %5, %14 : vector<1x256xi32>
    %cst_9 = arith.constant 0.000000e+00 : f32
    %16 = vector.broadcast %cst_9 : f32 to vector<1x256xf32>
    %17 = arith.select %15, %13, %16 : vector<1x256xi1>, vector<1x256xf32>
    %18 = arith.addf %12, %17 : vector<1x256xf32>
    %c4_i32 = arith.constant 4 : i32
    %19 = tpu.dynamic_rotate %18 by %c4_i32 dim 1 : vector<1x256xf32>, i32 -> vector<1x256xf32>
    %c4_i32_10 = arith.constant 4 : i32
    %20 = vector.broadcast %c4_i32_10 : i32 to vector<1x256xi32>
    %21 = arith.cmpi sge, %5, %20 : vector<1x256xi32>
    %cst_11 = arith.constant 0.000000e+00 : f32
    %22 = vector.broadcast %cst_11 : f32 to vector<1x256xf32>
    %23 = arith.select %21, %19, %22 : vector<1x256xi1>, vector<1x256xf32>
    %24 = arith.addf %18, %23 : vector<1x256xf32>
    %c8_i32 = arith.constant 8 : i32
    %25 = tpu.dynamic_rotate %24 by %c8_i32 dim 1 : vector<1x256xf32>, i32 -> vector<1x256xf32>
    %c8_i32_12 = arith.constant 8 : i32
    %26 = vector.broadcast %c8_i32_12 : i32 to vector<1x256xi32>
    %27 = arith.cmpi sge, %5, %26 : vector<1x256xi32>
    %cst_13 = arith.constant 0.000000e+00 : f32
    %28 = vector.broadcast %cst_13 : f32 to vector<1x256xf32>
    %29 = arith.select %27, %25, %28 : vector<1x256xi1>, vector<1x256xf32>
    %30 = arith.addf %24, %29 : vector<1x256xf32>
    %c16_i32 = arith.constant 16 : i32
    %31 = tpu.dynamic_rotate %4 by %c16_i32 dim 1 : vector<1x256xf32>, i32 -> vector<1x256xf32>
    %c1_i32_14 = arith.constant 1 : i32
    %32 = vector.broadcast %c1_i32_14 : i32 to vector<1x256xi32>
    %33 = arith.cmpi sge, %6, %32 : vector<1x256xi32>
    %cst_15 = arith.constant 0.000000e+00 : f32
    %34 = vector.broadcast %cst_15 : f32 to vector<1x256xf32>
    %35 = arith.select %33, %31, %34 : vector<1x256xi1>, vector<1x256xf32>
    %36 = arith.addf %4, %35 : vector<1x256xf32>
    %c32_i32 = arith.constant 32 : i32
    %37 = tpu.dynamic_rotate %36 by %c32_i32 dim 1 : vector<1x256xf32>, i32 -> vector<1x256xf32>
    %c2_i32_16 = arith.constant 2 : i32
    %38 = vector.broadcast %c2_i32_16 : i32 to vector<1x256xi32>
    %39 = arith.cmpi sge, %6, %38 : vector<1x256xi32>
    %cst_17 = arith.constant 0.000000e+00 : f32
    %40 = vector.broadcast %cst_17 : f32 to vector<1x256xf32>
    %41 = arith.select %39, %37, %40 : vector<1x256xi1>, vector<1x256xf32>
    %42 = arith.addf %36, %41 : vector<1x256xf32>
    %c64_i32 = arith.constant 64 : i32
    %43 = tpu.dynamic_rotate %42 by %c64_i32 dim 1 : vector<1x256xf32>, i32 -> vector<1x256xf32>
    %c4_i32_18 = arith.constant 4 : i32
    %44 = vector.broadcast %c4_i32_18 : i32 to vector<1x256xi32>
    %45 = arith.cmpi sge, %6, %44 : vector<1x256xi32>
    %cst_19 = arith.constant 0.000000e+00 : f32
    %46 = vector.broadcast %cst_19 : f32 to vector<1x256xf32>
    %47 = arith.select %45, %43, %46 : vector<1x256xi1>, vector<1x256xf32>
    %48 = arith.addf %42, %47 : vector<1x256xf32>
    %c128_i32 = arith.constant 128 : i32
    %49 = tpu.dynamic_rotate %48 by %c128_i32 dim 1 : vector<1x256xf32>, i32 -> vector<1x256xf32>
    %c8_i32_20 = arith.constant 8 : i32
    %50 = vector.broadcast %c8_i32_20 : i32 to vector<1x256xi32>
    %51 = arith.cmpi sge, %6, %50 : vector<1x256xi32>
    %cst_21 = arith.constant 0.000000e+00 : f32
    %52 = vector.broadcast %cst_21 : f32 to vector<1x256xf32>
    %53 = arith.select %51, %49, %52 : vector<1x256xi1>, vector<1x256xf32>
    %54 = arith.addf %48, %53 : vector<1x256xf32>
    %c255_i32 = arith.constant 255 : i32
    %55 = tpu.dynamic_rotate %30 by %c255_i32 dim 1 : vector<1x256xf32>, i32 -> vector<1x256xf32>
    %c15_i32 = arith.constant 15 : i32
    %56 = vector.broadcast %c15_i32 : i32 to vector<1x256xi32>
    %57 = arith.cmpi slt, %5, %56 : vector<1x256xi32>
    %58 = arith.select %57, %55, %30 : vector<1x256xi1>, vector<1x256xf32>
    %c254_i32 = arith.constant 254 : i32
    %59 = tpu.dynamic_rotate %58 by %c254_i32 dim 1 : vector<1x256xf32>, i32 -> vector<1x256xf32>
    %c14_i32 = arith.constant 14 : i32
    %60 = vector.broadcast %c14_i32 : i32 to vector<1x256xi32>
    %61 = arith.cmpi slt, %5, %60 : vector<1x256xi32>
    %62 = arith.select %61, %59, %58 : vector<1x256xi1>, vector<1x256xf32>
    %c252_i32 = arith.constant 252 : i32
    %63 = tpu.dynamic_rotate %62 by %c252_i32 dim 1 : vector<1x256xf32>, i32 -> vector<1x256xf32>
    %c12_i32 = arith.constant 12 : i32
    %64 = vector.broadcast %c12_i32 : i32 to vector<1x256xi32>
    %65 = arith.cmpi slt, %5, %64 : vector<1x256xi32>
    %66 = arith.select %65, %63, %62 : vector<1x256xi1>, vector<1x256xf32>
    %c248_i32 = arith.constant 248 : i32
    %67 = tpu.dynamic_rotate %66 by %c248_i32 dim 1 : vector<1x256xf32>, i32 -> vector<1x256xf32>
    %c8_i32_22 = arith.constant 8 : i32
    %68 = vector.broadcast %c8_i32_22 : i32 to vector<1x256xi32>
    %69 = arith.cmpi slt, %5, %68 : vector<1x256xi32>
    %70 = arith.select %69, %67, %66 : vector<1x256xi1>, vector<1x256xf32>
    %c240_i32 = arith.constant 240 : i32
    %71 = tpu.dynamic_rotate %54 by %c240_i32 dim 1 : vector<1x256xf32>, i32 -> vector<1x256xf32>
    %c15_i32_23 = arith.constant 15 : i32
    %72 = vector.broadcast %c15_i32_23 : i32 to vector<1x256xi32>
    %73 = arith.cmpi slt, %6, %72 : vector<1x256xi32>
    %74 = arith.select %73, %71, %54 : vector<1x256xi1>, vector<1x256xf32>
    %c224_i32 = arith.constant 224 : i32
    %75 = tpu.dynamic_rotate %74 by %c224_i32 dim 1 : vector<1x256xf32>, i32 -> vector<1x256xf32>
    %c14_i32_24 = arith.constant 14 : i32
    %76 = vector.broadcast %c14_i32_24 : i32 to vector<1x256xi32>
    %77 = arith.cmpi slt, %6, %76 : vector<1x256xi32>
    %78 = arith.select %77, %75, %74 : vector<1x256xi1>, vector<1x256xf32>
    %c192_i32 = arith.constant 192 : i32
    %79 = tpu.dynamic_rotate %78 by %c192_i32 dim 1 : vector<1x256xf32>, i32 -> vector<1x256xf32>
    %c12_i32_25 = arith.constant 12 : i32
    %80 = vector.broadcast %c12_i32_25 : i32 to vector<1x256xi32>
    %81 = arith.cmpi slt, %6, %80 : vector<1x256xi32>
    %82 = arith.select %81, %79, %78 : vector<1x256xi1>, vector<1x256xf32>
    %c128_i32_26 = arith.constant 128 : i32
    %83 = tpu.dynamic_rotate %82 by %c128_i32_26 dim 1 : vector<1x256xf32>, i32 -> vector<1x256xf32>
    %c8_i32_27 = arith.constant 8 : i32
    %84 = vector.broadcast %c8_i32_27 : i32 to vector<1x256xi32>
    %85 = arith.cmpi slt, %6, %84 : vector<1x256xi32>
    %86 = arith.select %85, %83, %82 : vector<1x256xi1>, vector<1x256xf32>
    %cst_28 = arith.constant 9.99999997E-7 : f32
    %87 = vector.broadcast %cst_28 : f32 to vector<1x256xf32>
    %88 = arith.addf %70, %87 : vector<1x256xf32>
    %cst_29 = arith.constant 6.28318548 : f32
    %89 = vector.broadcast %cst_29 : f32 to vector<1x256xf32>
    %90 = arith.divf %89, %88 : vector<1x256xf32>
    %91 = arith.mulf %30, %90 : vector<1x256xf32>
    %cst_30 = arith.constant 9.99999997E-7 : f32
    %92 = vector.broadcast %cst_30 : f32 to vector<1x256xf32>
    %93 = arith.addf %86, %92 : vector<1x256xf32>
    %cst_31 = arith.constant 6.28318548 : f32
    %94 = vector.broadcast %cst_31 : f32 to vector<1x256xf32>
    %95 = arith.divf %94, %93 : vector<1x256xf32>
    %96 = arith.mulf %54, %95 : vector<1x256xf32>
    %c0_32 = arith.constant 0 : index
    %c0_33 = arith.constant 0 : index
    %97 = vector.load %arg4[%c0_32, %c0_33] : memref<32x1xf32, #tpu.memory_space<vmem>>, vector<32x1xf32>
    %c0_34 = arith.constant 0 : index
    %c0_35 = arith.constant 0 : index
    %98 = vector.load %arg5[%c0_34, %c0_35] : memref<32x1xf32, #tpu.memory_space<vmem>>, vector<32x1xf32>
    %99 = vector.extract_strided_slice %97 {offsets = [0, 0], sizes = [8, 1], strides = [1, 1]} : vector<32x1xf32> to vector<8x1xf32>
    %100 = vector.extract_strided_slice %98 {offsets = [0, 0], sizes = [8, 1], strides = [1, 1]} : vector<32x1xf32> to vector<8x1xf32>
    %101 = vector.broadcast %96 : vector<1x256xf32> to vector<8x256xf32>
    %102 = vector.broadcast %99 : vector<8x1xf32> to vector<8x256xf32>
    %103 = arith.mulf %101, %102 : vector<8x256xf32>
    %104 = vector.broadcast %100 : vector<8x1xf32> to vector<8x256xf32>
    %105 = arith.addf %103, %104 : vector<8x256xf32>
    %106 = math.sin %105 : vector<8x256xf32>
    %c0_36 = arith.constant 0 : index
    %c0_37 = arith.constant 0 : index
    %c0_38 = arith.constant 0 : index
    %107 = vector.load %arg6[%c0_36, %c0_37, %c0_38] : memref<1x64x256xf32, #tpu.memory_space<vmem>>, vector<1x8x256xf32>
    %108 = vector.shape_cast %107 : vector<1x8x256xf32> to vector<8x256xf32>
    %109 = vector.shape_cast %106 : vector<8x256xf32> to vector<1x8x256xf32>
    tpu.vector_store %arg6[%c0_36, %c0_37, %c0_38], %109 {strides = array<i32>} : memref<1x64x256xf32, #tpu.memory_space<vmem>>, vector<1x8x256xf32>,
    %110 = vector.broadcast %91 : vector<1x256xf32> to vector<8x256xf32>
    %111 = vector.broadcast %99 : vector<8x1xf32> to vector<8x256xf32>
    %112 = arith.mulf %110, %111 : vector<8x256xf32>
    %113 = vector.broadcast %100 : vector<8x1xf32> to vector<8x256xf32>
    %114 = arith.addf %112, %113 : vector<8x256xf32>
    %115 = math.sin %114 : vector<8x256xf32>
    %c0_39 = arith.constant 0 : index
    %c32 = arith.constant 32 : index
    %c0_40 = arith.constant 0 : index
    %116 = vector.load %arg6[%c0_39, %c32, %c0_40] : memref<1x64x256xf32, #tpu.memory_space<vmem>>, vector<1x8x256xf32>
    %117 = vector.shape_cast %116 : vector<1x8x256xf32> to vector<8x256xf32>
    %118 = vector.shape_cast %115 : vector<8x256xf32> to vector<1x8x256xf32>
    tpu.vector_store %arg6[%c0_39, %c32, %c0_40], %118 {strides = array<i32>} : memref<1x64x256xf32, #tpu.memory_space<vmem>>, vector<1x8x256xf32>,
    %119 = vector.extract_strided_slice %97 {offsets = [8, 0], sizes = [8, 1], strides = [1, 1]} : vector<32x1xf32> to vector<8x1xf32>
    %120 = vector.extract_strided_slice %98 {offsets = [8, 0], sizes = [8, 1], strides = [1, 1]} : vector<32x1xf32> to vector<8x1xf32>
    %121 = vector.broadcast %96 : vector<1x256xf32> to vector<8x256xf32>
    %122 = vector.broadcast %119 : vector<8x1xf32> to vector<8x256xf32>
    %123 = arith.mulf %121, %122 : vector<8x256xf32>
    %124 = vector.broadcast %120 : vector<8x1xf32> to vector<8x256xf32>
    %125 = arith.addf %123, %124 : vector<8x256xf32>
    %126 = math.sin %125 : vector<8x256xf32>
    %c0_41 = arith.constant 0 : index
    %c8 = arith.constant 8 : index
    %c0_42 = arith.constant 0 : index
    %127 = vector.load %arg6[%c0_41, %c8, %c0_42] : memref<1x64x256xf32, #tpu.memory_space<vmem>>, vector<1x8x256xf32>
    %128 = vector.shape_cast %127 : vector<1x8x256xf32> to vector<8x256xf32>
    %129 = vector.shape_cast %126 : vector<8x256xf32> to vector<1x8x256xf32>
    tpu.vector_store %arg6[%c0_41, %c8, %c0_42], %129 {strides = array<i32>} : memref<1x64x256xf32, #tpu.memory_space<vmem>>, vector<1x8x256xf32>,
    %130 = vector.broadcast %91 : vector<1x256xf32> to vector<8x256xf32>
    %131 = vector.broadcast %119 : vector<8x1xf32> to vector<8x256xf32>
    %132 = arith.mulf %130, %131 : vector<8x256xf32>
    %133 = vector.broadcast %120 : vector<8x1xf32> to vector<8x256xf32>
    %134 = arith.addf %132, %133 : vector<8x256xf32>
    %135 = math.sin %134 : vector<8x256xf32>
    %c0_43 = arith.constant 0 : index
    %c40 = arith.constant 40 : index
    %c0_44 = arith.constant 0 : index
    %136 = vector.load %arg6[%c0_43, %c40, %c0_44] : memref<1x64x256xf32, #tpu.memory_space<vmem>>, vector<1x8x256xf32>
    %137 = vector.shape_cast %136 : vector<1x8x256xf32> to vector<8x256xf32>
    %138 = vector.shape_cast %135 : vector<8x256xf32> to vector<1x8x256xf32>
    tpu.vector_store %arg6[%c0_43, %c40, %c0_44], %138 {strides = array<i32>} : memref<1x64x256xf32, #tpu.memory_space<vmem>>, vector<1x8x256xf32>,
    %139 = vector.extract_strided_slice %97 {offsets = [16, 0], sizes = [8, 1], strides = [1, 1]} : vector<32x1xf32> to vector<8x1xf32>
    %140 = vector.extract_strided_slice %98 {offsets = [16, 0], sizes = [8, 1], strides = [1, 1]} : vector<32x1xf32> to vector<8x1xf32>
    %141 = vector.broadcast %96 : vector<1x256xf32> to vector<8x256xf32>
    %142 = vector.broadcast %139 : vector<8x1xf32> to vector<8x256xf32>
    %143 = arith.mulf %141, %142 : vector<8x256xf32>
    %144 = vector.broadcast %140 : vector<8x1xf32> to vector<8x256xf32>
    %145 = arith.addf %143, %144 : vector<8x256xf32>
    %146 = math.sin %145 : vector<8x256xf32>
    %c0_45 = arith.constant 0 : index
    %c16 = arith.constant 16 : index
    %c0_46 = arith.constant 0 : index
    %147 = vector.load %arg6[%c0_45, %c16, %c0_46] : memref<1x64x256xf32, #tpu.memory_space<vmem>>, vector<1x8x256xf32>
    %148 = vector.shape_cast %147 : vector<1x8x256xf32> to vector<8x256xf32>
    %149 = vector.shape_cast %146 : vector<8x256xf32> to vector<1x8x256xf32>
    tpu.vector_store %arg6[%c0_45, %c16, %c0_46], %149 {strides = array<i32>} : memref<1x64x256xf32, #tpu.memory_space<vmem>>, vector<1x8x256xf32>,
    %150 = vector.broadcast %91 : vector<1x256xf32> to vector<8x256xf32>
    %151 = vector.broadcast %139 : vector<8x1xf32> to vector<8x256xf32>
    %152 = arith.mulf %150, %151 : vector<8x256xf32>
    %153 = vector.broadcast %140 : vector<8x1xf32> to vector<8x256xf32>
    %154 = arith.addf %152, %153 : vector<8x256xf32>
    %155 = math.sin %154 : vector<8x256xf32>
    %c0_47 = arith.constant 0 : index
    %c48 = arith.constant 48 : index
    %c0_48 = arith.constant 0 : index
    %156 = vector.load %arg6[%c0_47, %c48, %c0_48] : memref<1x64x256xf32, #tpu.memory_space<vmem>>, vector<1x8x256xf32>
    %157 = vector.shape_cast %156 : vector<1x8x256xf32> to vector<8x256xf32>
    %158 = vector.shape_cast %155 : vector<8x256xf32> to vector<1x8x256xf32>
    tpu.vector_store %arg6[%c0_47, %c48, %c0_48], %158 {strides = array<i32>} : memref<1x64x256xf32, #tpu.memory_space<vmem>>, vector<1x8x256xf32>,
    %159 = vector.extract_strided_slice %97 {offsets = [24, 0], sizes = [8, 1], strides = [1, 1]} : vector<32x1xf32> to vector<8x1xf32>
    %160 = vector.extract_strided_slice %98 {offsets = [24, 0], sizes = [8, 1], strides = [1, 1]} : vector<32x1xf32> to vector<8x1xf32>
    %161 = vector.broadcast %96 : vector<1x256xf32> to vector<8x256xf32>
    %162 = vector.broadcast %159 : vector<8x1xf32> to vector<8x256xf32>
    %163 = arith.mulf %161, %162 : vector<8x256xf32>
    %164 = vector.broadcast %160 : vector<8x1xf32> to vector<8x256xf32>
    %165 = arith.addf %163, %164 : vector<8x256xf32>
    %166 = math.sin %165 : vector<8x256xf32>
    %c0_49 = arith.constant 0 : index
    %c24 = arith.constant 24 : index
    %c0_50 = arith.constant 0 : index
    %167 = vector.load %arg6[%c0_49, %c24, %c0_50] : memref<1x64x256xf32, #tpu.memory_space<vmem>>, vector<1x8x256xf32>
    %168 = vector.shape_cast %167 : vector<1x8x256xf32> to vector<8x256xf32>
    %169 = vector.shape_cast %166 : vector<8x256xf32> to vector<1x8x256xf32>
    tpu.vector_store %arg6[%c0_49, %c24, %c0_50], %169 {strides = array<i32>} : memref<1x64x256xf32, #tpu.memory_space<vmem>>, vector<1x8x256xf32>,
    %170 = vector.broadcast %91 : vector<1x256xf32> to vector<8x256xf32>
    %171 = vector.broadcast %159 : vector<8x1xf32> to vector<8x256xf32>
    %172 = arith.mulf %170, %171 : vector<8x256xf32>
    %173 = vector.broadcast %160 : vector<8x1xf32> to vector<8x256xf32>
    %174 = arith.addf %172, %173 : vector<8x256xf32>
    %175 = math.sin %174 : vector<8x256xf32>
    %c0_51 = arith.constant 0 : index
    %c56 = arith.constant 56 : index
    %c0_52 = arith.constant 0 : index
    %176 = vector.load %arg6[%c0_51, %c56, %c0_52] : memref<1x64x256xf32, #tpu.memory_space<vmem>>, vector<1x8x256xf32>
    %177 = vector.shape_cast %176 : vector<1x8x256xf32> to vector<8x256xf32>
    %178 = vector.shape_cast %175 : vector<8x256xf32> to vector<1x8x256xf32>
    tpu.vector_store %arg6[%c0_51, %c56, %c0_52], %178 {strides = array<i32>} : memref<1x64x256xf32, #tpu.memory_space<vmem>>, vector<1x8x256xf32>,
    return
  }
  func.func @transform_0(%arg0: i32) -> (i32, i32, i32) {
    %c0_i32 = arith.constant 0 : i32
    %c0_i32_0 = arith.constant 0 : i32
    %c0_i32_1 = arith.constant 0 : i32
    return %arg0, %c0_i32, %c0_i32_0 : i32, i32, i32
  }
  func.func @transform_1(%arg0: i32) -> (i32, i32) {
    %c0_i32 = arith.constant 0 : i32
    %c0_i32_0 = arith.constant 0 : i32
    %c0_i32_1 = arith.constant 0 : i32
    return %c0_i32, %c0_i32_0 : i32, i32
  }
  func.func @transform_2(%arg0: i32) -> (i32, i32) {
    %c0_i32 = arith.constant 0 : i32
    %c0_i32_0 = arith.constant 0 : i32
    %c0_i32_1 = arith.constant 0 : i32
    return %c0_i32, %c0_i32_0 : i32, i32
  }
  func.func @transform_3(%arg0: i32) -> (i32, i32) {
    %c0_i32 = arith.constant 0 : i32
    %c0_i32_0 = arith.constant 0 : i32
    %c0_i32_1 = arith.constant 0 : i32
    return %c0_i32, %c0_i32_0 : i32, i32
  }
  func.func @transform_4(%arg0: i32) -> (i32, i32) {
    %c0_i32 = arith.constant 0 : i32
    %c0_i32_0 = arith.constant 0 : i32
    %c0_i32_1 = arith.constant 0 : i32
    return %c0_i32, %c0_i32_0 : i32, i32
  }
  func.func @transform_5(%arg0: i32) -> (i32, i32, i32) {
    %c0_i32 = arith.constant 0 : i32
    %c0_i32_0 = arith.constant 0 : i32
    %c0_i32_1 = arith.constant 0 : i32
    return %arg0, %c0_i32, %c0_i32_0 : i32, i32, i32
  }
}

</mosaic_0001>

<bundles_post_ra>
// kernel: tpu_custom_call.1
= control target key start
LH: loop header
LB: loop body
LE: loop exit
PB: predicated region body
PF: predicated region fallthrough
CT: control target
= control target key end

     0   :  { %10 = vsyncpa [#allocation3], 0  ;;  %s4602_s0 = inlined_call_operand.vmem [shape: s32[2,1,256], index: 0, kind: input, shape index: {}]   ;;  %s4603_s1 = inlined_call_operand.vmem [shape: s32[1,256], index: 1, kind: input, shape index: {}]   ;;  %s4604_s2 = inlined_call_operand.vmem [shape: s32[1,256], index: 2, kind: input, shape index: {}]   ;;  %s4605_s3 = inlined_call_operand.vmem [shape: f32[32,1], index: 3, kind: input, shape index: {}]   ;;  %s4606_s4 = inlined_call_operand.vmem [shape: f32[32,1], index: 4, kind: input, shape index: {}]   ;;  %s4607_s5 = inlined_call_operand.hbm [shape: f32[2,64,256], index: 5, kind: output, shape index: {}]  }
   0x1   :  { %12 = vsyncpa [#allocation3 + $0x1], 0  ;;  %s3063_s18 = smov 0   ;;  %s3065_s19 = smov 0  }
   0x2   :  { %s3067_s20 = smov 0   ;;  %s3069_s21 = smov 0  }
   0x3 LB: > { %s3084_s22 = sadd.s32 4294967295, %s3008_s21   ;;  %s2675_s23 = sadd.s32 4294967294, %s3008_s21   ;;  %s3008_s21 = sphi %s3069_s21, %s4641_s21   ;;  %s3004_s20 = sphi %s3067_s20, %s4640_s20   ;;  %s3000_s19 = sphi %s3065_s19, %s4639_s19   ;;  %s2996_s18 = sphi %s3063_s18, %s4638_s18  }
   0x4   : > { %s3088_s24 = sadd.s32 1, %s3008_s21   ;;  %s135_s25 = sadd.s32 1, %s3004_s20 }
   0x5   : > { %s132_s26 = ssub.s32 %s3008_s21, %s3088_s24  ;;  %p145_p0 = scmp.ne.s32.totalorder %s3004_s20, %s3000_s19 }
   0x6   : > { %p133_p1 = scmp.eq.s32.totalorder %s132_s26, 0  ;;  %p146_p2 = scmp.eq.s32.totalorder %s3084_s22, 1 }
   0x7   : > { %p151_p3 = scmp.ne.s32.totalorder %s3000_s19, %s2996_s18  ;;  %p152_p4 = scmp.eq.s32.totalorder %s2675_s23, 1 }
   0x8   : > { %s3099_s27 = scalar_select %p133_p1, %s3004_s20, %s135_s25  }
   0x9   : > { %p3101_p5 = por %p146_p2, %p145_p0  ;;  %p3105_p6 = por %p152_p4, %p151_p3 }
   0xa   : > { %p2678_p7 = scmp.ge.s32.totalorder %s3008_s21, 1  ;;  %p189_p8 = scmp.lt.s32.totalorder %s3008_s21, 3 }
   0xc   : > { %p190_p9 = pnand %p2678_p7, %p189_p8 }
   0xd   : > { %p216_p10 = scmp.lt.s32.totalorder (!%p190_p9), %s3084_s22, 1  ;;  %v226_v0 = vlaneseq (!%p190_p9)  ;;  %s3010_s10 = smov (!%p190_p9), 1   ;;  %v3012_v9 = vmov (!%p190_p9), 1966171168   ;;  %v3131_v19 = vld [vmem:[%s4603_s1] sm:$0x3] (!%p190_p9) }
   0xe   : > { %193 = sbr.rel (%p190_p9) target bundleno = 1515 (0x5eb), region = 40  ;;  %s3011_s11 = smov (!%p190_p9), 16   ;;  %v250_v10 = vunpack.c.l.s4 (!%p190_p9), %v3012_v9  ;;  %vm245_vm1 = vcmp.ge.s32.totalorder (!%p190_p9), %v3131_v19, 1  ;;  %vm284_vm4 = vcmp.ge.s32.totalorder (!%p190_p9), %v3131_v19, 2  ;;  %v3147_v37 = vld [vmem:[%s4604_s2] sm:$0x3] (!%p190_p9) }
   0xf   : > { %v227_v1 = vshrl.u32 (!%p190_p9), %v226_v0, 7  ;;  %v3123_v11 = vand.u32 (!%p190_p9), 127, %v226_v0  ;;  %s3013_s14 = smov (!%p190_p9), 2   ;;  %vm390_vm5 = vcmp.ge.s32.totalorder (!%p190_p9), %v3147_v37, 1  ;;  %s3014_s17 = smov (!%p190_p9), 4   ;;  %vm323_vm8 = vcmp.ge.s32.totalorder (!%p190_p9), %v3131_v19, 4 }
  0x10   : > { %v251_v12 = vunpack.c.0.s8 (!%p190_p9), %v250_v10  ;;  %s3015_s23 = smov (!%p190_p9), 32   ;;  %vm429_vm9 = vcmp.ge.s32.totalorder (!%p190_p9), %v3147_v37, 2  ;;  %s3016_s25 = smov (!%p190_p9), 8   ;;  %vm362_vm12 = vcmp.ge.s32.totalorder (!%p190_p9), %v3131_v19, 8  ;;  %vm468_vm13 = vcmp.ge.s32.totalorder (!%p190_p9), %v3147_v37, 4 }
  0x11   : > { %v3116_v4 = vsub.s32 (!%p190_p9), 0, %v227_v1  ;;  %v3118_v6 = vsub.s32 (!%p190_p9), 1, %v227_v1  ;;  %vm242_vm0 = vcmp.lt.s32.totalorder (!%p190_p9), %v3123_v11, 1  ;;  %vm281_vm2 = vcmp.lt.s32.totalorder (!%p190_p9), %v3123_v11, 2  ;;  %s3017_s26 = smov (!%p190_p9), 64   ;;  %s3020_s7 = smov (!%p190_p9), 126  }
  0x12   : > { %v3126_v14 = vsub.s32 (!%p190_p9), %v251_v12, %v227_v1  ;;  %vm387_vm3 = vcmp.lt.s32.totalorder (!%p190_p9), %v3123_v11, 16  ;;  %vm320_vm6 = vcmp.lt.s32.totalorder (!%p190_p9), %v3123_v11, 4  ;;  %vm426_vm7 = vcmp.lt.s32.totalorder (!%p190_p9), %v3123_v11, 32  ;;  %s3021_s8 = smov (!%p190_p9), 96   ;;  %s213_s13 = sand.u32 (!%p190_p9), 1, %s3000_s19  }
  0x13   : > { %vm359_vm10 = vcmp.lt.s32.totalorder (!%p190_p9), %v3123_v11, 8  ;;  %vm465_vm11 = vcmp.lt.s32.totalorder (!%p190_p9), %v3123_v11, 64  ;;  %vm498_vm14 = vcmp.ge.s32.totalorder (!%p190_p9), %v3147_v37, 8  ;;  %vm532_vm15 = vcmp.lt.s32.totalorder (!%p190_p9), %v3123_v11, 127  ;;  %s2750_s16 = sshll.u32 (!%p190_p9), %s3084_s22, 11 }
  0x15   : > { %s217_s30 = scalar_select %p216_p10, %s3084_s22, 1 }
  0x16   : > { %s4560_s22 = scalar_lea.sflag [#allocation3], %s213_s13 }
  0x17   : > { %s2680_s6 = sshll.u32 %s217_s30, 1  ;;  %s3018_s30 = smov 127  }
  0x18   : > { %s219_s9 = scalar_lea.vmem %s4602_s0, %s2680_s6  ;;  %s3019_s6 = smov 112  }
  0x19   : > { %v220_v2 = vld [vmem:[%s219_s9] sm:$0x3]  ;;  %s3023_s9 = smov 124  }
  0x1a   : > { %v221_v3 = vsub.s32 1, %v220_v2 }
  0x1c   : > { %v222_v5 = vcvt.s32.f32 %v221_v3 }
  0x1e   : > { %v229_v7 = vrot.slane %v222_v5, %v3116_v4  ;;  %v233_v8 = vrot.slane %v222_v5, %v3118_v6 }
  0x20   : > { %236 = vrot.lane.b32.xlu0 %v229_v7, %s3010_s10 }
  0x24   : > { %238 = vrot.lane.b32.xlu0 %v233_v8, %s3010_s10  ;;  %s3024_s10 = smov 120  }
  0x28   : > { %383 = vrot.lane.b32.xlu0 %v229_v7, %s3011_s11 }
  0x92   : > { %v237_v13 = vpop.permute.xlu0 %236 }
  0x96   : > { %v239_v15 = vpop.permute.xlu0 %238 }
  0x97   : > { %v243_v16 = vsel %vm242_vm0, %v237_v13, %v239_v15  ;;  %v244_v17 = vsel %vm242_vm0, %v239_v15, %v237_v13  ;;  %vm535_vm0 = vcmp.lt.s32.totalorder %v3131_v19, 15 }
  0x98   : > { %v248_v18 = vcombine.low %v244_v17, %v243_v16 }
  0x9a   : > { %v255_v20 = vrot.slane %v248_v18, %v3126_v14  ;;  %v384_v31 = vpop.permute.xlu0 %383 }
  0x9c   : > { %v262_v21 = vrot.slane %v255_v20, %v3126_v14 }
  0x9e   : > { %v264_v22 = vsel %vm245_vm1, %v262_v21, 0.0  ;;  %vm684_vm1 = vcmp.lt.s32.totalorder %v3123_v11, 112 }
  0x9f   : > { %v265_v23 = vadd.f32 %v264_v22, %v222_v5 }
  0xa1   : > { %v270_v24 = vrot.slane %v265_v23, %v3116_v4  ;;  %v274_v25 = vrot.slane %v265_v23, %v3118_v6 }
  0xa3   : > { %277 = vrot.lane.b32.xlu1 %v270_v24, %s3013_s14 }
  0xa7   : > { %279 = vrot.lane.b32.xlu1 %v274_v25, %s3013_s14  ;;  %s2679_s14 = sshll.u32 %s213_s13, 7 }
  0xa8   : > { %s3591_s15 = scalar_lea.vmem [#allocation2], %s2679_s14 }
  0xab   : > { %385 = vrot.lane.b32.xlu1 %v233_v8, %s3011_s11 }
 0x115   : > { %v278_v26 = vpop.permute.xlu1 %277 }
 0x119   : > { %v280_v27 = vpop.permute.xlu1 %279 }
 0x11a   : > { %v282_v28 = vsel %vm281_vm2, %v278_v26, %v280_v27  ;;  %v283_v29 = vsel %vm281_vm2, %v280_v27, %v278_v26  ;;  %vm687_vm2 = vcmp.lt.s32.totalorder %v3147_v37, 15 }
 0x11b   : > { %v287_v30 = vcombine.low %v283_v29, %v282_v28 }
 0x11d   : > { %v294_v32 = vrot.slane %v287_v30, %v3126_v14  ;;  %v386_v33 = vpop.permute.xlu1 %385 }
 0x11e   : > { %v388_v34 = vsel %vm387_vm3, %v384_v31, %v386_v33  ;;  %v389_v35 = vsel %vm387_vm3, %v386_v33, %v384_v31  ;;  %vm570_vm3 = vcmp.lt.s32.totalorder %v3123_v11, 126 }
 0x11f   : > { %v301_v36 = vrot.slane %v294_v32, %v3126_v14  ;;  %v393_v38 = vcombine.low %v389_v35, %v388_v34 }
 0x121   : > { %v303_v39 = vsel %vm284_vm4, %v301_v36, 0.0  ;;  %v400_v40 = vrot.slane %v393_v38, %v3126_v14  ;;  %vm573_vm4 = vcmp.lt.s32.totalorder %v3131_v19, 14 }
 0x122   : > { %v304_v41 = vadd.f32 %v303_v39, %v265_v23 }
 0x123   : > { %v407_v42 = vrot.slane %v400_v40, %v3126_v14 }
 0x124   : > { %v313_v43 = vrot.slane %v304_v41, %v3118_v6  ;;  %v309_v44 = vrot.slane %v304_v41, %v3116_v4 }
 0x125   : > { %v409_v45 = vsel %vm390_vm5, %v407_v42, 0.0  ;;  %vm722_vm5 = vcmp.lt.s32.totalorder %v3123_v11, 96 }
 0x126   : > { %318 = vrot.lane.b32.xlu1 %v313_v43, %s3014_s17  ;;  %316 = vrot.lane.b32.xlu0 %v309_v44, %s3014_s17  ;;  %v410_v46 = vadd.f32 %v409_v45, %v222_v5  ;;  %s2613_s17 = sshll.u32 %s3591_s15, 4  ;;  %s4555_s17 = int_to_ptr.vmem [resolvable:$true] %s2613_s17 }
 0x128   : > { %v419_v47 = vrot.slane %v410_v46, %v3118_v6  ;;  %v415_v48 = vrot.slane %v410_v46, %v3116_v4 }
 0x12a   : > { %424 = vrot.lane.b32.xlu1 %v419_v47, %s3015_s23  ;;  %422 = vrot.lane.b32.xlu0 %v415_v48, %s3015_s23 }
 0x198   : > { %v319_v49 = vpop.permute.xlu1 %318  ;;  %v317_v50 = vpop.permute.xlu0 %316 }
 0x199   : > { %v321_v51 = vsel %vm320_vm6, %v317_v50, %v319_v49  ;;  %v322_v52 = vsel %vm320_vm6, %v319_v49, %v317_v50  ;;  %vm725_vm6 = vcmp.lt.s32.totalorder %v3147_v37, 14 }
 0x19a   : > { %v326_v53 = vcombine.low %v322_v52, %v321_v51 }
 0x19c   : > { %v333_v54 = vrot.slane %v326_v53, %v3126_v14  ;;  %v425_v55 = vpop.permute.xlu1 %424  ;;  %v423_v56 = vpop.permute.xlu0 %422 }
 0x19d   : > { %v427_v57 = vsel %vm426_vm7, %v423_v56, %v425_v55  ;;  %v428_v58 = vsel %vm426_vm7, %v425_v55, %v423_v56  ;;  %vm608_vm7 = vcmp.lt.s32.totalorder %v3123_v11, 124 }
 0x19e   : > { %v340_v59 = vrot.slane %v333_v54, %v3126_v14  ;;  %v432_v60 = vcombine.low %v428_v58, %v427_v57 }
 0x1a0   : > { %v342_v61 = vsel %vm323_vm8, %v340_v59, 0.0  ;;  %v439_v62 = vrot.slane %v432_v60, %v3126_v14  ;;  %vm611_vm8 = vcmp.lt.s32.totalorder %v3131_v19, 12 }
 0x1a1   : > { %v343_v63 = vadd.f32 %v342_v61, %v304_v41 }
 0x1a2   : > { %v446_v0 = vrot.slane %v439_v62, %v3126_v14 }
 0x1a3   : > { %v352_v1 = vrot.slane %v343_v63, %v3118_v6  ;;  %v348_v2 = vrot.slane %v343_v63, %v3116_v4 }
 0x1a4   : > { %v448_v3 = vsel %vm429_vm9, %v446_v0, 0.0  ;;  %vm762_vm9 = vcmp.lt.s32.totalorder %v3147_v37, 12 }
 0x1a5   : > { %357 = vrot.lane.b32.xlu1 %v352_v1, %s3016_s25  ;;  %355 = vrot.lane.b32.xlu0 %v348_v2, %s3016_s25  ;;  %v449_v5 = vadd.f32 %v448_v3, %v410_v46 }
 0x1a7   : > { %v458_v7 = vrot.slane %v449_v5, %v3118_v6  ;;  %v454_v8 = vrot.slane %v449_v5, %v3116_v4 }
 0x1a9   : > { %463 = vrot.lane.b32.xlu1 %v458_v7, %s3017_s26  ;;  %461 = vrot.lane.b32.xlu0 %v454_v8, %s3017_s26 }
 0x217   : > { %v358_v9 = vpop.permute.xlu1 %357  ;;  %v356_v10 = vpop.permute.xlu0 %355 }
 0x218   : > { %v360_v12 = vsel %vm359_vm10, %v356_v10, %v358_v9  ;;  %v361_v13 = vsel %vm359_vm10, %v358_v9, %v356_v10  ;;  %v3022_v10 = vmov 0   ;;  %vm791_vm10 = vcmp.lt.s32.totalorder %v3147_v37, 8 }
 0x219   : > { %v365_v15 = vcombine.low %v361_v13, %v360_v12  ;;  %2877 = vset.pattern.permute.xlu1 %v3022_v10  ;;  %2876 = vset.pattern.permute.xlu0 %v3022_v10 }
 0x21b   : > { %v372_v16 = vrot.slane %v365_v15, %v3126_v14  ;;  %v464_v17 = vpop.permute.xlu1 %463  ;;  %v462_v18 = vpop.permute.xlu0 %461 }
 0x21c   : > { %v466_v20 = vsel %vm465_vm11, %v462_v18, %v464_v17  ;;  %v467_v21 = vsel %vm465_vm11, %v464_v17, %v462_v18 }
 0x21d   : > { %v379_v22 = vrot.slane %v372_v16, %v3126_v14  ;;  %v471_v23 = vcombine.low %v467_v21, %v466_v20 }
 0x21f   : > { %v381_v24 = vsel %vm362_vm12, %v379_v22, 0.0  ;;  %v478_v25 = vrot.slane %v471_v23, %v3126_v14  ;;  %vm649_vm12 = vcmp.lt.s32.totalorder %v3131_v19, 8 }
 0x220   : > { %v3180_v26 = vadd.f32 %v381_v24, %v343_v63 }
 0x221   : > { %v485_v27 = vrot.slane %v478_v25, %v3126_v14 }
 0x222   : > { %v525_v28 = vrot.slane %v3180_v26, %v3118_v6  ;;  %v521_v29 = vrot.slane %v3180_v26, %v3116_v4 }
 0x223   : > { %v487_v30 = vsel %vm468_vm13, %v485_v27, 0.0 }
 0x224   : > { %v488_v31 = vadd.f32 %v487_v30, %v449_v5  ;;  %530 = vrot.lane.b32.xlu1 %v525_v28, %s3018_s30  ;;  %528 = vrot.lane.b32.xlu0 %v521_v29, %s3018_s30  ;;  %s2946_s30 = scalar_lea.vmem %s4555_s17, 2048 }
 0x225   : > { %p2947_p11 = scmp.ne.s32.totalorder %s4555_s17, %s2946_s30 }
 0x226   : > { %v493_v32 = vrot.slane %v488_v31, %v3116_v4  ;;  %v497_v33 = vrot.slane %v488_v31, %v3118_v6 }
 0x227   : > { %p2948_p12 = pnand %p2947_p11, %p3101_p5 }
 0x228   : > { %v499_v34 = vcombine.low %v497_v33, %v493_v32 }
 0x229   : > { %p2949_p13 = pneg %p2948_p12 }
 0x22a   : > { %v506_v35 = vrot.slane %v499_v34, %v3126_v14 }
 0x22c   : > { %v513_v36 = vrot.slane %v506_v35, %v3126_v14  ;;  %v818_v35 = vld [vmem:[%s4605_s3 + $0x8] sm:$0xff] }
 0x22e   : > { %v515_v38 = vsel %vm498_vm14, %v513_v36, 0.0  ;;  %v817_v36 = vld [vmem:[%s4605_s3] sm:$0xff] }
 0x22f   : > { %v3193_v39 = vadd.f32 %v515_v38, %v488_v31  ;;  %v819_v38 = vld [vmem:[%s4605_s3 + $0x10] sm:$0xff] }
 0x231   : > { %v677_v40 = vrot.slane %v3193_v39, %v3118_v6  ;;  %v673_v41 = vrot.slane %v3193_v39, %v3116_v4 }
 0x233   : > { %682 = vrot.lane.b32.xlu1 %v677_v40, %s3019_s6  ;;  %680 = vrot.lane.b32.xlu0 %v673_v41, %s3019_s6  ;;  %v820_v40 = vld [vmem:[%s4605_s3 + $0x18] sm:$0xff]  ;;  %v821_v41 = vld [vmem:[%s4606_s4] sm:$0xff]  ;;  %s3031_s6 = smov [#allocation2]  }
 0x296   : > { %v531_v42 = vpop.permute.xlu1 %530  ;;  %v529_v43 = vpop.permute.xlu0 %528 }
 0x297   : > { %v533_v44 = vsel %vm532_vm15, %v529_v43, %v531_v42  ;;  %v534_v45 = vsel %vm532_vm15, %v531_v42, %v529_v43  ;;  %v822_v42 = vld [vmem:[%s4606_s4 + $0x8] sm:$0xff]  ;;  %v823_v43 = vld [vmem:[%s4606_s4 + $0x10] sm:$0xff] }
 0x298   : > { %v538_v46 = vcombine.low %v533_v44, %v534_v45  ;;  %v824_v44 = vld [vmem:[%s4606_s4 + $0x18] sm:$0xff] }
 0x29a   : > { %v545_v47 = vrot.slane %v538_v46, %v3126_v14 }
 0x29c   : > { %v552_v48 = vrot.slane %v545_v47, %v3126_v14 }
 0x29e   : > { %v554_v49 = vsel %vm535_vm0, %v552_v48, %v3180_v26 }
 0x29f   : > { %v563_v50 = vrot.slane %v554_v49, %v3118_v6  ;;  %v559_v51 = vrot.slane %v554_v49, %v3116_v4 }
 0x2a1   : > { %568 = vrot.lane.b32.xlu1 %v563_v50, %s3020_s7  ;;  %566 = vrot.lane.b32.xlu0 %v559_v51, %s3020_s7  ;;  %s2950_s7 = sshll.u32 %s3031_s6, 4  ;;  %s2951_s7 = int_to_ptr.vmem [resolvable:$false] %s2950_s7 }
 0x2a2   : > { %p2953_p0 = scmp.lt.s32.totalorder %s4555_s17, %s2951_s7 }
 0x2a5   : > { %v683_v52 = vpop.permute.xlu1 %682  ;;  %v681_v53 = vpop.permute.xlu0 %680 }
 0x2a6   : > { %v685_v54 = vsel %vm684_vm1, %v681_v53, %v683_v52  ;;  %v686_v55 = vsel %vm684_vm1, %v683_v52, %v681_v53 }
 0x2a7   : > { %v690_v56 = vcombine.low %v685_v54, %v686_v55 }
 0x2a9   : > { %v697_v57 = vrot.slane %v690_v56, %v3126_v14 }
 0x2ab   : > { %v704_v58 = vrot.slane %v697_v57, %v3126_v14 }
 0x2ad   : > { %v706_v59 = vsel %vm687_vm2, %v704_v58, %v3193_v39 }
 0x2ae   : > { %v715_v60 = vrot.slane %v706_v59, %v3118_v6  ;;  %v711_v61 = vrot.slane %v706_v59, %v3116_v4 }
 0x2b0   : > { %720 = vrot.lane.b32.xlu1 %v715_v60, %s3021_s8  ;;  %718 = vrot.lane.b32.xlu0 %v711_v61, %s3021_s8  ;;  %s2952_s8 = scalar_lea.vmem %s2951_s7, 4096 }
 0x2b1   : > { %p2954_p1 = scmp.lt.s32.totalorder %s2952_s8, %s2946_s30 }
 0x2b3   : > { %p2955_p2 = por %p2954_p1, %p2953_p0 }
 0x2b5   : > { %p2956_p3 = pnand %p2955_p2, %p2949_p13 }
 0x313   : > { %v569_v62 = vpop.permute.xlu1 %568  ;;  %v567_v63 = vpop.permute.xlu0 %566 }
 0x314   : > { %v571_v0 = vsel %vm570_vm3, %v567_v63, %v569_v62  ;;  %v572_v1 = vsel %vm570_vm3, %v569_v62, %v567_v63 }
 0x315   : > { %v576_v2 = vcombine.low %v571_v0, %v572_v1 }
 0x317   : > { %v583_v3 = vrot.slane %v576_v2, %v3126_v14 }
 0x319   : > { %v590_v5 = vrot.slane %v583_v3, %v3126_v14 }
 0x31b   : > { %v592_v7 = vsel %vm573_vm4, %v590_v5, %v554_v49 }
 0x31c   : > { %v601_v8 = vrot.slane %v592_v7, %v3118_v6  ;;  %v597_v9 = vrot.slane %v592_v7, %v3116_v4 }
 0x31e   : > { %606 = vrot.lane.b32.xlu1 %v601_v8, %s3023_s9  ;;  %604 = vrot.lane.b32.xlu0 %v597_v9, %s3023_s9 }
 0x322   : > { %v721_v12 = vpop.permute.xlu1 %720  ;;  %v719_v13 = vpop.permute.xlu0 %718 }
 0x323   : > { %v723_v15 = vsel %vm722_vm5, %v719_v13, %v721_v12  ;;  %v724_v16 = vsel %vm722_vm5, %v721_v12, %v719_v13 }
 0x324   : > { %v728_v17 = vcombine.low %v723_v15, %v724_v16 }
 0x326   : > { %v735_v18 = vrot.slane %v728_v17, %v3126_v14 }
 0x328   : > { %v742_v20 = vrot.slane %v735_v18, %v3126_v14 }
 0x32a   : > { %v744_v21 = vsel %vm725_vm6, %v742_v20, %v706_v59 }
 0x32b   : > { %v753_v22 = vrot.slane %v744_v21, %v3118_v6  ;;  %v749_v23 = vrot.slane %v744_v21, %v3116_v4 }
 0x32d   : > { %758 = vrot.lane.b32.xlu1 %v753_v22, %s3017_s26  ;;  %756 = vrot.lane.b32.xlu0 %v749_v23, %s3017_s26  ;;  %s4552_s26 = scalar_lea.hbm %s4607_s5, %s2750_s16 }
 0x390   : > { %v607_v24 = vpop.permute.xlu1 %606  ;;  %v605_v25 = vpop.permute.xlu0 %604 }
 0x391   : > { %v609_v27 = vsel %vm608_vm7, %v605_v25, %v607_v24  ;;  %v610_v28 = vsel %vm608_vm7, %v607_v24, %v605_v25 }
 0x392   : > { %v614_v29 = vcombine.low %v609_v27, %v610_v28 }
 0x394   : > { %v621_v30 = vrot.slane %v614_v29, %v3126_v14 }
 0x396   : > { %v628_v31 = vrot.slane %v621_v30, %v3126_v14 }
 0x398   : > { %v630_v32 = vsel %vm611_vm8, %v628_v31, %v592_v7 }
 0x399   : > { %v639_v33 = vrot.slane %v630_v32, %v3118_v6  ;;  %v635_v34 = vrot.slane %v630_v32, %v3116_v4 }
 0x39b   : > { %644 = vrot.lane.b32.xlu1 %v639_v33, %s3024_s10  ;;  %642 = vrot.lane.b32.xlu0 %v635_v34, %s3024_s10 }
 0x39f   : > { %1287 = vperm.xlu1 %2877, %v818_v35   ;;  %838 = vperm.xlu0 %2876, %v817_v36   ;;  %v759_v45 = vpop.permute.xlu1 %758  ;;  %v757_v46 = vpop.permute.xlu0 %756 }
 0x3a0   : > { %v760_v47 = vsel %vm465_vm11, %v757_v46, %v759_v45  ;;  %v761_v48 = vsel %vm465_vm11, %v759_v45, %v757_v46  ;;  %vm646_vm11 = vcmp.lt.s32.totalorder %v3123_v11, 120 }
 0x3a1   : > { %v765_v49 = vcombine.low %v760_v47, %v761_v48 }
 0x3a3   : > { %1725 = vperm.xlu1 %2877, %v819_v38   ;;  %2163 = vperm.xlu0 %2876, %v820_v40   ;;  %v772_v50 = vrot.slane %v765_v49, %v3126_v14 }
 0x3a5   : > { %v779_v51 = vrot.slane %v772_v50, %v3126_v14 }
 0x3a7   : > { %845 = vperm.xlu1 %2877, %v821_v41   ;;  %1294 = vperm.xlu0 %2876, %v822_v42   ;;  %v781_v52 = vsel %vm762_vm9, %v779_v51, %v744_v21 }
 0x3a8   : > { %v786_v53 = vrot.slane %v781_v52, %v3116_v4  ;;  %v790_v54 = vrot.slane %v781_v52, %v3118_v6 }
 0x3aa   : > { %v792_v55 = vcombine.low %v790_v54, %v786_v53  ;;  %v3025_v54 = vmov 683565275  }
 0x3ab   : > { %1732 = vperm.xlu1 %2877, %v823_v43   ;;  %2170 = vperm.xlu0 %2876, %v824_v44  }
 0x3ac   : > { %v799_v56 = vrot.slane %v792_v55, %v3126_v14 }
 0x3ae   : > { %v806_v57 = vrot.slane %v799_v56, %v3126_v14 }
 0x3b0   : > { %v808_v58 = vsel %vm791_vm10, %v806_v57, %v781_v52 }
 0x3b1   : > { %v813_v59 = vadd.f32 1e-06, %v808_v58  ;;  %v3026_v58 = vmov 2475754826  }
 0x3b3   : > { %2878 = vrcp.f32 %v813_v59 }
 0x3bd   : > { %v2879_v7 = vpop.eup %2878 }
 0x3be   : > { %v815_v37 = vmul.f32 6.2831855, %v2879_v7 }
 0x3c0   : > { %v816_v11 = vmul.f32 %v815_v37, %v3193_v39 }
 0x3c2   : > { %v3279_v15 = vrot.slane %v816_v11, %v3116_v4  ;;  %v3282_v19 = vrot.slane %v816_v11, %v3118_v6  ;;  %v3030_v11 = vmov 1326507024  }
 0x40d   : > { %v645_v60 = vpop.permute.xlu1 %644  ;;  %v643_v61 = vpop.permute.xlu0 %642 }
 0x40e   : > { %v647_v62 = vsel %vm646_vm11, %v643_v61, %v645_v60  ;;  %v648_v63 = vsel %vm646_vm11, %v645_v60, %v643_v61  ;;  %v3027_v60 = vmov 2131351028  }
 0x40f   : > { %v652_v0 = vcombine.low %v647_v62, %v648_v63  ;;  %v3028_v62 = vmov 2102212464  }
 0x411   : > { %v659_v1 = vrot.slane %v652_v0, %v3126_v14  ;;  %v3029_v0 = vmov 920167782  }
 0x413   : > { %v666_v2 = vrot.slane %v659_v1, %v3126_v14 }
 0x415   : > { %v668_v3 = vsel %vm649_vm12, %v666_v2, %v630_v32 }
 0x416   : > { %v809_v5 = vadd.f32 1e-06, %v668_v3 }
 0x418   : > { %2880 = vrcp.f32 %v809_v5 }
 0x41e   : > { %v3273_v8 = vpop.permute.xlu1 %1287  ;;  %v839_v10 = vpop.permute.xlu0 %838 }
 0x41f   : > { %v841_v16 = vmul.f32 %v839_v10, %v3279_v15  ;;  %v842_v17 = vmul.f32 %v839_v10, %v3282_v19 }
 0x422   : > { %v2881_v9 = vpop.eup %2880  ;;  %v3276_v12 = vpop.permute.xlu1 %1725 }
 0x423   : > { %v811_v13 = vmul.f32 6.2831855, %v2881_v9 }
 0x425   : > { %v812_v14 = vmul.f32 %v811_v13, %v3180_v26 }
 0x426   : > { %v846_v18 = vpop.permute.xlu1 %845 }
 0x427   : > { %v3288_v39 = vrot.slane %v812_v14, %v3116_v4  ;;  %v3290_v20 = vadd.f32 %v846_v18, %v841_v16  ;;  %v3292_v21 = vadd.f32 %v846_v18, %v842_v17  ;;  %v3300_v27 = vrot.slane %v812_v14, %v3118_v6 }
 0x429   : > { %v1071_v22 = vmul.f32 %v3288_v39, %v839_v10  ;;  %v850_v23 = vand.u32 2147483647, %v3290_v20  ;;  %v853_v24 = vand.u32 2139095040, %v3290_v20  ;;  %v954_v26 = vand.u32 2147483647, %v3292_v21 }
 0x42a   : > { %v957_v25 = vand.u32 2139095040, %v3292_v21  ;;  %v1072_v35 = vmul.f32 %v3300_v27, %v839_v10  ;;  %vm852_vm10 = vcmp.lt.s32.totalorder %v3290_v20, 0  ;;  %vm956_vm12 = vcmp.lt.s32.totalorder %v3292_v21, 0 }
 0x42b   : > { %v854_v28 = vshrl.u32 %v853_v24, 23  ;;  %v857_v4 = vand.u32 8388607, %v850_v23  ;;  %v3304_v29 = vadd.f32 %v1071_v22, %v846_v18  ;;  %v961_v31 = vand.u32 8388607, %v954_v26 }
 0x42c   : > { %v958_v30 = vshrl.u32 %v957_v25, 23  ;;  %v3311_v48 = vadd.f32 %v1072_v35, %v846_v18  ;;  %vm3422_vm11 = vcmp.le.f32.partialorder %v850_v23, 0.7853982 }
 0x42d   : > { %v2681_v32 = vadd.s32 4294967169, %v854_v28  ;;  %v1078_v34 = vand.u32 2139095040, %v3304_v29  ;;  %v858_v36 = vor.u32 8388608, %v857_v4  ;;  %v962_v6 = vor.u32 8388608, %v961_v31 }
 0x42e   : > { %v2685_v33 = vadd.s32 4294967169, %v958_v30  ;;  %v1075_v41 = vand.u32 2147483647, %v3304_v29 }
 0x42f   : > { %v860_v38 = vadd.s32 1, %v2681_v32  ;;  %v1079_v42 = vshrl.u32 %v1078_v34, 23  ;;  %v3313_v49 = vshll.u32 %v858_v36, 8  ;;  %v3317_v51 = vshll.u32 %v962_v6, 8 }
 0x430   : > { %v964_v40 = vadd.s32 1, %v2685_v33  ;;  %v3321_v52 = vand.u32 8388607, %v1075_v41 }
 0x431   : > { %vm861_vm13 = vcmp.gt.s32.totalorder %v860_v38, 0  ;;  %v2689_v44 = vadd.s32 4294967169, %v1079_v42 }
 0x432   : > { %v862_v43 = vsel %vm861_vm13, %v860_v38, 0  ;;  %vm965_vm14 = vcmp.gt.s32.totalorder %v964_v40, 0 }
 0x433   : > { %v863_v45 = vshrl.u32 %v862_v43, 5  ;;  %v864_v46 = vand.u32 31, %v862_v43  ;;  %v966_v47 = vsel %vm965_vm14, %v964_v40, 0  ;;  %v3324_v57 = vadd.s32 1, %v2689_v44 }
 0x434   : > { %v3315_v50 = vshrl.u32 %v966_v47, 5  ;;  %v968_v56 = vand.u32 31, %v966_v47 }
 0x435   : > { %v865_v53 = vsub.s32 32, %v864_v46  ;;  %v867_v55 = vshll.u32 %v3025_v54, %v864_v46  ;;  %v870_v59 = vshll.u32 %v3026_v58, %v864_v46  ;;  %v873_v61 = vshll.u32 %v3027_v60, %v864_v46 }
 0x436   : > { %v876_v63 = vshll.u32 %v3028_v62, %v864_v46  ;;  %v879_v1 = vshll.u32 %v3029_v0, %v864_v46  ;;  %vm882_vm15 = vcmp.lt.s32.totalorder %v863_v45, 1  ;;  %vm883_vm0 = vcmp.lt.s32.totalorder %v863_v45, 2 }
 0x437   : > { %v868_v2 = vshrl.u32 %v3026_v58, %v865_v53  ;;  %v871_v3 = vshrl.u32 %v3027_v60, %v865_v53  ;;  %v874_v5 = vshrl.u32 %v3028_v62, %v865_v53  ;;  %v866_v7 = vshrl.u32 %v3025_v54, %v865_v53 }
 0x438   : > { %v877_v37 = vshrl.u32 %v3029_v0, %v865_v53  ;;  %v880_v9 = vshrl.u32 %v3030_v11, %v865_v53  ;;  %v969_v16 = vsub.s32 32, %v968_v56  ;;  %vm884_vm1 = vcmp.lt.s32.totalorder %v863_v45, 3 }
 0x439   : > { %v869_v10 = vor.u32 %v868_v2, %v867_v55  ;;  %v872_v13 = vor.u32 %v871_v3, %v870_v59  ;;  %v875_v14 = vor.u32 %v874_v5, %v873_v61  ;;  %vm885_vm2 = vcmp.lt.s32.totalorder %v863_v45, 4 }
 0x43a   : > { %v878_v17 = vor.u32 %v877_v37, %v876_v63  ;;  %v881_v18 = vor.u32 %v880_v9, %v879_v1  ;;  %v971_v32 = vshll.u32 %v3025_v54, %v968_v56  ;;  %v972_v35 = vshrl.u32 %v3026_v58, %v969_v16 }
 0x43b   : > { %v886_v22 = vsel %vm882_vm15, %v866_v7, %v869_v10  ;;  %v887_v24 = vsel %vm885_vm2, %v875_v14, 2102212464  ;;  %v890_v25 = vsel %vm882_vm15, %v869_v10, %v872_v13  ;;  %v894_v28 = vsel %vm882_vm15, %v872_v13, %v875_v14 }
 0x43c   : > { %v888_v4 = vsel %vm884_vm1, %v872_v13, %v887_v24  ;;  %v891_v30 = vsel %vm885_vm2, %v878_v17, 920167782  ;;  %v895_v31 = vsel %vm885_vm2, %v881_v18, 1326507024  ;;  %v974_v36 = vshll.u32 %v3026_v58, %v968_v56 }
 0x43d   : > { %v892_v33 = vsel %vm884_vm1, %v875_v14, %v891_v30  ;;  %v896_v34 = vsel %vm884_vm1, %v878_v17, %v895_v31  ;;  %v889_v38 = vsel %vm883_vm0, %v886_v22, %v888_v4  ;;  %v975_v42 = vshrl.u32 %v3027_v60, %v969_v16 }
 0x43e   : > { %v893_v6 = vsel %vm883_vm0, %v890_v25, %v892_v33  ;;  %v897_v40 = vsel %vm883_vm0, %v894_v28, %v896_v34  ;;  %v973_v53 = vor.u32 %v972_v35, %v971_v32  ;;  %v977_v59 = vshll.u32 %v3027_v60, %v968_v56 }
 0x43f   : > { %v3347_v43 = vmul.u32.u64.low %v3313_v49, %v897_v40  ;;  %v3348_v44 = vmul.u32.u64.high %v3313_v49, %v897_v40, %v3347_v43  ;;  %v3351_v46 = vmul.u32.u64.low %v3313_v49, %v893_v6  ;;  %v3352_v47 = vmul.u32.u64.high %v3313_v49, %v893_v6, %v3351_v46 }
 0x440   : > { %v976_v55 = vor.u32 %v975_v42, %v974_v36  ;;  %v978_v61 = vshrl.u32 %v3028_v62, %v969_v16  ;;  %v970_v63 = vshrl.u32 %v3025_v54, %v969_v16  ;;  %v980_v45 = vshll.u32 %v3028_v62, %v968_v56 }
 0x441   : > { %v981_v1 = vshrl.u32 %v3029_v0, %v969_v16  ;;  %v984_v2 = vshrl.u32 %v3030_v11, %v969_v16  ;;  %v905_v3 = vmul.u32 %v3313_v49, %v889_v38  ;;  %v983_v7 = vshll.u32 %v3029_v0, %v968_v56 }
 0x442   : > { %v979_v5 = vor.u32 %v978_v61, %v977_v59  ;;  %vm986_vm3 = vcmp.lt.s32.totalorder %v3315_v50, 1  ;;  %vm907_vm4 = vc.u32 %v3348_v44, %v3351_v46  ;;  %v908_v37 = vadd.s32 1, %v3352_v47 }
 0x443   : > { %v982_v9 = vor.u32 %v981_v1, %v980_v45  ;;  %vm987_vm5 = vcmp.lt.s32.totalorder %v3315_v50, 2  ;;  %v985_v10 = vor.u32 %v984_v2, %v983_v7  ;;  %vm988_vm6 = vcmp.lt.s32.totalorder %v3315_v50, 3 }
 0x444   : > { %vm989_vm7 = vcmp.lt.s32.totalorder %v3315_v50, 4  ;;  %v994_v13 = vsel %vm986_vm3, %v973_v53, %v976_v55  ;;  %v909_v49 = vsel %vm907_vm4, %v908_v37, %v3352_v47  ;;  %v998_v56 = vsel %vm986_vm3, %v976_v55, %v979_v5 }
 0x445   : > { %v991_v14 = vsel %vm989_vm7, %v979_v5, 2102212464  ;;  %v995_v16 = vsel %vm989_vm7, %v982_v9, 920167782  ;;  %v910_v17 = vadd.s32 %v909_v49, %v905_v3  ;;  %v990_v18 = vsel %vm986_vm3, %v970_v63, %v973_v53 }
 0x446   : > { %v996_v22 = vsel %vm988_vm6, %v979_v5, %v995_v16  ;;  %v999_v24 = vsel %vm989_vm7, %v985_v10, 1326507024  ;;  %v992_v25 = vsel %vm988_vm6, %v976_v55, %v991_v14  ;;  %vm1086_vm8 = vcmp.gt.s32.totalorder %v3324_v57, 0 }
 0x447   : > { %v997_v28 = vsel %vm987_vm5, %v994_v13, %v996_v22  ;;  %v1000_v4 = vsel %vm988_vm6, %v982_v9, %v999_v24  ;;  %v911_v30 = vadd.s32 536870912, %v910_v17  ;;  %v1087_v36 = vsel %vm1086_vm8, %v3324_v57, 0 }
 0x448   : > { %v1001_v31 = vsel %vm987_vm5, %v998_v56, %v1000_v4  ;;  %v3375_v32 = vmul.u32.u64.low %v3317_v51, %v997_v28  ;;  %v3376_v33 = vmul.u32.u64.high %v3317_v51, %v997_v28, %v3375_v32  ;;  %v993_v6 = vsel %vm987_vm5, %v990_v18, %v992_v25 }
 0x449   : > { %v3380_v34 = vmul.u32.u64.low %v3317_v51, %v1001_v31  ;;  %v3381_v35 = vmul.u32.u64.high %v3317_v51, %v1001_v31, %v3380_v34  ;;  %v912_v38 = vshrl.u32 %v911_v30, 30  ;;  %v1089_v40 = vand.u32 31, %v1087_v36 }
 0x44a   : > { %v1182_v42 = vand.u32 2139095040, %v3311_v48  ;;  %v1012_v47 = vadd.s32 1, %v3376_v33  ;;  %v1083_v53 = vor.u32 8388608, %v3321_v52  ;;  %v1009_v55 = vmul.u32 %v3317_v51, %v993_v6 }
 0x44b   : > { %v913_v43 = vshll.u32 %v912_v38, 30  ;;  %vm1011_vm9 = vc.u32 %v3381_v35, %v3375_v32  ;;  %v1090_v59 = vsub.s32 32, %v1089_v40  ;;  %v3397_v63 = vmul.f32 %v3273_v8, %v3279_v15 }
 0x44c   : > { %v1013_v57 = vsel %vm1011_vm9, %v1012_v47, %v3376_v33  ;;  %v1183_v50 = vshrl.u32 %v1182_v42, 23  ;;  %v1179_v52 = vand.u32 2147483647, %v3311_v48  ;;  %v906_v51 = vadd.s32 %v3351_v46, %v3348_v44 }
 0x44d   : > { %v3392_v61 = vsub.s32 %v910_v17, %v913_v43  ;;  %v1014_v45 = vadd.s32 %v1013_v57, %v1009_v55  ;;  %v3403_v2 = vshrl.u32 %v1087_v36, 5  ;;  %v3405_v3 = vshll.u32 %v1083_v53, 8 }
 0x44e   : > { %v936_v5 = vsub.s32 4, %v912_v38  ;;  %v1093_v37 = vshrl.u32 %v3026_v58, %v1090_v59  ;;  %v1096_v9 = vshrl.u32 %v3027_v60, %v1090_v59  ;;  %v1099_v13 = vshrl.u32 %v3028_v62, %v1090_v59 }
 0x44f   : > { %v916_v1 = vsub.s32 0, %v3392_v61  ;;  %v1015_v7 = vadd.s32 536870912, %v1014_v45  ;;  %v1102_v49 = vshrl.u32 %v3029_v0, %v1090_v59  ;;  %v3412_v14 = vadd.s32 4294967169, %v1183_v50 }
 0x450   : > { %v1092_v46 = vshll.u32 %v3025_v54, %v1089_v40  ;;  %v1095_v16 = vshll.u32 %v3026_v58, %v1089_v40  ;;  %v3418_v56 = vand.u32 8388607, %v1179_v52  ;;  %v1098_v22 = vshll.u32 %v3027_v60, %v1089_v40 }
 0x451   : > { %v2682_v10 = vmin.u32 %v916_v1, %v3392_v61  ;;  %v1016_v44 = vshrl.u32 %v1015_v7, 30  ;;  %v1101_v24 = vshll.u32 %v3028_v62, %v1089_v40  ;;  %v1105_v25 = vshrl.u32 %v3030_v11, %v1090_v59 }
 0x452   : > { %v937_v28 = vsel %vm852_vm10, %v936_v5, %v912_v38  ;;  %v1094_v30 = vor.u32 %v1093_v37, %v1092_v46  ;;  %v1097_v31 = vor.u32 %v1096_v9, %v1095_v16  ;;  %v1100_v23 = vor.u32 %v1099_v13, %v1098_v22 }
 0x453   : > { %v918_v18 = vclz %v2682_v10  ;;  %v1017_v4 = vshll.u32 %v1016_v44, 30  ;;  %v1103_v34 = vor.u32 %v1102_v49, %v1101_v24  ;;  %v1104_v36 = vshll.u32 %v3029_v0, %v1089_v40 }
 0x454   : > { %v1040_v42 = vsub.s32 4, %v1016_v44  ;;  %v1091_v43 = vshrl.u32 %v3025_v54, %v1090_v59  ;;  %vm1107_vm13 = vcmp.lt.s32.totalorder %v3403_v2, 1  ;;  %vm1108_vm15 = vcmp.lt.s32.totalorder %v3403_v2, 2 }
 0x455   : > { %v2683_v33 = vadd.s32 4294967294, %v918_v18  ;;  %v3433_v6 = vsub.s32 %v1014_v45, %v1017_v4  ;;  %v1106_v47 = vor.u32 %v1105_v25, %v1104_v36  ;;  %vm1109_vm0 = vcmp.lt.s32.totalorder %v3403_v2, 3  ;;  %v3463_v18 = vpop.permute.xlu0 %2163 }
 0x456   : > { %vm3441_vm1 = vcmp.le.f32.partialorder %v954_v26, 0.7853982  ;;  %vm1110_vm2 = vcmp.lt.s32.totalorder %v3403_v2, 4  ;;  %v1115_v55 = vsel %vm1107_vm13, %v1094_v30, %v1097_v31  ;;  %v1119_v7 = vsel %vm1107_vm13, %v1097_v31, %v1100_v23 }
 0x457   : > { %vm2684_vm14 = vcmp.lt.s32.totalorder %v2683_v33, 0  ;;  %v1020_v40 = vsub.s32 0, %v3433_v6  ;;  %v1112_v50 = vsel %vm1110_vm2, %v1100_v23, 2102212464  ;;  %v1116_v45 = vsel %vm1110_vm2, %v1103_v34, 920167782 }
 0x458   : > { %v921_v38 = vsel %vm2684_vm14, 0, %v2683_v33  ;;  %v1117_v26 = vsel %vm1109_vm0, %v1100_v23, %v1116_v45  ;;  %v1120_v13 = vsel %vm1110_vm2, %v1106_v47, 1326507024  ;;  %v939_v49 = vsel %vm3422_vm11, 0, %v937_v28 }
 0x459   : > { %v922_v59 = vsub.s32 32, %v921_v38  ;;  %v926_v57 = vsub.s32 4294967266, %v921_v38  ;;  %v923_v1 = vshll.u32 %v3392_v61, %v921_v38  ;;  %v2686_v5 = vmin.u32 %v1020_v40, %v3433_v6 }
 0x45a   : > { %v1118_v10 = vsel %vm1108_vm15, %v1115_v55, %v1117_v26  ;;  %v1111_v61 = vsel %vm1107_vm13, %v1091_v43, %v1094_v30  ;;  %v1113_v16 = vsel %vm1109_vm0, %v1097_v31, %v1112_v50  ;;  %v1121_v25 = vsel %vm1109_vm0, %v1103_v34, %v1120_v13 }
 0x45b   : > { %v924_v37 = vshrl.u32 %v906_v51, %v922_v59  ;;  %v927_v9 = vadd.s32 127, %v926_v57  ;;  %v1022_v46 = vclz %v2686_v5  ;;  %v1041_v51 = vsel %vm956_vm12, %v1040_v42, %v1016_v44 }
 0x45c   : > { %v1122_v28 = vsel %vm1108_vm15, %v1119_v7, %v1121_v25  ;;  %v3472_v33 = vmul.u32.u64.low %v3405_v3, %v1118_v10  ;;  %v3473_v30 = vmul.u32.u64.high %v3405_v3, %v1118_v10, %v3472_v33  ;;  %v1114_v31 = vsel %vm1108_vm15, %v1111_v61, %v1113_v16 }
 0x45d   : > { %v925_v22 = vor.u32 %v924_v37, %v923_v1  ;;  %v928_v24 = vshll.u32 %v927_v9, 23  ;;  %v2687_v4 = vadd.s32 4294967294, %v1022_v46  ;;  %v943_v44 = vadd.s32 3, %v939_v49 }
 0x45e   : > { %v3478_v36 = vmul.u32.u64.low %v3405_v3, %v1122_v28  ;;  %v3479_v43 = vmul.u32.u64.high %v3405_v3, %v1122_v28, %v3478_v36  ;;  %v1010_v34 = vadd.s32 %v3375_v32, %v3381_v35  ;;  %v1189_v42 = vadd.s32 1, %v3412_v14  ;;  %v3490_v32 = vpop.permute.xlu0 %1294 }
 0x45f   : > { %v929_v23 = vor.u32 4788187, %v928_v24  ;;  %vm2688_vm3 = vcmp.lt.s32.totalorder %v2687_v4, 0  ;;  %v932_v38 = vcvt.s32.f32 %v925_v22  ;;  %v1043_v55 = vsel %vm3441_vm1, 0, %v1041_v51 }
 0x460   : > { %v1025_v40 = vsel %vm2688_vm3, 0, %v2687_v4  ;;  %v1130_v57 = vmul.u32 %v3405_v3, %v1114_v31  ;;  %v1133_v50 = vadd.s32 1, %v3473_v30  ;;  %vm1132_vm4 = vc.u32 %v3479_v43, %v3472_v33 }
 0x461   : > { %v930_v47 = vand.u32 2147483647, %v929_v23  ;;  %v1026_v59 = vsub.s32 32, %v1025_v40  ;;  %v1030_v2 = vsub.s32 4294967266, %v1025_v40  ;;  %v1027_v1 = vshll.u32 %v3433_v6, %v1025_v40 }
 0x462   : > { %vm1190_vm5 = vcmp.gt.s32.totalorder %v1189_v42, 0  ;;  %v1134_v5 = vsel %vm1132_vm4, %v1133_v50, %v3473_v30  ;;  %v1047_v37 = vadd.s32 3, %v1043_v55  ;;  %v1291_v3 = vmul.f32 %v3273_v8, %v3282_v19 }
 0x463   : > { %v933_v45 = vmul.f32 %v932_v38, %v930_v47  ;;  %v1028_v35 = vshrl.u32 %v1010_v34, %v1026_v59  ;;  %v1031_v14 = vadd.s32 127, %v1030_v2  ;;  %v1191_v26 = vsel %vm1190_vm5, %v1189_v42, 0 }
 0x464   : > { %v1135_v9 = vadd.s32 %v1134_v5, %v1130_v57  ;;  %v1193_v10 = vand.u32 31, %v1191_v26  ;;  %v3497_v6 = vadd.f32 %v3490_v32, %v3397_v63  ;;  %v3504_v24 = vand.u32 3, %v943_v44 }
 0x465   : > { %v934_v7 = vxor.u32 2147483648, %v933_v45  ;;  %v1029_v13 = vor.u32 %v1028_v35, %v1027_v1  ;;  %v1032_v49 = vshll.u32 %v1031_v14, 23  ;;  %v3507_v25 = vadd.f32 %v3490_v32, %v1291_v3 }
 0x466   : > { %v1136_v61 = vadd.s32 536870912, %v1135_v9  ;;  %v1194_v16 = vsub.s32 32, %v1193_v10  ;;  %v3509_v4 = vand.u32 3, %v1047_v37  ;;  %v1187_v28 = vor.u32 8388608, %v3418_v56 }
 0x467   : > { %v935_v46 = vsel %vm852_vm10, %v934_v7, %v933_v45  ;;  %v1033_v51 = vor.u32 4788187, %v1032_v49  ;;  %v1036_v23 = vcvt.s32.f32 %v1029_v13  ;;  %v1302_v31 = vand.u32 2139095040, %v3497_v6 }
 0x468   : > { %v938_v22 = vsel %vm3422_vm11, %v3290_v20, %v935_v46  ;;  %v1137_v63 = vshrl.u32 %v1136_v61, 30  ;;  %vm1077_vm6 = vcmp.lt.s32.totalorder %v3304_v29, 0  ;;  %v3515_v17 = vadd.s32 %v3472_v33, %v3479_v43 }
 0x469   : > { %2882 = vcosq.f32 %v938_v22  ;;  %v1034_v30 = vand.u32 2147483647, %v1033_v51  ;;  %v1197_v44 = vshrl.u32 %v3026_v58, %v1194_v16  ;;  %v1200_v34 = vshrl.u32 %v3027_v60, %v1194_v16 }
 0x46a   : > { %2884 = vsinq.f32 %v938_v22  ;;  %v1138_v36 = vshll.u32 %v1137_v63, 30  ;;  %v1203_v47 = vshrl.u32 %v3028_v62, %v1194_v16  ;;  %v1205_v56 = vshll.u32 %v3028_v62, %v1193_v10 }
 0x46b   : > { %v1037_v42 = vmul.f32 %v1036_v23, %v1034_v30  ;;  %v1206_v38 = vshrl.u32 %v3029_v0, %v1194_v16  ;;  %vm949_vm7 = vcmp.eq.s32.totalorder %v3504_v24, 2  ;;  %v3525_v55 = vshrl.u32 %v1191_v26, 5 }
 0x46c   : > { %v3523_v40 = vsub.s32 %v1135_v9, %v1138_v36  ;;  %v1196_v33 = vshll.u32 %v3025_v54, %v1193_v10  ;;  %v1199_v43 = vshll.u32 %v3026_v58, %v1193_v10  ;;  %vm946_vm8 = vcmp.eq.s32.totalorder %v3504_v24, 0 }
 0x46d   : > { %v1038_v59 = vxor.u32 2147483648, %v1037_v42  ;;  %v1202_v2 = vshll.u32 %v3027_v60, %v1193_v10  ;;  %v1207_v57 = vor.u32 %v1206_v38, %v1205_v56  ;;  %v1209_v50 = vshrl.u32 %v3030_v11, %v1194_v16 }
 0x46e   : > { %vm945_vm9 = vcmp.lt.s32.totalorder %v3504_v24, 2  ;;  %v1141_v45 = vsub.s32 0, %v3523_v40  ;;  %v1198_v1 = vor.u32 %v1197_v44, %v1196_v33  ;;  %v1201_v35 = vor.u32 %v1200_v34, %v1199_v43 }
 0x46f   : > { %v3534_v14 = vshll.u32 %v1187_v28, 8  ;;  %vm942_vm10 = vweird.f32 %v3290_v20  ;;  %v1039_v5 = vsel %vm956_vm12, %v1038_v59, %v1037_v42  ;;  %v1161_v26 = vsub.s32 4, %v1137_v63 }
 0x470   : > { %v1204_v7 = vor.u32 %v1203_v47, %v1202_v2  ;;  %v1208_v37 = vshll.u32 %v3029_v0, %v1193_v10  ;;  %v1042_v9 = vsel %vm3441_vm1, %v3292_v21, %v1039_v5  ;;  %v2690_v3 = vmin.u32 %v1141_v45, %v3523_v40 }
 0x471   : > { %vm1214_vm11 = vcmp.lt.s32.totalorder %v3525_v55, 4  ;;  %v1303_v13 = vshrl.u32 %v1302_v31, 23  ;;  %2886 = vcosq.f32 %v1042_v9  ;;  %vm1211_vm13 = vcmp.lt.s32.totalorder %v3525_v55, 1 }
 0x472   : > { %v1210_v49 = vor.u32 %v1209_v50, %v1208_v37  ;;  %v1220_v46 = vsel %vm1214_vm11, %v1207_v57, 920167782  ;;  %2888 = vsinq.f32 %v1042_v9  ;;  %v1143_v10 = vclz %v2690_v3 }
 0x473   : > { %v2883_v61 = vpop.eup %2882  ;;  %vm1213_vm12 = vcmp.lt.s32.totalorder %v3525_v55, 3  ;;  %v1219_v53 = vsel %vm1211_vm13, %v1198_v1, %v1201_v35  ;;  %v1162_v28 = vsel %vm1077_vm6, %v1161_v26, %v1137_v63  ;;  %v1195_v30 = vshrl.u32 %v3025_v54, %v1194_v16 }
 0x474   : > { %v2885_v22 = vpop.eup %2884  ;;  %v950_v51 = vxor.u32 2147483648, %v2883_v61  ;;  %v1221_v23 = vsel %vm1213_vm12, %v1204_v7, %v1220_v46  ;;  %vm3561_vm14 = vcmp.le.f32.partialorder %v1075_v41, 0.7853982  ;;  %v2691_v44 = vadd.s32 4294967294, %v1143_v10 }
 0x475   : > { %v947_v31 = vxor.u32 2147483648, %v2885_v22  ;;  %vm1212_vm15 = vcmp.lt.s32.totalorder %v3525_v55, 2  ;;  %v1216_v34 = vsel %vm1214_vm11, %v1204_v7, 2102212464  ;;  %v1223_v42 = vsel %vm1211_vm13, %v1201_v35, %v1204_v7 }
 0x476   : > { %v951_v63 = vsel %vm949_vm7, %v950_v51, %v2885_v22  ;;  %v1222_v16 = vsel %vm1212_vm15, %v1219_v53, %v1221_v23  ;;  %v1224_v41 = vsel %vm1214_vm11, %v1210_v49, 1326507024  ;;  %vm2692_vm0 = vcmp.lt.s32.totalorder %v2691_v44, 0 }
 0x477   : > { %v948_v47 = vsel %vm946_vm8, %v2883_v61, %v947_v31  ;;  %v1225_v56 = vsel %vm1213_vm12, %v1207_v57, %v1224_v41  ;;  %v2697_v38 = vadd.s32 4294967169, %v1303_v13  ;;  %v1146_v43 = vsel %vm2692_vm0, 0, %v2691_v44 }
 0x478   : > { %v952_v33 = vsel %vm945_vm9, %v948_v47, %v951_v63  ;;  %v1215_v59 = vsel %vm1211_vm13, %v1195_v30, %v1198_v1  ;;  %v1226_v2 = vsel %vm1212_vm15, %v1223_v42, %v1225_v56  ;;  %vm1046_vm1 = vweird.f32 %v3292_v21 }
 0x479   : > { %v953_v50 = vsel %vm942_vm10, nan, %v952_v33  ;;  %v1147_v45 = vsub.s32 32, %v1146_v43  ;;  %v1151_v5 = vsub.s32 4294967266, %v1146_v43  ;;  %v1217_v57 = vsel %vm1213_vm12, %v1201_v35, %v1216_v34 }
 0x47a   : > { %1058 = vst [vmem:[%s3591_s15] sm:$0xff] %v953_v50  ;;  %v3595_v24 = vmul.u32.u64.low %v3534_v14, %v1226_v2  ;;  %v3596_v1 = vmul.u32.u64.high %v3534_v14, %v1226_v2, %v3595_v24  ;;  %v3599_v26 = vmul.u32.u64.low %v3534_v14, %v1222_v16  ;;  %v3600_v7 = vmul.u32.u64.high %v3534_v14, %v1222_v16, %v3599_v26 }
 0x47b   : > { %v1148_v20 = vshll.u32 %v3523_v40, %v1146_v43  ;;  %v1149_v37 = vshrl.u32 %v3515_v17, %v1147_v45  ;;  %v1152_v9 = vadd.s32 127, %v1151_v5  ;;  %v1309_v3 = vadd.s32 1, %v2697_v38  ;;  %v2887_v35 = vpop.eup %2886 }
 0x47c   : > { %vm1050_vm2 = vcmp.eq.s32.totalorder %v3509_v4, 0  ;;  %vm1053_vm3 = vcmp.eq.s32.totalorder %v3509_v4, 2  ;;  %v1218_v13 = vsel %vm1212_vm15, %v1215_v59, %v1217_v57  ;;  %v1299_v49 = vand.u32 2147483647, %v3497_v6  ;;  %v2889_v46 = vpop.eup %2888 }
 0x47d   : > { %v1054_v61 = vxor.u32 2147483648, %v2887_v35  ;;  %v1150_v10 = vor.u32 %v1149_v37, %v1148_v20  ;;  %v1153_v53 = vshll.u32 %v1152_v9, 23  ;;  %vm1310_vm4 = vcmp.gt.s32.totalorder %v1309_v3, 0 }
 0x47e   : > { %v1051_v40 = vxor.u32 2147483648, %v2889_v46  ;;  %v1164_v17 = vsel %vm3561_vm14, 0, %v1162_v28  ;;  %vm1236_vm5 = vc.u32 %v3596_v1, %v3599_v26  ;;  %v1237_v22 = vadd.s32 1, %v3600_v7 }
 0x47f   : > { %v1055_v51 = vsel %vm1053_vm3, %v1054_v61, %v2889_v46  ;;  %v1154_v55 = vor.u32 4788187, %v1153_v53  ;;  %v1234_v30 = vmul.u32 %v3534_v14, %v1218_v13  ;;  %v1311_v23 = vsel %vm1310_vm4, %v1309_v3, 0 }
 0x480   : > { %vm1049_vm7 = vcmp.lt.s32.totalorder %v3509_v4, 2  ;;  %v1052_v31 = vsel %vm1050_vm2, %v2887_v35, %v1051_v40  ;;  %v1238_v44 = vsel %vm1236_vm5, %v1237_v22, %v3600_v7  ;;  %v1313_v34 = vand.u32 31, %v1311_v23 }
 0x481   : > { %v1056_v28 = vsel %vm1049_vm7, %v1052_v31, %v1055_v51  ;;  %v1155_v63 = vand.u32 2147483647, %v1154_v55  ;;  %v1157_v16 = vcvt.s32.f32 %v1150_v10  ;;  %v1239_v42 = vadd.s32 %v1238_v44, %v1234_v30 }
 0x482   : > { %v1057_v41 = vsel %vm1046_vm1, nan, %v1056_v28  ;;  %v1168_v47 = vadd.s32 3, %v1164_v17  ;;  %v1306_v14 = vand.u32 8388607, %v1299_v49  ;;  %v1314_v56 = vsub.s32 32, %v1313_v34 }
 0x483   : > { %1059 = vst [vmem:[%s3591_s15 + $0x8] sm:$0xff] %v1057_v41  ;;  %v1158_v38 = vmul.f32 %v1157_v16, %v1155_v63  ;;  %v1240_v33 = vadd.s32 536870912, %v1239_v42  ;;  %v1312_v4 = vshrl.u32 %v1311_v23, 5  ;;  %v1316_v43 = vshll.u32 %v3025_v54, %v1313_v34 }
 0x484   : > { %v1317_v59 = vshrl.u32 %v3026_v58, %v1314_v56  ;;  %v1319_v2 = vshll.u32 %v3026_v58, %v1313_v34  ;;  %v1320_v50 = vshrl.u32 %v3027_v60, %v1314_v56  ;;  %v1323_v21 = vshrl.u32 %v3028_v62, %v1314_v56 }
 0x485   : > { %v1159_v45 = vxor.u32 2147483648, %v1158_v38  ;;  %v3630_v5 = vshrl.u32 %v1240_v33, 30  ;;  %v1322_v57 = vshll.u32 %v3027_v60, %v1313_v34  ;;  %v1326_v24 = vshrl.u32 %v3029_v0, %v1314_v56 }
 0x486   : > { %v1318_v7 = vor.u32 %v1317_v59, %v1316_v43  ;;  %v1325_v20 = vshll.u32 %v3028_v62, %v1313_v34  ;;  %v1328_v37 = vshll.u32 %v3029_v0, %v1313_v34  ;;  %v1329_v9 = vshrl.u32 %v3030_v11, %v1314_v56 }
 0x487   : > { %v1160_v3 = vsel %vm1077_vm6, %v1159_v45, %v1158_v38  ;;  %v1242_v35 = vshll.u32 %v3630_v5, 30  ;;  %v1321_v13 = vor.u32 %v1320_v50, %v1319_v2  ;;  %v1324_v46 = vor.u32 %v1323_v21, %v1322_v57 }
 0x488   : > { %v1163_v61 = vsel %vm3561_vm14, %v3304_v29, %v1160_v3  ;;  %v3643_v10 = vand.u32 3, %v1168_v47  ;;  %v1327_v53 = vor.u32 %v1326_v24, %v1325_v20  ;;  %v1330_v40 = vor.u32 %v1329_v9, %v1328_v37 }
 0x489   : > { %2890 = vcosq.f32 %v1163_v61  ;;  %v3645_v17 = vsub.s32 %v1239_v42, %v1242_v35  ;;  %v1307_v22 = vor.u32 8388608, %v1306_v14  ;;  %v1406_v51 = vand.u32 2139095040, %v3507_v25 }
 0x48a   : > { %2892 = vsinq.f32 %v1163_v61  ;;  %v1315_v55 = vshrl.u32 %v3025_v54, %v1314_v56  ;;  %vm1331_vm6 = vcmp.lt.s32.totalorder %v1312_v4, 1  ;;  %vm1334_vm8 = vcmp.lt.s32.totalorder %v1312_v4, 4 }
 0x48b   : > { %v1245_v30 = vsub.s32 0, %v3645_v17  ;;  %vm1333_vm9 = vcmp.lt.s32.totalorder %v1312_v4, 3  ;;  %v1336_v36 = vsel %vm1334_vm8, %v1324_v46, 2102212464  ;;  %v1339_v23 = vsel %vm1331_vm6, %v1318_v7, %v1321_v13 }
 0x48c   : > { %v1335_v31 = vsel %vm1331_vm6, %v1315_v55, %v1318_v7  ;;  %v1337_v44 = vsel %vm1333_vm9, %v1321_v13, %v1336_v36  ;;  %v1340_v34 = vsel %vm1334_vm8, %v1327_v53, 920167782  ;;  %v1344_v28 = vsel %vm1334_vm8, %v1330_v40, 1326507024 }
 0x48d   : > { %v2694_v63 = vmin.u32 %v1245_v30, %v3645_v17  ;;  %vm1332_vm10 = vcmp.lt.s32.totalorder %v1312_v4, 2  ;;  %v1341_v16 = vsel %vm1333_vm9, %v1324_v46, %v1340_v34  ;;  %v1343_v42 = vsel %vm1331_vm6, %v1321_v13, %v1324_v46 }
 0x48e   : > { %v1342_v41 = vsel %vm1332_vm10, %v1339_v23, %v1341_v16  ;;  %v1345_v47 = vsel %vm1333_vm9, %v1327_v53, %v1344_v28  ;;  %v1347_v14 = vshll.u32 %v1307_v22, 8  ;;  %v1407_v56 = vshrl.u32 %v1406_v51, 23 }
 0x48f   : > { %vm1181_vm11 = vcmp.lt.s32.totalorder %v3311_v48, 0  ;;  %v1247_v38 = vclz %v2694_v63  ;;  %v1338_v33 = vsel %vm1332_vm10, %v1335_v31, %v1337_v44  ;;  %vm1167_vm13 = vweird.f32 %v3304_v29 }
 0x490   : > { %v1346_v43 = vsel %vm1332_vm10, %v1343_v42, %v1345_v47  ;;  %v3653_v59 = vmul.u32.u64.low %v1347_v14, %v1342_v41  ;;  %v3654_v2 = vmul.u32.u64.high %v1347_v14, %v1342_v41, %v3653_v59  ;;  %v2701_v50 = vadd.s32 4294967169, %v1407_v56 }
 0x491   : > { %v2695_v21 = vadd.s32 4294967294, %v1247_v38  ;;  %v3657_v4 = vmul.u32.u64.low %v1347_v14, %v1346_v43  ;;  %v3658_v45 = vmul.u32.u64.high %v1347_v14, %v1346_v43, %v3657_v4  ;;  %v1403_v57 = vand.u32 2147483647, %v3507_v25 }
 0x492   : > { %vm1170_vm12 = vcmp.lt.s32.totalorder %v3643_v10, 2  ;;  %vm1171_vm14 = vcmp.eq.s32.totalorder %v3643_v10, 0  ;;  %vm1174_vm15 = vcmp.eq.s32.totalorder %v3643_v10, 2  ;;  %v1413_v24 = vadd.s32 1, %v2701_v50 }
 0x493   : > { %v2891_v7 = vpop.eup %2890  ;;  %v1235_v20 = vadd.s32 %v3599_v26, %v3596_v1  ;;  %vm2696_vm0 = vcmp.lt.s32.totalorder %v2695_v21, 0  ;;  %v1265_v37 = vsub.s32 4, %v3630_v5  ;;  %v1354_v9 = vmul.u32 %v1347_v14, %v1338_v33 }
 0x494   : > { %v2893_v3 = vpop.eup %2892  ;;  %v1175_v35 = vxor.u32 2147483648, %v2891_v7  ;;  %v1250_v13 = vsel %vm2696_vm0, 0, %v2695_v21  ;;  %v1357_v46 = vadd.s32 1, %v3654_v2  ;;  %vm1414_vm1 = vcmp.gt.s32.totalorder %v1413_v24, 0 }
 0x495   : > { %v1172_v61 = vxor.u32 2147483648, %v2893_v3  ;;  %v1251_v53 = vsub.s32 32, %v1250_v13  ;;  %v1255_v40 = vsub.s32 4294967266, %v1250_v13  ;;  %v1410_v22 = vand.u32 8388607, %v1403_v57 }
 0x496   : > { %v1176_v51 = vsel %vm1174_vm15, %v1175_v35, %v2893_v3  ;;  %v1252_v1 = vshll.u32 %v3645_v17, %v1250_v13  ;;  %vm1356_vm2 = vc.u32 %v3658_v45, %v3653_v59  ;;  %v1415_v26 = vsel %vm1414_vm1, %v1413_v24, 0 }
 0x497   : > { %v1173_v55 = vsel %vm1171_vm14, %v2891_v7, %v1172_v61  ;;  %v1253_v30 = vshrl.u32 %v1235_v20, %v1251_v53  ;;  %v1256_v36 = vadd.s32 127, %v1255_v40  ;;  %v1358_v23 = vsel %vm1356_vm2, %v1357_v46, %v3654_v2 }
 0x498   : > { %v1177_v31 = vsel %vm1170_vm12, %v1173_v55, %v1176_v51  ;;  %v1266_v44 = vsel %vm1181_vm11, %v1265_v37, %v3630_v5  ;;  %v1359_v17 = vadd.s32 %v1358_v23, %v1354_v9  ;;  %v1417_v34 = vand.u32 31, %v1415_v26 }
 0x499   : > { %v1178_v28 = vsel %vm1167_vm13, nan, %v1177_v31  ;;  %v1254_v63 = vor.u32 %v1253_v30, %v1252_v1  ;;  %v1257_v16 = vshll.u32 %v1256_v36, 23  ;;  %v1509_v42 = vmul.f32 %v3273_v8, %v3288_v39 }
 0x49a   : > { %vm3689_vm3 = vcmp.le.f32.partialorder %v1179_v52, 0.7853982  ;;  %1283 = vst [vmem:[%s3591_s15 + $0x40] sm:$0xff] %v1178_v28  ;;  %v1360_v10 = vadd.s32 536870912, %v1359_v17  ;;  %v1418_v47 = vsub.s32 32, %v1417_v34  ;;  %v1411_v29 = vor.u32 8388608, %v1410_v22 }
 0x49b   : > { %v1258_v5 = vor.u32 4788187, %v1257_v16  ;;  %v1268_v14 = vsel %vm3689_vm3, 0, %v1266_v44  ;;  %v1416_v56 = vshrl.u32 %v1415_v26, 5  ;;  %v1261_v38 = vcvt.s32.f32 %v1254_v63 }
 0x49c   : > { %v1361_v33 = vshrl.u32 %v1360_v10, 30  ;;  %v1421_v43 = vshrl.u32 %v3026_v58, %v1418_v47  ;;  %v1424_v2 = vshrl.u32 %v3027_v60, %v1418_v47  ;;  %v1427_v52 = vshrl.u32 %v3028_v62, %v1418_v47 }
 0x49d   : > { %v1259_v50 = vand.u32 2147483647, %v1258_v5  ;;  %v1429_v21 = vshll.u32 %v3028_v62, %v1417_v34  ;;  %v1430_v4 = vshrl.u32 %v3029_v0, %v1418_v47  ;;  %v1420_v7 = vshll.u32 %v3025_v54, %v1417_v34 }
 0x49e   : > { %v1362_v24 = vshll.u32 %v1361_v33, 30  ;;  %v1423_v20 = vshll.u32 %v3026_v58, %v1417_v34  ;;  %v1426_v37 = vshll.u32 %v3027_v60, %v1417_v34  ;;  %v1433_v35 = vshrl.u32 %v3030_v11, %v1418_v47 }
 0x49f   : > { %v1262_v9 = vmul.f32 %v1261_v38, %v1259_v50  ;;  %v1431_v3 = vor.u32 %v1430_v4, %v1429_v21  ;;  %vm1301_vm4 = vcmp.lt.s32.totalorder %v3497_v6, 0  ;;  %v1422_v46 = vor.u32 %v1421_v43, %v1420_v7 }
 0x4a0   : > { %v3706_v13 = vsub.s32 %v1359_v17, %v1362_v24  ;;  %v1425_v61 = vor.u32 %v1424_v2, %v1423_v20  ;;  %v1428_v53 = vor.u32 %v1427_v52, %v1426_v37  ;;  %v1272_v22 = vadd.s32 3, %v1268_v14 }
 0x4a1   : > { %v1263_v40 = vxor.u32 2147483648, %v1262_v9  ;;  %v1432_v51 = vshll.u32 %v3029_v0, %v1417_v34  ;;  %v3710_v1 = vadd.f32 %v1509_v42, %v3490_v32  ;;  %vm1435_vm5 = vcmp.lt.s32.totalorder %v1416_v56, 1 }
 0x4a2   : > { %v1365_v26 = vsub.s32 0, %v3706_v13  ;;  %vm1438_vm7 = vcmp.lt.s32.totalorder %v1416_v56, 4  ;;  %v1451_v55 = vshll.u32 %v1411_v29, 8  ;;  %vm1437_vm6 = vcmp.lt.s32.totalorder %v1416_v56, 3 }
 0x4a3   : > { %v1264_v30 = vsel %vm1181_vm11, %v1263_v40, %v1262_v9  ;;  %v1434_v36 = vor.u32 %v1433_v35, %v1432_v51  ;;  %v1444_v23 = vsel %vm1438_vm7, %v1431_v3, 920167782  ;;  %v1440_v17 = vsel %vm1438_vm7, %v1428_v53, 2102212464 }
 0x4a4   : > { %v1267_v31 = vsel %vm3689_vm3, %v3311_v48, %v1264_v30  ;;  %v2698_v44 = vmin.u32 %v1365_v26, %v3706_v13  ;;  %v1443_v34 = vsel %vm1435_vm5, %v1422_v46, %v1425_v61  ;;  %v1385_v28 = vsub.s32 4, %v1361_v33 }
 0x4a5   : > { %2894 = vcosq.f32 %v1267_v31  ;;  %v1419_v63 = vshrl.u32 %v3025_v54, %v1418_v47  ;;  %v1445_v16 = vsel %vm1437_vm6, %v1428_v53, %v1444_v23  ;;  %vm1436_vm8 = vcmp.lt.s32.totalorder %v1416_v56, 2 }
 0x4a6   : > { %2896 = vsinq.f32 %v1267_v31  ;;  %v1367_v42 = vclz %v2698_v44  ;;  %v1447_v10 = vsel %vm1435_vm5, %v1425_v61, %v1428_v53  ;;  %v1441_v5 = vsel %vm1437_vm6, %v1425_v61, %v1440_v17 }
 0x4a7   : > { %v1439_v41 = vsel %vm1435_vm5, %v1419_v63, %v1422_v46  ;;  %v1446_v14 = vsel %vm1436_vm8, %v1443_v34, %v1445_v16  ;;  %v1448_v29 = vsel %vm1438_vm7, %v1434_v36, 1326507024  ;;  %v1510_v47 = vmul.f32 %v3273_v8, %v3300_v27 }
 0x4a8   : > { %v2699_v38 = vadd.s32 4294967294, %v1367_v42  ;;  %v1449_v43 = vsel %vm1437_vm6, %v1431_v3, %v1448_v29  ;;  %v3729_v2 = vmul.u32.u64.low %v1451_v55, %v1446_v14  ;;  %v3730_v50 = vmul.u32.u64.high %v1451_v55, %v1446_v14, %v3729_v2 }
 0x4a9   : > { %v1386_v52 = vsel %vm1301_vm4, %v1385_v28, %v1361_v33  ;;  %v1450_v21 = vsel %vm1436_vm8, %v1447_v10, %v1449_v43  ;;  %v1516_v4 = vand.u32 2139095040, %v3710_v1  ;;  %v1442_v24 = vsel %vm1436_vm8, %v1439_v41, %v1441_v5 }
 0x4aa   : > { %vm2700_vm9 = vcmp.lt.s32.totalorder %v2699_v38, 0  ;;  %v3737_v7 = vmul.u32.u64.low %v1451_v55, %v1450_v21  ;;  %v3738_v20 = vmul.u32.u64.high %v1451_v55, %v1450_v21, %v3737_v7  ;;  %v1273_v37 = vand.u32 3, %v1272_v22 }
 0x4ab   : > { %vm3742_vm10 = vcmp.le.f32.partialorder %v1299_v49, 0.7853982  ;;  %v1370_v9 = vsel %vm2700_vm9, 0, %v2699_v38  ;;  %v1517_v8 = vshrl.u32 %v1516_v4, 23  ;;  %vm1271_vm11 = vweird.f32 %v3311_v48 }
 0x4ac   : > { %v1355_v33 = vadd.s32 %v3653_v59, %v3658_v45  ;;  %v1371_v3 = vsub.s32 32, %v1370_v9  ;;  %v1375_v35 = vsub.s32 4294967266, %v1370_v9  ;;  %v1461_v46 = vadd.s32 1, %v3730_v50 }
 0x4ad   : > { %v1388_v61 = vsel %vm3742_vm10, 0, %v1386_v52  ;;  %v1458_v53 = vmul.u32 %v1451_v55, %v1442_v24  ;;  %v1513_v49 = vand.u32 2147483647, %v3710_v1  ;;  %v2705_v40 = vadd.s32 4294967169, %v1517_v8 }
 0x4ae   : > { %v1372_v22 = vshll.u32 %v3706_v13, %v1370_v9  ;;  %v1373_v51 = vshrl.u32 %v1355_v33, %v1371_v3  ;;  %v1376_v26 = vadd.s32 127, %v1375_v35  ;;  %vm1460_vm13 = vc.u32 %v3738_v20, %v3729_v2 }
 0x4af   : > { %v2895_v30 = vpop.eup %2894  ;;  %vm1275_vm12 = vcmp.eq.s32.totalorder %v1273_v37, 0  ;;  %v1462_v59 = vsel %vm1460_vm13, %v1461_v46, %v3730_v50  ;;  %v3757_v45 = vadd.f32 %v1510_v47, %v3490_v32  ;;  %v1523_v36 = vadd.s32 1, %v2705_v40 }
 0x4b0   : > { %v2897_v23 = vpop.eup %2896  ;;  %v1279_v31 = vxor.u32 2147483648, %v2895_v30  ;;  %v1374_v55 = vor.u32 %v1373_v51, %v1372_v22  ;;  %v1377_v44 = vshll.u32 %v1376_v26, 23  ;;  %v1463_v17 = vadd.s32 %v1462_v59, %v1458_v53 }
 0x4b1   : > { %v1276_v34 = vxor.u32 2147483648, %v2897_v23  ;;  %vm1278_vm14 = vcmp.eq.s32.totalorder %v1273_v37, 2  ;;  %v1392_v13 = vadd.s32 3, %v1388_v61  ;;  %vm1524_vm15 = vcmp.gt.s32.totalorder %v1523_v36, 0 }
 0x4b2   : > { %v1280_v28 = vsel %vm1278_vm14, %v1279_v31, %v2897_v23  ;;  %v1378_v63 = vor.u32 4788187, %v1377_v44  ;;  %v1464_v16 = vadd.s32 536870912, %v1463_v17  ;;  %v1520_v42 = vand.u32 8388607, %v1513_v49 }
 0x4b3   : > { %vm1274_vm0 = vcmp.lt.s32.totalorder %v1273_v37, 2  ;;  %v1277_v32 = vsel %vm1275_vm12, %v2895_v30, %v1276_v34  ;;  %v1525_v10 = vsel %vm1524_vm15, %v1523_v36, 0  ;;  %v1620_v41 = vand.u32 2139095040, %v3757_v45 }
 0x4b4   : > { %v1281_v5 = vsel %vm1274_vm0, %v1277_v32, %v1280_v28  ;;  %v1379_v14 = vand.u32 2147483647, %v1378_v63  ;;  %v1381_v29 = vcvt.s32.f32 %v1374_v55  ;;  %v1465_v38 = vshrl.u32 %v1464_v16, 30 }
 0x4b5   : > { %v1282_v43 = vsel %vm1271_vm11, nan, %v1281_v5  ;;  %v1527_v50 = vand.u32 31, %v1525_v10  ;;  %v3767_v47 = vmul.f32 %v3276_v12, %v3279_v15  ;;  %v3770_v21 = vand.u32 3, %v1392_v13 }
 0x4b6   : > { %1284 = vst [vmem:[%s3591_s15 + $0x48] sm:$0xff] %v1282_v43  ;;  %v1382_v52 = vmul.f32 %v1381_v29, %v1379_v14  ;;  %vm1405_vm1 = vcmp.lt.s32.totalorder %v3507_v25, 0  ;;  %v1466_v4 = vshll.u32 %v1465_v38, 30  ;;  %v1521_v24 = vor.u32 8388608, %v1520_v42 }
 0x4b7   : > { %v3774_v7 = vadd.s32 %v3729_v2, %v3738_v20  ;;  %v1528_v37 = vsub.s32 32, %v1527_v50  ;;  %v1617_v48 = vand.u32 2147483647, %v3757_v45  ;;  %v1621_v9 = vshrl.u32 %v1620_v41, 23 }
 0x4b8   : > { %v1383_v8 = vxor.u32 2147483648, %v1382_v52  ;;  %v3777_v33 = vsub.s32 %v1463_v17, %v1466_v4  ;;  %v1489_v3 = vsub.s32 4, %v1465_v38  ;;  %v3779_v35 = vshrl.u32 %v1525_v10, 5 }
 0x4b9   : > { %v1530_v46 = vshll.u32 %v3025_v54, %v1527_v50  ;;  %v1531_v61 = vshrl.u32 %v3026_v58, %v1528_v37  ;;  %v1533_v53 = vshll.u32 %v3026_v58, %v1527_v50  ;;  %v1534_v40 = vshrl.u32 %v3027_v60, %v1528_v37 }
 0x4ba   : > { %v1384_v2 = vsel %vm1301_vm4, %v1383_v8, %v1382_v52  ;;  %v1469_v20 = vsub.s32 0, %v3777_v33  ;;  %v1536_v22 = vshll.u32 %v3027_v60, %v1527_v50  ;;  %v1537_v51 = vshrl.u32 %v3028_v62, %v1528_v37 }
 0x4bb   : > { %v1387_v26 = vsel %vm3742_vm10, %v3497_v6, %v1384_v2  ;;  %v1532_v30 = vor.u32 %v1531_v61, %v1530_v46  ;;  %v1539_v59 = vshll.u32 %v3028_v62, %v1527_v50  ;;  %v1540_v36 = vshrl.u32 %v3029_v0, %v1528_v37 }
 0x4bc   : > { %2898 = vcosq.f32 %v1387_v26  ;;  %v2702_v23 = vmin.u32 %v1469_v20, %v3777_v33  ;;  %v1535_v31 = vor.u32 %v1534_v40, %v1533_v53  ;;  %v1538_v55 = vor.u32 %v1537_v51, %v1536_v22 }
 0x4bd   : > { %2900 = vsinq.f32 %v1387_v26  ;;  %v1541_v44 = vor.u32 %v1540_v36, %v1539_v59  ;;  %v1542_v17 = vshll.u32 %v3029_v0, %v1527_v50  ;;  %v1543_v34 = vshrl.u32 %v3030_v11, %v1528_v37 }
 0x4be   : > { %v1471_v13 = vclz %v2702_v23  ;;  %v3798_v28 = vshll.u32 %v1521_v24, 8  ;;  %v2709_v56 = vadd.s32 4294967169, %v1621_v9  ;;  %v1624_v63 = vand.u32 8388607, %v1617_v48 }
 0x4bf   : > { %v1490_v16 = vsel %vm1405_vm1, %v1489_v3, %v1465_v38  ;;  %v1529_v42 = vshrl.u32 %v3025_v54, %v1528_v37  ;;  %v1544_v32 = vor.u32 %v1543_v34, %v1542_v17  ;;  %vm1545_vm2 = vcmp.lt.s32.totalorder %v3779_v35, 1 }
 0x4c0   : > { %vm3808_vm3 = vcmp.le.f32.partialorder %v1403_v57, 0.7853982  ;;  %v2703_v41 = vadd.s32 4294967294, %v1471_v13  ;;  %vm1547_vm4 = vcmp.lt.s32.totalorder %v3779_v35, 3  ;;  %vm1548_vm5 = vcmp.lt.s32.totalorder %v3779_v35, 4 }
 0x4c1   : > { %v1553_v5 = vsel %vm1545_vm2, %v1532_v30, %v1535_v31  ;;  %vm1395_vm7 = vcmp.eq.s32.totalorder %v3770_v21, 0  ;;  %v1550_v14 = vsel %vm1548_vm5, %v1538_v55, 2102212464  ;;  %v1554_v29 = vsel %vm1548_vm5, %v1541_v44, 920167782 }
 0x4c2   : > { %v1557_v38 = vsel %vm1545_vm2, %v1535_v31, %v1538_v55  ;;  %v1558_v43 = vsel %vm1548_vm5, %v1544_v32, 1326507024  ;;  %vm1394_vm6 = vcmp.lt.s32.totalorder %v3770_v21, 2  ;;  %vm2704_vm8 = vcmp.lt.s32.totalorder %v2703_v41, 0 }
 0x4c3   : > { %vm1546_vm9 = vcmp.lt.s32.totalorder %v3779_v35, 2  ;;  %v1555_v57 = vsel %vm1547_vm4, %v1538_v55, %v1554_v29  ;;  %v1559_v50 = vsel %vm1547_vm4, %v1541_v44, %v1558_v43  ;;  %vm1391_vm10 = vweird.f32 %v3497_v6 }
 0x4c4   : > { %v1474_v52 = vsel %vm2704_vm8, 0, %v2703_v41  ;;  %v1549_v4 = vsel %vm1545_vm2, %v1529_v42, %v1532_v30  ;;  %v1556_v24 = vsel %vm1546_vm9, %v1553_v5, %v1555_v57  ;;  %v1560_v37 = vsel %vm1546_vm9, %v1557_v38, %v1559_v50 }
 0x4c5   : > { %v1475_v9 = vsub.s32 32, %v1474_v52  ;;  %v1479_v8 = vsub.s32 4294967266, %v1474_v52  ;;  %v1551_v3 = vsel %vm1547_vm4, %v1535_v31, %v1550_v14  ;;  %v1627_v46 = vadd.s32 1, %v2709_v56 }
 0x4c6   : > { %v3835_v61 = vmul.u32.u64.low %v3798_v28, %v1560_v37  ;;  %v3836_v53 = vmul.u32.u64.high %v3798_v28, %v1560_v37, %v3835_v61  ;;  %v3839_v40 = vmul.u32.u64.low %v3798_v28, %v1556_v24  ;;  %v3840_v2 = vmul.u32.u64.high %v3798_v28, %v1556_v24, %v3839_v40  ;;  %v2899_v20 = vpop.eup %2898 }
 0x4c7   : > { %v1476_v22 = vshll.u32 %v3777_v33, %v1474_v52  ;;  %v1477_v51 = vshrl.u32 %v3774_v7, %v1475_v9  ;;  %v1480_v26 = vadd.s32 127, %v1479_v8  ;;  %vm1628_vm11 = vcmp.gt.s32.totalorder %v1627_v46, 0  ;;  %v2901_v30 = vpop.eup %2900 }
 0x4c8   : > { %v1399_v59 = vxor.u32 2147483648, %v2899_v20  ;;  %v1552_v36 = vsel %vm1546_vm9, %v1549_v4, %v1551_v3  ;;  %v1625_v23 = vor.u32 8388608, %v1624_v63  ;;  %v1629_v31 = vsel %vm1628_vm11, %v1627_v46, 0  ;;  %v3872_v3 = vpop.permute.xlu1 %1732 }
 0x4c9   : > { %v1396_v55 = vxor.u32 2147483648, %v2901_v30  ;;  %vm1398_vm13 = vcmp.eq.s32.totalorder %v3770_v21, 2  ;;  %v1478_v44 = vor.u32 %v1477_v51, %v1476_v22  ;;  %v1481_v17 = vshll.u32 %v1480_v26, 23 }
 0x4ca   : > { %v1400_v34 = vsel %vm1398_vm13, %v1399_v59, %v2901_v30  ;;  %v1492_v33 = vsel %vm3808_vm3, 0, %v1490_v16  ;;  %vm1570_vm12 = vc.u32 %v3836_v53, %v3839_v40  ;;  %v1571_v7 = vadd.s32 1, %v3840_v2 }
 0x4cb   : > { %v1397_v35 = vsel %vm1395_vm7, %v2899_v20, %v1396_v55  ;;  %v1482_v13 = vor.u32 4788187, %v1481_v17  ;;  %v1568_v56 = vmul.u32 %v3798_v28, %v1552_v36  ;;  %v1631_v63 = vand.u32 31, %v1629_v31 }
 0x4cc   : > { %v1401_v42 = vsel %vm1394_vm6, %v1397_v35, %v1400_v34  ;;  %v1485_v32 = vcvt.s32.f32 %v1478_v44  ;;  %v1572_v41 = vsel %vm1570_vm12, %v1571_v7, %v3840_v2  ;;  %v3859_v16 = vshll.u32 %v1625_v23, 8 }
 0x4cd   : > { %v1402_v5 = vsel %vm1391_vm10, nan, %v1401_v42  ;;  %v1483_v14 = vand.u32 2147483647, %v1482_v13  ;;  %v1573_v29 = vadd.s32 %v1572_v41, %v1568_v56  ;;  %v1632_v38 = vsub.s32 32, %v1631_v63 }
 0x4ce   : > { %v1496_v43 = vadd.s32 3, %v1492_v33  ;;  %1507 = vst [vmem:[%s3591_s15 + $0x10] sm:$0xff] %v1402_v5  ;;  %v1630_v57 = vshrl.u32 %v1629_v31, 5  ;;  %v1634_v28 = vshll.u32 %v3025_v54, %v1631_v63  ;;  %v1637_v50 = vshll.u32 %v3026_v58, %v1631_v63 }
 0x4cf   : > { %v1486_v21 = vmul.f32 %v1485_v32, %v1483_v14  ;;  %v1574_v52 = vadd.s32 536870912, %v1573_v29  ;;  %v1635_v4 = vshrl.u32 %v3026_v58, %v1632_v38  ;;  %v1640_v24 = vshll.u32 %v3027_v60, %v1631_v63 }
 0x4d0   : > { %v1638_v37 = vshrl.u32 %v3027_v60, %v1632_v38  ;;  %v1641_v6 = vshrl.u32 %v3028_v62, %v1632_v38  ;;  %v1643_v9 = vshll.u32 %v3028_v62, %v1631_v63  ;;  %v1644_v8 = vshrl.u32 %v3029_v0, %v1632_v38 }
 0x4d1   : > { %v1487_v46 = vxor.u32 2147483648, %v1486_v21  ;;  %v1575_v61 = vshrl.u32 %v1574_v52, 30  ;;  %v1636_v2 = vor.u32 %v1635_v4, %v1634_v28  ;;  %v1647_v20 = vshrl.u32 %v3030_v11, %v1632_v38 }
 0x4d2   : > { %v1639_v22 = vor.u32 %v1638_v37, %v1637_v50  ;;  %v1642_v51 = vor.u32 %v1641_v6, %v1640_v24  ;;  %v1645_v26 = vor.u32 %v1644_v8, %v1643_v9  ;;  %v1646_v30 = vshll.u32 %v3029_v0, %v1631_v63 }
 0x4d3   : > { %v1488_v59 = vsel %vm1405_vm1, %v1487_v46, %v1486_v21  ;;  %v1576_v36 = vshll.u32 %v1575_v61, 30  ;;  %vm1649_vm14 = vcmp.lt.s32.totalorder %v1630_v57, 1  ;;  %v3880_v23 = vadd.f32 %v3872_v3, %v3767_v47 }
 0x4d4   : > { %v1491_v31 = vsel %vm3808_vm3, %v3507_v25, %v1488_v59  ;;  %v1633_v55 = vshrl.u32 %v3025_v54, %v1632_v38  ;;  %v1648_v44 = vor.u32 %v1647_v20, %v1646_v30  ;;  %vm1652_vm15 = vcmp.lt.s32.totalorder %v1630_v57, 4 }
 0x4d5   : > { %2902 = vcosq.f32 %v1491_v31  ;;  %v3886_v17 = vsub.s32 %v1573_v29, %v1576_v36  ;;  %v1654_v34 = vsel %vm1652_vm15, %v1642_v51, 2102212464  ;;  %v1657_v33 = vsel %vm1649_vm14, %v1636_v2, %v1639_v22 }
 0x4d6   : > { %2904 = vsinq.f32 %v1491_v31  ;;  %vm1650_vm0 = vcmp.lt.s32.totalorder %v1630_v57, 2  ;;  %vm1651_vm1 = vcmp.lt.s32.totalorder %v1630_v57, 3  ;;  %v1658_v47 = vsel %vm1652_vm15, %v1645_v26, 920167782 }
 0x4d7   : > { %v1579_v7 = vsub.s32 0, %v3886_v17  ;;  %v1599_v10 = vsub.s32 4, %v1575_v61  ;;  %v1653_v35 = vsel %vm1649_vm14, %v1633_v55, %v1636_v2  ;;  %v1659_v13 = vsel %vm1651_vm1, %v1642_v51, %v1658_v47 }
 0x4d8   : > { %v1655_v56 = vsel %vm1651_vm1, %v1639_v22, %v1654_v34  ;;  %v1660_v63 = vsel %vm1650_vm0, %v1657_v33, %v1659_v13  ;;  %v1661_v42 = vsel %vm1649_vm14, %v1639_v22, %v1642_v51  ;;  %v1662_v32 = vsel %vm1652_vm15, %v1648_v44, 1326507024 }
 0x4d9   : > { %v1497_v41 = vand.u32 3, %v1496_v43  ;;  %v2706_v5 = vmin.u32 %v1579_v7, %v3886_v17  ;;  %v1663_v14 = vsel %vm1651_vm1, %v1645_v26, %v1662_v32  ;;  %vm1515_vm2 = vcmp.lt.s32.totalorder %v3710_v1, 0 }
 0x4da   : > { %v1664_v29 = vsel %vm1650_vm0, %v1661_v42, %v1663_v14  ;;  %v3900_v38 = vmul.u32.u64.low %v3859_v16, %v1660_v63  ;;  %v3901_v28 = vmul.u32.u64.high %v3859_v16, %v1660_v63, %v3900_v38  ;;  %v1600_v21 = vsel %vm1515_vm2, %v1599_v10, %v1575_v61 }
 0x4db   : > { %v1581_v50 = vclz %v2706_v5  ;;  %v1656_v52 = vsel %vm1650_vm0, %v1653_v35, %v1655_v56  ;;  %v1729_v43 = vmul.f32 %v3276_v12, %v3282_v19  ;;  %v1737_v37 = vand.u32 2147483647, %v3880_v23 }
 0x4dc   : > { %v3909_v4 = vmul.u32.u64.low %v3859_v16, %v1664_v29  ;;  %v3910_v24 = vmul.u32.u64.high %v3859_v16, %v1664_v29, %v3909_v4  ;;  %v1740_v6 = vand.u32 2139095040, %v3880_v23  ;;  %vm1498_vm3 = vcmp.lt.s32.totalorder %v1497_v41, 2 }
 0x4dd   : > { %vm3916_vm4 = vcmp.le.f32.partialorder %v1513_v49, 0.7853982  ;;  %v2707_v57 = vadd.s32 4294967294, %v1581_v50  ;;  %v3921_v8 = vadd.f32 %v3872_v3, %v1729_v43  ;;  %vm1499_vm5 = vcmp.eq.s32.totalorder %v1497_v41, 0 }
 0x4de   : > { %vm1502_vm7 = vcmp.eq.s32.totalorder %v1497_v41, 2  ;;  %v1675_v46 = vadd.s32 1, %v3901_v28  ;;  %v1741_v61 = vshrl.u32 %v1740_v6, 23  ;;  %v1569_v20 = vadd.s32 %v3839_v40, %v3836_v53 }
 0x4df   : > { %v2903_v2 = vpop.eup %2902  ;;  %vm2708_vm6 = vcmp.lt.s32.totalorder %v2707_v57, 0  ;;  %v1602_v49 = vsel %vm3916_vm4, 0, %v1600_v21  ;;  %v1672_v22 = vmul.u32 %v3859_v16, %v1656_v52  ;;  %vm1674_vm8 = vc.u32 %v3910_v24, %v3900_v38 }
 0x4e0   : > { %v2905_v51 = vpop.eup %2904  ;;  %v1503_v26 = vxor.u32 2147483648, %v2903_v2  ;;  %v1584_v30 = vsel %vm2708_vm6, 0, %v2707_v57  ;;  %v1744_v59 = vand.u32 8388607, %v1737_v37  ;;  %v1844_v44 = vand.u32 2139095040, %v3921_v8 }
 0x4e1   : > { %v1500_v36 = vxor.u32 2147483648, %v2905_v51  ;;  %v1585_v31 = vsub.s32 32, %v1584_v30  ;;  %v1589_v55 = vsub.s32 4294967266, %v1584_v30  ;;  %v1586_v40 = vshll.u32 %v3886_v17, %v1584_v30 }
 0x4e2   : > { %v1504_v53 = vsel %vm1502_vm7, %v1503_v26, %v2905_v51  ;;  %v1676_v16 = vsel %vm1674_vm8, %v1675_v46, %v3901_v28  ;;  %v2713_v34 = vadd.s32 4294967169, %v1741_v61  ;;  %vm1495_vm9 = vweird.f32 %v3507_v25 }
 0x4e3   : > { %v1501_v33 = vsel %vm1499_vm5, %v2903_v2, %v1500_v36  ;;  %v1587_v47 = vshrl.u32 %v1569_v20, %v1585_v31  ;;  %v1590_v7 = vadd.s32 127, %v1589_v55  ;;  %v1677_v10 = vadd.s32 %v1676_v16, %v1672_v22 }
 0x4e4   : > { %v1505_v35 = vsel %vm1498_vm3, %v1501_v33, %v1504_v53  ;;  %v1606_v13 = vadd.s32 3, %v1602_v49  ;;  %v1747_v56 = vadd.s32 1, %v2713_v34  ;;  %v1745_v17 = vor.u32 8388608, %v1744_v59 }
 0x4e5   : > { %v1506_v63 = vsel %vm1495_vm9, nan, %v1505_v35  ;;  %v1588_v42 = vor.u32 %v1587_v47, %v1586_v40  ;;  %v1591_v32 = vshll.u32 %v1590_v7, 23  ;;  %v1678_v5 = vadd.s32 536870912, %v1677_v10 }
 0x4e6   : > { %1508 = vst [vmem:[%s3591_s15 + $0x18] sm:$0xff] %v1506_v63  ;;  %vm1748_vm10 = vcmp.gt.s32.totalorder %v1747_v56, 0  ;;  %v1841_v14 = vand.u32 2147483647, %v3921_v8  ;;  %v1845_v21 = vshrl.u32 %v1844_v44, 23  ;;  %v3941_v41 = vand.u32 3, %v1606_v13 }
 0x4e7   : > { %v1592_v29 = vor.u32 4788187, %v1591_v32  ;;  %v1679_v28 = vshrl.u32 %v1678_v5, 30  ;;  %v1749_v50 = vsel %vm1748_vm10, %v1747_v56, 0  ;;  %v1595_v25 = vcvt.s32.f32 %v1588_v42 }
 0x4e8   : > { %v1751_v52 = vand.u32 31, %v1749_v50  ;;  %vm1619_vm11 = vcmp.lt.s32.totalorder %v3757_v45, 0  ;;  %v3945_v6 = vadd.s32 %v3900_v38, %v3910_v24  ;;  %v3947_v46 = vshll.u32 %v1745_v17, 8 }
 0x4e9   : > { %v1593_v43 = vand.u32 2147483647, %v1592_v29  ;;  %v1680_v4 = vshll.u32 %v1679_v28, 30  ;;  %v3951_v61 = vand.u32 8388607, %v1841_v14  ;;  %v3955_v49 = vshrl.u32 %v1749_v50, 5 }
 0x4ea   : > { %v1752_v57 = vsub.s32 32, %v1751_v52  ;;  %v2717_v22 = vadd.s32 4294967169, %v1845_v21  ;;  %v1703_v51 = vsub.s32 4, %v1679_v28  ;;  %v1754_v26 = vshll.u32 %v3025_v54, %v1751_v52 }
 0x4eb   : > { %v1596_v2 = vmul.f32 %v1595_v25, %v1593_v43  ;;  %v3953_v20 = vsub.s32 %v1677_v10, %v1680_v4  ;;  %v1757_v36 = vshll.u32 %v3026_v58, %v1751_v52  ;;  %v1760_v44 = vshll.u32 %v3027_v60, %v1751_v52 }
 0x4ec   : > { %v1755_v30 = vshrl.u32 %v3026_v58, %v1752_v57  ;;  %v1758_v38 = vshrl.u32 %v3027_v60, %v1752_v57  ;;  %v1761_v31 = vshrl.u32 %v3028_v62, %v1752_v57  ;;  %v1763_v53 = vshll.u32 %v3028_v62, %v1751_v52 }
 0x4ed   : > { %v1597_v24 = vxor.u32 2147483648, %v1596_v2  ;;  %v1683_v59 = vsub.s32 0, %v3953_v20  ;;  %v1764_v40 = vshrl.u32 %v3029_v0, %v1752_v57  ;;  %v1766_v47 = vshll.u32 %v3029_v0, %v1751_v52 }
 0x4ee   : > { %v1756_v55 = vor.u32 %v1755_v30, %v1754_v26  ;;  %v1759_v33 = vor.u32 %v1758_v38, %v1757_v36  ;;  %v1762_v10 = vor.u32 %v1761_v31, %v1760_v44  ;;  %v1767_v13 = vshrl.u32 %v3030_v11, %v1752_v57 }
 0x4ef   : > { %v1598_v16 = vsel %vm1515_vm2, %v1597_v24, %v1596_v2  ;;  %v2710_v34 = vmin.u32 %v1683_v59, %v3953_v20  ;;  %v1765_v35 = vor.u32 %v1764_v40, %v1763_v53  ;;  %v1849_v63 = vor.u32 8388608, %v3951_v61 }
 0x4f0   : > { %v1601_v7 = vsel %vm3916_vm4, %v3710_v1, %v1598_v16  ;;  %v1851_v42 = vadd.s32 1, %v2717_v22  ;;  %vm3977_vm13 = vcmp.le.f32.partialorder %v1617_v48, 0.7853982  ;;  %v1704_v9 = vsel %vm1619_vm11, %v1703_v51, %v1679_v28 }
 0x4f1   : > { %2906 = vcosq.f32 %v1601_v7  ;;  %v1685_v56 = vclz %v2710_v34  ;;  %v1753_v5 = vshrl.u32 %v3025_v54, %v1752_v57  ;;  %v1768_v17 = vor.u32 %v1767_v13, %v1766_v47 }
 0x4f2   : > { %2908 = vsinq.f32 %v1601_v7  ;;  %vm1769_vm12 = vcmp.lt.s32.totalorder %v3955_v49, 1  ;;  %vm1771_vm14 = vcmp.lt.s32.totalorder %v3955_v49, 3  ;;  %vm1772_vm15 = vcmp.lt.s32.totalorder %v3955_v49, 4 }
 0x4f3   : > { %v2711_v29 = vadd.s32 4294967294, %v1685_v56  ;;  %v1774_v50 = vsel %vm1772_vm15, %v1762_v10, 2102212464  ;;  %v1777_v21 = vsel %vm1769_vm12, %v1756_v55, %v1759_v33  ;;  %v1778_v52 = vsel %vm1772_vm15, %v1765_v35, 920167782 }
 0x4f4   : > { %v1781_v48 = vsel %vm1769_vm12, %v1759_v33, %v1762_v10  ;;  %vm1770_vm1 = vcmp.lt.s32.totalorder %v3955_v49, 2  ;;  %v1779_v28 = vsel %vm1771_vm14, %v1762_v10, %v1778_v52  ;;  %v1782_v43 = vsel %vm1772_vm15, %v1768_v17, 1326507024 }
 0x4f5   : > { %vm2712_vm0 = vcmp.lt.s32.totalorder %v2711_v29, 0  ;;  %vm1609_vm2 = vcmp.eq.s32.totalorder %v3941_v41, 0  ;;  %v1773_v4 = vsel %vm1769_vm12, %v1753_v5, %v1756_v55  ;;  %v1780_v57 = vsel %vm1770_vm1, %v1777_v21, %v1779_v28 }
 0x4f6   : > { %v1688_v25 = vsel %vm2712_vm0, 0, %v2711_v29  ;;  %v1783_v61 = vsel %vm1771_vm14, %v1765_v35, %v1782_v43  ;;  %vm1608_vm3 = vcmp.lt.s32.totalorder %v3941_v41, 2  ;;  %v1775_v51 = vsel %vm1771_vm14, %v1759_v33, %v1774_v50 }
 0x4f7   : > { %v1689_v2 = vsub.s32 32, %v1688_v25  ;;  %v1693_v22 = vsub.s32 4294967266, %v1688_v25  ;;  %v1784_v26 = vsel %vm1770_vm1, %v1781_v48, %v1783_v61  ;;  %vm1605_vm4 = vweird.f32 %v3710_v1 }
 0x4f8   : > { %v4002_v30 = vmul.u32.u64.low %v3947_v46, %v1784_v26  ;;  %v4003_v38 = vmul.u32.u64.high %v3947_v46, %v1784_v26, %v4002_v30  ;;  %v4006_v24 = vmul.u32.u64.low %v3947_v46, %v1780_v57  ;;  %v4007_v59 = vmul.u32.u64.high %v3947_v46, %v1780_v57, %v4006_v24 }
 0x4f9   : > { %v1690_v36 = vshll.u32 %v3953_v20, %v1688_v25  ;;  %v1691_v31 = vshrl.u32 %v3945_v6, %v1689_v2  ;;  %v1694_v55 = vadd.s32 127, %v1693_v22  ;;  %vm1852_vm5 = vcmp.gt.s32.totalorder %v1851_v42, 0 }
 0x4fa   : > { %vm1612_vm7 = vcmp.eq.s32.totalorder %v3941_v41, 2  ;;  %v1776_v44 = vsel %vm1770_vm1, %v1773_v4, %v1775_v51  ;;  %v1853_v53 = vsel %vm1852_vm5, %v1851_v42, 0  ;;  %v4015_v40 = vshll.u32 %v1849_v63, 8 }
 0x4fb   : > { %v2907_v16 = vpop.eup %2906  ;;  %v1692_v34 = vor.u32 %v1691_v31, %v1690_v36  ;;  %v1695_v33 = vshll.u32 %v1694_v55, 23  ;;  %v1706_v47 = vsel %vm3977_vm13, 0, %v1704_v9  ;;  %v1855_v7 = vand.u32 31, %v1853_v53 }
 0x4fc   : > { %v2909_v20 = vpop.eup %2908  ;;  %v1613_v10 = vxor.u32 2147483648, %v2907_v16  ;;  %vm1794_vm6 = vc.u32 %v4003_v38, %v4006_v24  ;;  %v1795_v6 = vadd.s32 1, %v4007_v59  ;;  %v1947_v49 = vmul.f32 %v3276_v12, %v3288_v39 }
 0x4fd   : > { %v1610_v35 = vxor.u32 2147483648, %v2909_v20  ;;  %v1696_v13 = vor.u32 4788187, %v1695_v33  ;;  %v1792_v56 = vmul.u32 %v3947_v46, %v1776_v44  ;;  %v1856_v63 = vsub.s32 32, %v1855_v7 }
 0x4fe   : > { %v1614_v42 = vsel %vm1612_vm7, %v1613_v10, %v2909_v20  ;;  %v1710_v9 = vadd.s32 3, %v1706_v47  ;;  %v1796_v5 = vsel %vm1794_vm6, %v1795_v6, %v4007_v59  ;;  %v4030_v17 = vmul.f32 %v3276_v12, %v3300_v27 }
 0x4ff   : > { %v1611_v29 = vsel %vm1609_vm2, %v2907_v16, %v1610_v35  ;;  %v1697_v50 = vand.u32 2147483647, %v1696_v13  ;;  %v1699_v21 = vcvt.s32.f32 %v1692_v34  ;;  %v1797_v52 = vadd.s32 %v1796_v5, %v1792_v56 }
 0x500   : > { %v1615_v46 = vsel %vm1608_vm3, %v1611_v29, %v1614_v42  ;;  %v1858_v48 = vshll.u32 %v3025_v54, %v1855_v7  ;;  %v1859_v28 = vshrl.u32 %v3026_v58, %v1856_v63  ;;  %v1862_v43 = vshrl.u32 %v3027_v60, %v1856_v63 }
 0x501   : > { %v1616_v25 = vsel %vm1605_vm4, nan, %v1615_v46  ;;  %v1700_v12 = vmul.f32 %v1699_v21, %v1697_v50  ;;  %v1798_v4 = vadd.s32 536870912, %v1797_v52  ;;  %v1865_v57 = vshrl.u32 %v3028_v62, %v1856_v63 }
 0x502   : > { %1721 = vst [vmem:[%s3591_s15 + $0x50] sm:$0xff] %v1616_v25  ;;  %v1854_v61 = vshrl.u32 %v1853_v53, 5  ;;  %v1861_v2 = vshll.u32 %v3026_v58, %v1855_v7  ;;  %v1864_v41 = vshll.u32 %v3027_v60, %v1855_v7  ;;  %v1868_v22 = vshrl.u32 %v3029_v0, %v1856_v63 }
 0x503   : > { %v1701_v51 = vxor.u32 2147483648, %v1700_v12  ;;  %v1799_v26 = vshrl.u32 %v1798_v4, 30  ;;  %v1860_v30 = vor.u32 %v1859_v28, %v1858_v48  ;;  %v1867_v59 = vshll.u32 %v3028_v62, %v1855_v7 }
 0x504   : > { %v1863_v36 = vor.u32 %v1862_v43, %v1861_v2  ;;  %v1866_v1 = vor.u32 %v1865_v57, %v1864_v41  ;;  %v1870_v31 = vshll.u32 %v3029_v0, %v1855_v7  ;;  %v1871_v55 = vshrl.u32 %v3030_v11, %v1856_v63 }
 0x505   : > { %v1702_v44 = vsel %vm1619_vm11, %v1701_v51, %v1700_v12  ;;  %v4051_v53 = vand.u32 3, %v1710_v9  ;;  %v1800_v16 = vshll.u32 %v1799_v26, 30  ;;  %v1869_v34 = vor.u32 %v1868_v22, %v1867_v59 }
 0x506   : > { %v1705_v33 = vsel %vm3977_vm13, %v3757_v45, %v1702_v44  ;;  %v1857_v47 = vshrl.u32 %v3025_v54, %v1856_v63  ;;  %v1872_v20 = vor.u32 %v1871_v55, %v1870_v31  ;;  %v4058_v10 = vadd.f32 %v1947_v49, %v3872_v3 }
 0x507   : > { %2910 = vcosq.f32 %v1705_v33  ;;  %v4060_v7 = vsub.s32 %v1797_v52, %v1800_v16  ;;  %vm1873_vm8 = vcmp.lt.s32.totalorder %v1854_v61, 1  ;;  %vm1876_vm9 = vcmp.lt.s32.totalorder %v1854_v61, 4 }
 0x508   : > { %2912 = vsinq.f32 %v1705_v33  ;;  %vm1874_vm10 = vcmp.lt.s32.totalorder %v1854_v61, 2  ;;  %v1878_v6 = vsel %vm1876_vm9, %v1866_v1, 2102212464  ;;  %v1881_v35 = vsel %vm1873_vm8, %v1860_v30, %v1863_v36 }
 0x509   : > { %v1803_v13 = vsub.s32 0, %v4060_v7  ;;  %v1823_v56 = vsub.s32 4, %v1799_v26  ;;  %vm1875_vm11 = vcmp.lt.s32.totalorder %v1854_v61, 3  ;;  %v1882_v32 = vsel %vm1876_vm9, %v1869_v34, 920167782 }
 0x50a   : > { %v1877_v42 = vsel %vm1873_vm8, %v1857_v47, %v1860_v30  ;;  %v1883_v63 = vsel %vm1875_vm11, %v1866_v1, %v1882_v32  ;;  %v1885_v9 = vsel %vm1873_vm8, %v1863_v36, %v1866_v1  ;;  %v1886_v5 = vsel %vm1876_vm9, %v1872_v20, 1326507024 }
 0x50b   : > { %v2714_v49 = vmin.u32 %v1803_v13, %v4060_v7  ;;  %v1879_v29 = vsel %vm1875_vm11, %v1863_v36, %v1878_v6  ;;  %v1884_v50 = vsel %vm1874_vm10, %v1881_v35, %v1883_v63  ;;  %v1887_v21 = vsel %vm1875_vm11, %v1869_v34, %v1886_v5 }
 0x50c   : > { %v1888_v52 = vsel %vm1874_vm10, %v1885_v9, %v1887_v21  ;;  %v4067_v46 = vmul.u32.u64.low %v4015_v40, %v1884_v50  ;;  %v4068_v48 = vmul.u32.u64.high %v4015_v40, %v1884_v50, %v4067_v46  ;;  %vm4073_vm13 = vcmp.le.f32.partialorder %v1737_v37, 0.7853982 }
 0x50d   : > { %vm1739_vm12 = vcmp.lt.s32.totalorder %v3880_v23, 0  ;;  %v1805_v43 = vclz %v2714_v49  ;;  %v1880_v12 = vsel %vm1874_vm10, %v1877_v42, %v1879_v29  ;;  %vm1712_vm14 = vcmp.lt.s32.totalorder %v4051_v53, 2 }
 0x50e   : > { %v1824_v25 = vsel %vm1739_vm12, %v1823_v56, %v1799_v26  ;;  %v4082_v4 = vmul.u32.u64.low %v4015_v40, %v1888_v52  ;;  %v4083_v57 = vmul.u32.u64.high %v4015_v40, %v1888_v52, %v4082_v4  ;;  %v4088_v37 = vadd.f32 %v4030_v17, %v3872_v3 }
 0x50f   : > { %v2715_v2 = vadd.s32 4294967294, %v1805_v43  ;;  %v1954_v41 = vand.u32 2139095040, %v4058_v10  ;;  %vm1713_vm15 = vcmp.eq.s32.totalorder %v4051_v53, 0  ;;  %vm1716_vm0 = vcmp.eq.s32.totalorder %v4051_v53, 2 }
 0x510   : > { %v1793_v61 = vadd.s32 %v4006_v24, %v4003_v38  ;;  %v1899_v22 = vadd.s32 1, %v4068_v48  ;;  %v1826_v26 = vsel %vm4073_vm13, 0, %v1824_v25  ;;  %v1896_v30 = vmul.u32 %v4015_v40, %v1880_v12 }
 0x511   : > { %v2911_v51 = vpop.eup %2910  ;;  %vm2716_vm1 = vcmp.lt.s32.totalorder %v2715_v2, 0  ;;  %v1955_v3 = vshrl.u32 %v1954_v41, 23  ;;  %vm1898_vm2 = vc.u32 %v4083_v57, %v4067_v46  ;;  %v1951_v1 = vand.u32 2147483647, %v4058_v10 }
 0x512   : > { %v2913_v17 = vpop.eup %2912  ;;  %v1717_v59 = vxor.u32 2147483648, %v2911_v51  ;;  %v1808_v36 = vsel %vm2716_vm1, 0, %v2715_v2  ;;  %v2058_v55 = vand.u32 2139095040, %v4088_v37  ;;  %v1900_v16 = vsel %vm1898_vm2, %v1899_v22, %v4068_v48 }
 0x513   : > { %v1714_v31 = vxor.u32 2147483648, %v2913_v17  ;;  %v1809_v38 = vsub.s32 32, %v1808_v36  ;;  %v1813_v24 = vsub.s32 4294967266, %v1808_v36  ;;  %v1810_v40 = vshll.u32 %v4060_v7, %v1808_v36 }
 0x514   : > { %v1718_v44 = vsel %vm1716_vm0, %v1717_v59, %v2913_v17  ;;  %v2721_v34 = vadd.s32 4294967169, %v1955_v3  ;;  %v1901_v6 = vadd.s32 %v1900_v16, %v1896_v30  ;;  %vm1709_vm3 = vweird.f32 %v3757_v45 }
 0x515   : > { %v1715_v33 = vsel %vm1713_vm15, %v2911_v51, %v1714_v31  ;;  %v1811_v47 = vshrl.u32 %v1793_v61, %v1809_v38  ;;  %v1814_v20 = vadd.s32 127, %v1813_v24  ;;  %v1830_v13 = vadd.s32 3, %v1826_v26 }
 0x516   : > { %v1719_v35 = vsel %vm1712_vm14, %v1715_v33, %v1718_v44  ;;  %v1961_v56 = vadd.s32 1, %v2721_v34  ;;  %v1902_v7 = vadd.s32 536870912, %v1901_v6  ;;  %v1958_v9 = vand.u32 8388607, %v1951_v1 }
 0x517   : > { %v1720_v32 = vsel %vm1709_vm3, nan, %v1719_v35  ;;  %v1812_v42 = vor.u32 %v1811_v47, %v1810_v40  ;;  %v1815_v63 = vshll.u32 %v1814_v20, 23  ;;  %v2059_v50 = vshrl.u32 %v2058_v55, 23 }
 0x518   : > { %1722 = vst [vmem:[%s3591_s15 + $0x58] sm:$0xff] %v1720_v32  ;;  %vm1962_vm4 = vcmp.gt.s32.totalorder %v1961_v56, 0  ;;  %v1903_v49 = vshrl.u32 %v1902_v7, 30  ;;  %v4115_v21 = vand.u32 3, %v1830_v13  ;;  %vm1843_vm5 = vcmp.lt.s32.totalorder %v3921_v8, 0 }
 0x519   : > { %v1816_v5 = vor.u32 4788187, %v1815_v63  ;;  %v1963_v29 = vsel %vm1962_vm4, %v1961_v56, 0  ;;  %v4120_v53 = vmul.f32 %v3463_v18, %v3279_v15  ;;  %v1819_v48 = vcvt.s32.f32 %v1812_v42 }
 0x51a   : > { %v1965_v45 = vand.u32 31, %v1963_v29  ;;  %vm4124_vm7 = vcmp.le.f32.partialorder %v1841_v14, 0.7853982  ;;  %v1904_v25 = vshll.u32 %v1903_v49, 30  ;;  %v2055_v12 = vand.u32 2147483647, %v4088_v37 }
 0x51b   : > { %v1817_v52 = vand.u32 2147483647, %v1816_v5  ;;  %v1897_v4 = vadd.s32 %v4067_v46, %v4083_v57  ;;  %v1927_v2 = vsub.s32 4, %v1903_v49  ;;  %v1959_v41 = vor.u32 8388608, %v1958_v9 }
 0x51c   : > { %v1966_v61 = vsub.s32 32, %v1965_v45  ;;  %v4131_v15 = vsub.s32 %v1901_v6, %v1904_v25  ;;  %v1964_v51 = vshrl.u32 %v1963_v29, 5  ;;  %v2725_v26 = vadd.s32 4294967169, %v2059_v50 }
 0x51d   : > { %v1820_v22 = vmul.f32 %v1819_v48, %v1817_v52  ;;  %v1968_v30 = vshll.u32 %v3025_v54, %v1965_v45  ;;  %v1971_v3 = vshll.u32 %v3026_v58, %v1965_v45  ;;  %v1974_v46 = vshll.u32 %v3027_v60, %v1965_v45 }
 0x51e   : > { %v1969_v14 = vshrl.u32 %v3026_v58, %v1966_v61  ;;  %v1972_v17 = vshrl.u32 %v3027_v60, %v1966_v61  ;;  %v1907_v36 = vsub.s32 0, %v4131_v15  ;;  %v1975_v57 = vshrl.u32 %v3028_v62, %v1966_v61 }
 0x51f   : > { %v1821_v59 = vxor.u32 2147483648, %v1820_v22  ;;  %v1928_v31 = vsel %vm1843_vm5, %v1927_v2, %v1903_v49  ;;  %v1977_v24 = vshll.u32 %v3028_v62, %v1965_v45  ;;  %v1978_v55 = vshrl.u32 %v3029_v0, %v1966_v61 }
 0x520   : > { %v1970_v38 = vor.u32 %v1969_v14, %v1968_v30  ;;  %v2718_v40 = vmin.u32 %v1907_v36, %v4131_v15  ;;  %v1973_v16 = vor.u32 %v1972_v17, %v1971_v3  ;;  %v1980_v34 = vshll.u32 %v3029_v0, %v1965_v45 }
 0x521   : > { %v1822_v44 = vsel %vm1739_vm12, %v1821_v59, %v1820_v22  ;;  %v1976_v47 = vor.u32 %v1975_v57, %v1974_v46  ;;  %v1979_v20 = vor.u32 %v1978_v55, %v1977_v24  ;;  %v1981_v6 = vshrl.u32 %v3030_v11, %v1966_v61 }
 0x522   : > { %v1825_v33 = vsel %vm4073_vm13, %v3880_v23, %v1822_v44  ;;  %v1909_v35 = vclz %v2718_v40  ;;  %v1999_v13 = vshll.u32 %v1959_v41, 8  ;;  %v2065_v56 = vadd.s32 1, %v2725_v26 }
 0x523   : > { %2914 = vcosq.f32 %v1825_v33  ;;  %v1930_v32 = vsel %vm4124_vm7, 0, %v1928_v31  ;;  %v1967_v42 = vshrl.u32 %v3025_v54, %v1966_v61  ;;  %v1982_v63 = vor.u32 %v1981_v6, %v1980_v34 }
 0x524   : > { %2916 = vsinq.f32 %v1825_v33  ;;  %v2719_v7 = vadd.s32 4294967294, %v1909_v35  ;;  %vm1983_vm6 = vcmp.lt.s32.totalorder %v1964_v51, 1  ;;  %vm1985_vm8 = vcmp.lt.s32.totalorder %v1964_v51, 3 }
 0x525   : > { %vm1986_vm9 = vcmp.lt.s32.totalorder %v1964_v51, 4  ;;  %v1991_v9 = vsel %vm1983_vm6, %v1970_v38, %v1973_v16  ;;  %v1995_v49 = vsel %vm1983_vm6, %v1973_v16, %v1976_v47  ;;  %vm1984_vm11 = vcmp.lt.s32.totalorder %v1964_v51, 2 }
 0x526   : > { %v1988_v28 = vsel %vm1986_vm9, %v1976_v47, 2102212464  ;;  %v1992_v5 = vsel %vm1986_vm9, %v1979_v20, 920167782  ;;  %vm2720_vm10 = vcmp.lt.s32.totalorder %v2719_v7, 0  ;;  %v1987_v52 = vsel %vm1983_vm6, %v1967_v42, %v1970_v38 }
 0x527   : > { %v1993_v29 = vsel %vm1985_vm8, %v1976_v47, %v1992_v5  ;;  %v1996_v50 = vsel %vm1986_vm9, %v1982_v63, 1326507024  ;;  %v1912_v45 = vsel %vm2720_vm10, 0, %v2719_v7  ;;  %vm1832_vm13 = vcmp.lt.s32.totalorder %v4115_v21, 2 }
 0x528   : > { %v1994_v48 = vsel %vm1984_vm11, %v1991_v9, %v1993_v29  ;;  %v1997_v25 = vsel %vm1985_vm8, %v1979_v20, %v1996_v50  ;;  %v1913_v2 = vsub.s32 32, %v1912_v45  ;;  %v1917_v41 = vsub.s32 4294967266, %v1912_v45 }
 0x529   : > { %v1989_v61 = vsel %vm1985_vm8, %v1973_v16, %v1988_v28  ;;  %v1998_v22 = vsel %vm1984_vm11, %v1995_v49, %v1997_v25  ;;  %vm1829_vm12 = vweird.f32 %v3880_v23  ;;  %v1914_v17 = vshll.u32 %v4131_v15, %v1912_v45 }
 0x52a   : > { %v4162_v26 = vmul.u32.u64.low %v1999_v13, %v1998_v22  ;;  %v4163_v30 = vmul.u32.u64.high %v1999_v13, %v1998_v22, %v4162_v26  ;;  %v4165_v14 = vmul.u32.u64.low %v1999_v13, %v1994_v48  ;;  %v4166_v3 = vmul.u32.u64.high %v1999_v13, %v1994_v48, %v4165_v14 }
 0x52b   : > { %v1915_v59 = vshrl.u32 %v1897_v4, %v1913_v2  ;;  %v1918_v36 = vadd.s32 127, %v1917_v41  ;;  %vm2066_vm14 = vcmp.gt.s32.totalorder %v2065_v56, 0  ;;  %v1934_v46 = vadd.s32 3, %v1930_v32  ;;  %v4196_v26 = vpop.permute.xlu0 %2170 }
 0x52c   : > { %v1990_v57 = vsel %vm1984_vm11, %v1987_v52, %v1989_v61  ;;  %v2062_v31 = vand.u32 8388607, %v2055_v12  ;;  %v2067_v38 = vsel %vm2066_vm14, %v2065_v56, 0  ;;  %vm1833_vm15 = vcmp.eq.s32.totalorder %v4115_v21, 0 }
 0x52d   : > { %v2915_v24 = vpop.eup %2914  ;;  %v1916_v55 = vor.u32 %v1915_v59, %v1914_v17  ;;  %v1919_v44 = vshll.u32 %v1918_v36, 23  ;;  %v2069_v40 = vand.u32 31, %v2067_v38  ;;  %vm1836_vm0 = vcmp.eq.s32.totalorder %v4115_v21, 2 }
 0x52e   : > { %v2917_v16 = vpop.eup %2916  ;;  %v1837_v15 = vxor.u32 2147483648, %v2915_v24  ;;  %vm2008_vm1 = vc.u32 %v4163_v30, %v4165_v14  ;;  %v2009_v4 = vadd.s32 1, %v4166_v3  ;;  %v2006_v33 = vmul.u32 %v1999_v13, %v1990_v57 }
 0x52f   : > { %v1834_v51 = vxor.u32 2147483648, %v2917_v16  ;;  %v1920_v34 = vor.u32 4788187, %v1919_v44  ;;  %v2070_v47 = vsub.s32 32, %v2069_v40  ;;  %v4178_v6 = vand.u32 3, %v1934_v46 }
 0x530   : > { %v1838_v20 = vsel %vm1836_vm0, %v1837_v15, %v2917_v16  ;;  %v2010_v35 = vsel %vm2008_vm1, %v2009_v4, %v4166_v3  ;;  %v2063_v56 = vor.u32 8388608, %v2062_v31  ;;  %v1923_v63 = vcvt.s32.f32 %v1916_v55 }
 0x531   : > { %v1835_v32 = vsel %vm1833_vm15, %v2915_v24, %v1834_v51  ;;  %v1921_v42 = vand.u32 2147483647, %v1920_v34  ;;  %v2011_v7 = vadd.s32 %v2010_v35, %v2006_v33  ;;  %v2072_v9 = vshll.u32 %v3025_v54, %v2069_v40 }
 0x532   : > { %v1839_v28 = vsel %vm1832_vm13, %v1835_v32, %v1838_v20  ;;  %v2073_v13 = vshrl.u32 %v3026_v58, %v2070_v47  ;;  %v2076_v5 = vshrl.u32 %v3027_v60, %v2070_v47  ;;  %v2079_v45 = vshrl.u32 %v3028_v62, %v2070_v47 }
 0x533   : > { %v1840_v49 = vsel %vm1829_vm12, nan, %v1839_v28  ;;  %v1924_v29 = vmul.f32 %v1923_v63, %v1921_v42  ;;  %v2012_v50 = vadd.s32 536870912, %v2011_v7  ;;  %v2068_v52 = vshrl.u32 %v2067_v38, 5 }
 0x534   : > { %1945 = vst [vmem:[%s3591_s15 + $0x20] sm:$0xff] %v1840_v49  ;;  %v2075_v48 = vshll.u32 %v3026_v58, %v2069_v40  ;;  %v2078_v21 = vshll.u32 %v3027_v60, %v2069_v40  ;;  %v2082_v25 = vshrl.u32 %v3029_v0, %v2070_v47  ;;  %v2074_v61 = vor.u32 %v2073_v13, %v2072_v9 }
 0x535   : > { %v1925_v2 = vxor.u32 2147483648, %v1924_v29  ;;  %v2013_v41 = vshrl.u32 %v2012_v50, 30  ;;  %v2081_v22 = vshll.u32 %v3028_v62, %v2069_v40  ;;  %v2084_v17 = vshll.u32 %v3029_v0, %v2069_v40 }
 0x536   : > { %v2077_v23 = vor.u32 %v2076_v5, %v2075_v48  ;;  %v2080_v3 = vor.u32 %v2079_v45, %v2078_v21  ;;  %v2085_v59 = vshrl.u32 %v3030_v11, %v2070_v47  ;;  %v4202_v31 = vshll.u32 %v2063_v56, 8 }
 0x537   : > { %v1926_v36 = vsel %vm1843_vm5, %v1925_v2, %v1924_v29  ;;  %v2014_v46 = vshll.u32 %v2013_v41, 30  ;;  %v2083_v57 = vor.u32 %v2082_v25, %v2081_v22  ;;  %v2071_v24 = vshrl.u32 %v3025_v54, %v2070_v47 }
 0x538   : > { %v1929_v38 = vsel %vm4124_vm7, %v3921_v8, %v1926_v36  ;;  %v2086_v55 = vor.u32 %v2085_v59, %v2084_v17  ;;  %v4210_v44 = vadd.f32 %v4196_v26, %v4120_v53  ;;  %vm2087_vm2 = vcmp.lt.s32.totalorder %v2068_v52, 1 }
 0x539   : > { %2918 = vcosq.f32 %v1929_v38  ;;  %v4212_v40 = vsub.s32 %v2011_v7, %v2014_v46  ;;  %vm2090_vm3 = vcmp.lt.s32.totalorder %v2068_v52, 4  ;;  %vm2088_vm4 = vcmp.lt.s32.totalorder %v2068_v52, 2 }
 0x53a   : > { %2920 = vsinq.f32 %v1929_v38  ;;  %v2092_v16 = vsel %vm2090_vm3, %v2080_v3, 2102212464  ;;  %v2095_v15 = vsel %vm2087_vm2, %v2074_v61, %v2077_v23  ;;  %v2037_v43 = vsub.s32 4, %v2013_v41 }
 0x53b   : > { %v2017_v4 = vsub.s32 0, %v4212_v40  ;;  %vm2089_vm5 = vcmp.lt.s32.totalorder %v2068_v52, 3  ;;  %v2096_v51 = vsel %vm2090_vm3, %v2083_v57, 920167782  ;;  %v2091_v34 = vsel %vm2087_vm2, %v2071_v24, %v2074_v61 }
 0x53c   : > { %v2097_v33 = vsel %vm2089_vm5, %v2080_v3, %v2096_v51  ;;  %v2099_v47 = vsel %vm2087_vm2, %v2077_v23, %v2080_v3  ;;  %v2100_v20 = vsel %vm2090_vm3, %v2086_v55, 1326507024  ;;  %v2093_v35 = vsel %vm2089_vm5, %v2077_v23, %v2092_v16 }
 0x53d   : > { %v2722_v53 = vmin.u32 %v2017_v4, %v4212_v40  ;;  %v2098_v56 = vsel %vm2088_vm4, %v2095_v15, %v2097_v33  ;;  %v2101_v32 = vsel %vm2089_vm5, %v2083_v57, %v2100_v20  ;;  %vm4225_vm7 = vcmp.le.f32.partialorder %v1951_v1, 0.7853982 }
 0x53e   : > { %v2102_v42 = vsel %vm2088_vm4, %v2099_v47, %v2101_v32  ;;  %v4219_v63 = vmul.u32.u64.low %v4202_v31, %v2098_v56  ;;  %v4220_v7 = vmul.u32.u64.high %v4202_v31, %v2098_v56, %v4219_v63  ;;  %vm1953_vm6 = vcmp.lt.s32.totalorder %v4058_v10, 0 }
 0x53f   : > { %v2019_v9 = vclz %v2722_v53  ;;  %v2167_v13 = vmul.f32 %v3463_v18, %v3282_v19  ;;  %v2038_v5 = vsel %vm1953_vm6, %v2037_v43, %v2013_v41  ;;  %v2094_v49 = vsel %vm2088_vm4, %v2091_v34, %v2093_v35 }
 0x540   : > { %v4236_v29 = vmul.u32.u64.low %v4202_v31, %v2102_v42  ;;  %v4237_v50 = vmul.u32.u64.high %v4202_v31, %v2102_v42, %v4236_v29  ;;  %vm1936_vm8 = vcmp.lt.s32.totalorder %v4178_v6, 2  ;;  %v2178_v48 = vand.u32 2139095040, %v4210_v44 }
 0x541   : > { %v2723_v1 = vadd.s32 4294967294, %v2019_v9  ;;  %v4241_v45 = vadd.f32 %v4196_v26, %v2167_v13  ;;  %vm1937_vm9 = vcmp.eq.s32.totalorder %v4178_v6, 0  ;;  %vm1940_vm10 = vcmp.eq.s32.totalorder %v4178_v6, 2 }
 0x542   : > { %v2007_v19 = vadd.s32 %v4165_v14, %v4163_v30  ;;  %v2113_v52 = vadd.s32 1, %v4220_v7  ;;  %v2040_v25 = vsel %vm4225_vm7, 0, %v2038_v5  ;;  %v2110_v2 = vmul.u32 %v4202_v31, %v2094_v49 }
 0x543   : > { %v2919_v21 = vpop.eup %2918  ;;  %vm2724_vm11 = vcmp.lt.s32.totalorder %v2723_v1, 0  ;;  %v2179_v41 = vshrl.u32 %v2178_v48, 23  ;;  %vm2112_vm13 = vc.u32 %v4237_v50, %v4219_v63  ;;  %v2175_v3 = vand.u32 2147483647, %v4210_v44 }
 0x544   : > { %v2921_v61 = vpop.eup %2920  ;;  %v1941_v22 = vxor.u32 2147483648, %v2919_v21  ;;  %v2022_v23 = vsel %vm2724_vm11, 0, %v2723_v1  ;;  %v2282_v59 = vand.u32 2139095040, %v4241_v45  ;;  %v2114_v57 = vsel %vm2112_vm13, %v2113_v52, %v4220_v7 }
 0x545   : > { %v1938_v17 = vxor.u32 2147483648, %v2921_v61  ;;  %v2023_v30 = vsub.s32 32, %v2022_v23  ;;  %v2027_v14 = vsub.s32 4294967266, %v2022_v23  ;;  %v2024_v46 = vshll.u32 %v4212_v40, %v2022_v23 }
 0x546   : > { %v1942_v36 = vsel %vm1940_vm10, %v1941_v22, %v2921_v61  ;;  %v2729_v31 = vadd.s32 4294967169, %v2179_v41  ;;  %v2115_v16 = vadd.s32 %v2114_v57, %v2110_v2  ;;  %vm1933_vm12 = vweird.f32 %v3921_v8 }
 0x547   : > { %v1939_v38 = vsel %vm1937_vm9, %v2919_v21, %v1938_v17  ;;  %v2025_v24 = vshrl.u32 %v2007_v19, %v2023_v30  ;;  %v2028_v55 = vadd.s32 127, %v2027_v14  ;;  %v2044_v4 = vadd.s32 3, %v2040_v25 }
 0x548   : > { %v1943_v15 = vsel %vm1936_vm8, %v1939_v38, %v1942_v36  ;;  %v2185_v43 = vadd.s32 1, %v2729_v31  ;;  %v2116_v40 = vadd.s32 536870912, %v2115_v16  ;;  %v2182_v47 = vand.u32 8388607, %v2175_v3 }
 0x549   : > { %v1944_v51 = vsel %vm1933_vm12, nan, %v1943_v15  ;;  %v2026_v34 = vor.u32 %v2025_v24, %v2024_v46  ;;  %v2029_v33 = vshll.u32 %v2028_v55, 23  ;;  %v2283_v56 = vshrl.u32 %v2282_v59, 23 }
 0x54a   : > { %1946 = vst [vmem:[%s3591_s15 + $0x28] sm:$0xff] %v1944_v51  ;;  %vm2186_vm14 = vcmp.gt.s32.totalorder %v2185_v43, 0  ;;  %v2117_v53 = vshrl.u32 %v2116_v40, 30  ;;  %v4270_v8 = vmul.f32 %v3463_v18, %v3288_v39  ;;  %v4274_v6 = vmul.f32 %v3463_v18, %v3300_v27 }
 0x54b   : > { %v2030_v20 = vor.u32 4788187, %v2029_v33  ;;  %v2187_v35 = vsel %vm2186_vm14, %v2185_v43, 0  ;;  %v2033_v7 = vcvt.s32.f32 %v2026_v34  ;;  %v4276_v9 = vand.u32 3, %v2044_v4 }
 0x54c   : > { %v2189_v32 = vand.u32 31, %v2187_v35  ;;  %vm2057_vm15 = vcmp.lt.s32.totalorder %v4088_v37, 0  ;;  %v2118_v13 = vshll.u32 %v2117_v53, 30  ;;  %v2111_v5 = vadd.s32 %v4219_v63, %v4237_v50 }
 0x54d   : > { %v2031_v42 = vand.u32 2147483647, %v2030_v20  ;;  %v2183_v49 = vor.u32 8388608, %v2182_v47  ;;  %v2279_v39 = vand.u32 2147483647, %v4241_v45  ;;  %v2188_v27 = vshrl.u32 %v2187_v35, 5 }
 0x54e   : > { %v2190_v29 = vsub.s32 32, %v2189_v32  ;;  %v4282_v48 = vsub.s32 %v2115_v16, %v2118_v13  ;;  %v2733_v18 = vadd.s32 4294967169, %v2283_v56  ;;  %v2141_v19 = vsub.s32 4, %v2117_v53 }
 0x54f   : > { %v2034_v1 = vmul.f32 %v2033_v7, %v2031_v42  ;;  %v2192_v52 = vshll.u32 %v3025_v54, %v2189_v32  ;;  %v2195_v63 = vshll.u32 %v3026_v58, %v2189_v32  ;;  %v2198_v22 = vshll.u32 %v3027_v60, %v2189_v32 }
 0x550   : > { %v2193_v21 = vshrl.u32 %v3026_v58, %v2190_v29  ;;  %v2196_v25 = vshrl.u32 %v3027_v60, %v2190_v29  ;;  %v2121_v41 = vsub.s32 0, %v4282_v48  ;;  %v2199_v50 = vshrl.u32 %v3028_v62, %v2190_v29 }
 0x551   : > { %v2035_v2 = vxor.u32 2147483648, %v2034_v1  ;;  %v2201_v23 = vshll.u32 %v3028_v62, %v2189_v32  ;;  %v2202_v17 = vshrl.u32 %v3029_v0, %v2190_v29  ;;  %v2204_v36 = vshll.u32 %v3029_v0, %v2189_v32 }
 0x552   : > { %v2194_v61 = vor.u32 %v2193_v21, %v2192_v52  ;;  %v2726_v14 = vmin.u32 %v2121_v41, %v4282_v48  ;;  %v2197_v59 = vor.u32 %v2196_v25, %v2195_v63  ;;  %v2200_v57 = vor.u32 %v2199_v50, %v2198_v22 }
 0x553   : > { %v2036_v30 = vsel %vm1953_vm6, %v2035_v2, %v2034_v1  ;;  %v2203_v31 = vor.u32 %v2202_v17, %v2201_v23  ;;  %v2205_v38 = vshrl.u32 %v3030_v11, %v2190_v29  ;;  %v4301_v55 = vshll.u32 %v2183_v49, 8 }
 0x554   : > { %v2039_v46 = vsel %vm4225_vm7, %v4058_v10, %v2036_v30  ;;  %v2123_v24 = vclz %v2726_v14  ;;  %v2289_v16 = vadd.s32 1, %v2733_v18  ;;  %v2142_v15 = vsel %vm2057_vm15, %v2141_v19, %v2117_v53 }
 0x555   : > { %2922 = vcosq.f32 %v2039_v46  ;;  %v2191_v4 = vshrl.u32 %v3025_v54, %v2190_v29  ;;  %v2206_v43 = vor.u32 %v2205_v38, %v2204_v36  ;;  %vm4308_vm0 = vcmp.le.f32.partialorder %v2055_v12, 0.7853982 }
 0x556   : > { %2924 = vsinq.f32 %v2039_v46  ;;  %v2727_v51 = vadd.s32 4294967294, %v2123_v24  ;;  %vm2207_vm1 = vcmp.lt.s32.totalorder %v2188_v27, 1  ;;  %vm2209_vm2 = vcmp.lt.s32.totalorder %v2188_v27, 3 }
 0x557   : > { %vm2210_vm3 = vcmp.lt.s32.totalorder %v2188_v27, 4  ;;  %v2215_v33 = vsel %vm2207_vm1, %v2194_v61, %v2197_v59  ;;  %v2219_v47 = vsel %vm2207_vm1, %v2197_v59, %v2200_v57  ;;  %vm2208_vm5 = vcmp.lt.s32.totalorder %v2188_v27, 2 }
 0x558   : > { %v2212_v34 = vsel %vm2210_vm3, %v2200_v57, 2102212464  ;;  %v2216_v40 = vsel %vm2210_vm3, %v2203_v31, 920167782  ;;  %vm2728_vm4 = vcmp.lt.s32.totalorder %v2727_v51, 0  ;;  %v2211_v56 = vsel %vm2207_vm1, %v2191_v4, %v2194_v61 }
 0x559   : > { %v2217_v20 = vsel %vm2209_vm2, %v2200_v57, %v2216_v40  ;;  %v2220_v53 = vsel %vm2210_vm3, %v2206_v43, 1326507024  ;;  %v2126_v35 = vsel %vm2728_vm4, 0, %v2727_v51  ;;  %vm2046_vm7 = vcmp.lt.s32.totalorder %v4276_v9, 2 }
 0x55a   : > { %v2218_v12 = vsel %vm2208_vm5, %v2215_v33, %v2217_v20  ;;  %v2221_v32 = vsel %vm2209_vm2, %v2203_v31, %v2220_v53  ;;  %v2127_v42 = vsub.s32 32, %v2126_v35  ;;  %v2131_v7 = vsub.s32 4294967266, %v2126_v35 }
 0x55b   : > { %v2213_v13 = vsel %vm2209_vm2, %v2197_v59, %v2212_v34  ;;  %v2222_v49 = vsel %vm2208_vm5, %v2219_v47, %v2221_v32  ;;  %vm2043_vm6 = vweird.f32 %v4058_v10  ;;  %v2128_v52 = vshll.u32 %v4282_v48, %v2126_v35 }
 0x55c   : > { %v4320_v29 = vmul.u32.u64.low %v4301_v55, %v2222_v49  ;;  %v4321_v1 = vmul.u32.u64.high %v4301_v55, %v2222_v49, %v4320_v29  ;;  %v4324_v18 = vmul.u32.u64.low %v4301_v55, %v2218_v12  ;;  %v4325_v19 = vmul.u32.u64.high %v4301_v55, %v2218_v12, %v4324_v18 }
 0x55d   : > { %v2129_v21 = vshrl.u32 %v2111_v5, %v2127_v42  ;;  %v2132_v25 = vadd.s32 127, %v2131_v7  ;;  %vm2290_vm8 = vcmp.gt.s32.totalorder %v2289_v16, 0  ;;  %vm2047_vm9 = vcmp.eq.s32.totalorder %v4276_v9, 0 }
 0x55e   : > { %v2214_v2 = vsel %vm2208_vm5, %v2211_v56, %v2213_v13  ;;  %v2286_v41 = vand.u32 8388607, %v2279_v39  ;;  %v2291_v63 = vsel %vm2290_vm8, %v2289_v16, 0  ;;  %vm2050_vm10 = vcmp.eq.s32.totalorder %v4276_v9, 2 }
 0x55f   : > { %v2923_v50 = vpop.eup %2922  ;;  %v2130_v61 = vor.u32 %v2129_v21, %v2128_v52  ;;  %v2133_v22 = vshll.u32 %v2132_v25, 23  ;;  %v2293_v23 = vand.u32 31, %v2291_v63  ;;  %v2144_v5 = vsel %vm4308_vm0, 0, %v2142_v15 }
 0x560   : > { %v2925_v17 = vpop.eup %2924  ;;  %v2051_v30 = vxor.u32 2147483648, %v2923_v50  ;;  %vm2232_vm11 = vc.u32 %v4321_v1, %v4324_v18  ;;  %v2233_v48 = vadd.s32 1, %v4325_v19  ;;  %v2230_v59 = vmul.u32 %v4301_v55, %v2214_v2 }
 0x561   : > { %v2048_v27 = vxor.u32 2147483648, %v2925_v17  ;;  %v2134_v14 = vor.u32 4788187, %v2133_v22  ;;  %v2294_v36 = vsub.s32 32, %v2293_v23  ;;  %v2287_v31 = vor.u32 8388608, %v2286_v41 }
 0x562   : > { %v2052_v46 = vsel %vm2050_vm10, %v2051_v30, %v2925_v17  ;;  %v2234_v57 = vsel %vm2232_vm11, %v2233_v48, %v4325_v19  ;;  %v4343_v38 = vadd.f32 %v4270_v8, %v4196_v26  ;;  %v2137_v15 = vcvt.s32.f32 %v2130_v61 }
 0x563   : > { %v2049_v24 = vsel %vm2047_vm9, %v2923_v50, %v2048_v27  ;;  %v2135_v16 = vand.u32 2147483647, %v2134_v14  ;;  %v2235_v4 = vadd.s32 %v2234_v57, %v2230_v59  ;;  %v2148_v55 = vadd.s32 3, %v2144_v5 }
 0x564   : > { %v2053_v43 = vsel %vm2046_vm7, %v2049_v24, %v2052_v46  ;;  %v2297_v51 = vshrl.u32 %v3026_v58, %v2294_v36  ;;  %v2300_v34 = vshrl.u32 %v3027_v60, %v2294_v36  ;;  %v2303_v47 = vshrl.u32 %v3028_v62, %v2294_v36 }
 0x565   : > { %v2054_v33 = vsel %vm2043_vm6, nan, %v2053_v43  ;;  %v2138_v40 = vmul.f32 %v2137_v15, %v2135_v16  ;;  %v2236_v8 = vadd.s32 536870912, %v2235_v4  ;;  %v2292_v20 = vshrl.u32 %v2291_v63, 5 }
 0x566   : > { %2159 = vst [vmem:[%s3591_s15 + $0x60] sm:$0xff] %v2054_v33  ;;  %v2296_v53 = vshll.u32 %v3025_v54, %v2293_v23  ;;  %v2299_v35 = vshll.u32 %v3026_v58, %v2293_v23  ;;  %v2306_v9 = vshrl.u32 %v3029_v0, %v2294_v36  ;;  %v2302_v32 = vshll.u32 %v3027_v60, %v2293_v23 }
 0x567   : > { %v2139_v56 = vxor.u32 2147483648, %v2138_v40  ;;  %v2237_v12 = vshrl.u32 %v2236_v8, 30  ;;  %v2305_v42 = vshll.u32 %v3028_v62, %v2293_v23  ;;  %v2308_v13 = vshll.u32 %v3029_v0, %v2293_v23 }
 0x568   : > { %v2298_v10 = vor.u32 %v2297_v51, %v2296_v53  ;;  %v2301_v7 = vor.u32 %v2300_v34, %v2299_v35  ;;  %v2309_v49 = vshrl.u32 %v3030_v11, %v2294_v36  ;;  %v2304_v52 = vor.u32 %v2303_v47, %v2302_v32 }
 0x569   : > { %v2140_v29 = vsel %vm2057_vm15, %v2139_v56, %v2138_v40  ;;  %v2238_v19 = vshll.u32 %v2237_v12, 30  ;;  %v2307_v21 = vor.u32 %v2306_v9, %v2305_v42  ;;  %v4367_v2 = vand.u32 3, %v2148_v55 }
 0x56a   : > { %v2143_v25 = vsel %vm4308_vm0, %v4088_v37, %v2140_v29  ;;  %v2310_v41 = vor.u32 %v2309_v49, %v2308_v13  ;;  %v2327_v63 = vshll.u32 %v2287_v31, 8  ;;  %v2295_v61 = vshrl.u32 %v3025_v54, %v2294_v36 }
 0x56b   : > { %2926 = vcosq.f32 %v2143_v25  ;;  %v4369_v50 = vsub.s32 %v2235_v4, %v2238_v19  ;;  %vm2311_vm13 = vcmp.lt.s32.totalorder %v2292_v20, 1  ;;  %vm2312_vm12 = vcmp.lt.s32.totalorder %v2292_v20, 2 }
 0x56c   : > { %2928 = vsinq.f32 %v2143_v25  ;;  %vm2314_vm14 = vcmp.lt.s32.totalorder %v2292_v20, 4  ;;  %v2319_v22 = vsel %vm2311_vm13, %v2298_v10, %v2301_v7  ;;  %vm2313_vm15 = vcmp.lt.s32.totalorder %v2292_v20, 3 }
 0x56d   : > { %v2241_v23 = vsub.s32 0, %v4369_v50  ;;  %v2316_v17 = vsel %vm2314_vm14, %v2304_v52, 2102212464  ;;  %v2320_v28 = vsel %vm2314_vm14, %v2307_v21, 920167782  ;;  %v2261_v30 = vsub.s32 4, %v2237_v12 }
 0x56e   : > { %v2321_v5 = vsel %vm2313_vm15, %v2304_v52, %v2320_v28  ;;  %v2323_v48 = vsel %vm2311_vm13, %v2301_v7, %v2304_v52  ;;  %v2324_v27 = vsel %vm2314_vm14, %v2310_v41, 1326507024  ;;  %v2315_v59 = vsel %vm2311_vm13, %v2295_v61, %v2298_v10 }
 0x56f   : > { %v2730_v14 = vmin.u32 %v2241_v23, %v4369_v50  ;;  %v2322_v46 = vsel %vm2312_vm12, %v2319_v22, %v2321_v5  ;;  %v2325_v36 = vsel %vm2313_vm15, %v2307_v21, %v2324_v27  ;;  %v2317_v57 = vsel %vm2313_vm15, %v2301_v7, %v2316_v17 }
 0x570   : > { %v2326_v31 = vsel %vm2312_vm12, %v2323_v48, %v2325_v36  ;;  %v4376_v24 = vmul.u32.u64.low %v2327_v63, %v2322_v46  ;;  %v4377_v16 = vmul.u32.u64.high %v2327_v63, %v2322_v46, %v4376_v24  ;;  %vm4382_vm0 = vcmp.le.f32.partialorder %v2175_v3, 0.7853982 }
 0x571   : > { %vm2177_vm1 = vcmp.lt.s32.totalorder %v4210_v44, 0  ;;  %v2243_v4 = vclz %v2730_v14  ;;  %v4389_v55 = vmul.u32.u64.low %v2327_v63, %v2326_v31  ;;  %v4390_v51 = vmul.u32.u64.high %v2327_v63, %v2326_v31, %v4389_v55 }
 0x572   : > { %v2262_v43 = vsel %vm2177_vm1, %v2261_v30, %v2237_v12  ;;  %v2392_v34 = vand.u32 2139095040, %v4343_v38  ;;  %vm2150_vm2 = vcmp.lt.s32.totalorder %v4367_v2, 2  ;;  %v2318_v40 = vsel %vm2312_vm12, %v2315_v59, %v2317_v57 }
 0x573   : > { %v2731_v33 = vadd.s32 4294967294, %v2243_v4  ;;  %v4397_v3 = vadd.f32 %v4274_v6, %v4196_v26  ;;  %vm2151_vm3 = vcmp.eq.s32.totalorder %v4367_v2, 0  ;;  %vm2154_vm4 = vcmp.eq.s32.totalorder %v4367_v2, 2 }
 0x574   : > { %v2337_v8 = vadd.s32 1, %v4377_v16  ;;  %v2393_v47 = vshrl.u32 %v2392_v34, 23  ;;  %v2231_v35 = vadd.s32 %v4324_v18, %v4321_v1  ;;  %v2264_v20 = vsel %vm4382_vm0, 0, %v2262_v43 }
 0x575   : > { %v2927_v53 = vpop.eup %2926  ;;  %vm2732_vm5 = vcmp.lt.s32.totalorder %v2731_v33, 0  ;;  %v2389_v9 = vand.u32 2147483647, %v4343_v38  ;;  %v2334_v12 = vmul.u32 %v2327_v63, %v2318_v40  ;;  %vm2336_vm7 = vc.u32 %v4390_v51, %v4376_v24 }
 0x576   : > { %v2929_v56 = vpop.eup %2928  ;;  %v2155_v26 = vxor.u32 2147483648, %v2927_v53  ;;  %v2246_v6 = vsel %vm2732_vm5, 0, %v2731_v33  ;;  %v2496_v7 = vand.u32 2139095040, %v4397_v3  ;;  %v2338_v13 = vsel %vm2336_vm7, %v2337_v8, %v4377_v16 }
 0x577   : > { %v2152_v32 = vxor.u32 2147483648, %v2929_v56  ;;  %v2247_v42 = vsub.s32 32, %v2246_v6  ;;  %v2251_v10 = vsub.s32 4294967266, %v2246_v6  ;;  %v2248_v18 = vshll.u32 %v4369_v50, %v2246_v6 }
 0x578   : > { %v2156_v1 = vsel %vm2154_vm4, %v2155_v26, %v2929_v56  ;;  %v2737_v49 = vadd.s32 4294967169, %v2393_v47  ;;  %v2339_v21 = vadd.s32 %v2338_v13, %v2334_v12  ;;  %vm2147_vm6 = vweird.f32 %v4088_v37 }
 0x579   : > { %v2153_v29 = vsel %vm2151_vm3, %v2927_v53, %v2152_v32  ;;  %v2249_v19 = vshrl.u32 %v2231_v35, %v2247_v42  ;;  %v2252_v52 = vadd.s32 127, %v2251_v10  ;;  %v2268_v50 = vadd.s32 3, %v2264_v20 }
 0x57a   : > { %v2157_v25 = vsel %vm2150_vm2, %v2153_v29, %v2156_v1  ;;  %v2399_v41 = vadd.s32 1, %v2737_v49  ;;  %v2340_v23 = vadd.s32 536870912, %v2339_v21  ;;  %v2396_v17 = vand.u32 8388607, %v2389_v9 }
 0x57b   : > { %v2158_v63 = vsel %vm2147_vm6, nan, %v2157_v25  ;;  %v2250_v61 = vor.u32 %v2249_v19, %v2248_v18  ;;  %v2253_v22 = vshll.u32 %v2252_v52, 23  ;;  %v2497_v48 = vshrl.u32 %v2496_v7, 23 }
 0x57c   : > { %2160 = vst [vmem:[%s3591_s15 + $0x68] sm:$0xff] %v2158_v63  ;;  %vm2400_vm8 = vcmp.gt.s32.totalorder %v2399_v41, 0  ;;  %v4422_v30 = vshrl.u32 %v2340_v23, 30  ;;  %v4425_v59 = vand.u32 3, %v2268_v50  ;;  %v2493_v36 = vand.u32 2147483647, %v4397_v3 }
 0x57d   : > { %v2254_v28 = vor.u32 4788187, %v2253_v22  ;;  %v2401_v5 = vsel %vm2400_vm8, %v2399_v41, 0  ;;  %v2257_v2 = vcvt.s32.f32 %v2250_v61  ;;  %v2397_v16 = vor.u32 8388608, %v2396_v17 }
 0x57e   : > { %v2403_v37 = vand.u32 31, %v2401_v5  ;;  %v2342_v14 = vshll.u32 %v4422_v30, 30  ;;  %v2741_v4 = vadd.s32 4294967169, %v2497_v48  ;;  %v2402_v43 = vshrl.u32 %v2401_v5, 5 }
 0x57f   : > { %v2255_v27 = vand.u32 2147483647, %v2254_v28  ;;  %v2335_v13 = vadd.s32 %v4376_v24, %v4390_v51  ;;  %v2437_v29 = vshll.u32 %v2397_v16, 8  ;;  %vm2281_vm14 = vcmp.lt.s32.totalorder %v4241_v45, 0 }
 0x580   : > { %v2404_v46 = vsub.s32 32, %v2403_v37  ;;  %v4428_v31 = vsub.s32 %v2339_v21, %v2342_v14  ;;  %v2406_v55 = vshll.u32 %v3025_v54, %v2403_v37  ;;  %v2409_v47 = vshll.u32 %v3026_v58, %v2403_v37 }
 0x581   : > { %v2258_v57 = vmul.f32 %v2257_v2, %v2255_v27  ;;  %v2412_v20 = vshll.u32 %v3027_v60, %v2403_v37  ;;  %v2415_v56 = vshll.u32 %v3028_v62, %v2403_v37  ;;  %v2418_v42 = vshll.u32 %v3029_v0, %v2403_v37 }
 0x582   : > { %v2407_v34 = vshrl.u32 %v3026_v58, %v2404_v46  ;;  %v2410_v33 = vshrl.u32 %v3027_v60, %v2404_v46  ;;  %v2345_v8 = vsub.s32 0, %v4428_v31  ;;  %v2413_v53 = vshrl.u32 %v3028_v62, %v2404_v46 }
 0x583   : > { %v2259_v40 = vxor.u32 2147483648, %v2258_v57  ;;  %v2416_v26 = vshrl.u32 %v3029_v0, %v2404_v46  ;;  %v2419_v18 = vshrl.u32 %v3030_v11, %v2404_v46  ;;  %v2405_v19 = vshrl.u32 %v3025_v54, %v2404_v46 }
 0x584   : > { %v2408_v35 = vor.u32 %v2407_v34, %v2406_v55  ;;  %v2734_v12 = vmin.u32 %v2345_v8, %v4428_v31  ;;  %v2411_v32 = vor.u32 %v2410_v33, %v2409_v47  ;;  %v2414_v7 = vor.u32 %v2413_v53, %v2412_v20 }
 0x585   : > { %v2260_v6 = vsel %vm2177_vm1, %v2259_v40, %v2258_v57  ;;  %v2417_v1 = vor.u32 %v2416_v26, %v2415_v56  ;;  %v2420_v52 = vor.u32 %v2419_v18, %v2418_v42  ;;  %v2503_v21 = vadd.s32 1, %v2741_v4 }
 0x586   : > { %v2263_v10 = vsel %vm4382_vm0, %v4210_v44, %v2260_v6  ;;  %v2347_v49 = vclz %v2734_v12  ;;  %vm2421_vm9 = vcmp.lt.s32.totalorder %v2402_v43, 1  ;;  %vm2423_vm10 = vcmp.lt.s32.totalorder %v2402_v43, 3 }
 0x587   : > { %2930 = vcosq.f32 %v2263_v10  ;;  %vm2424_vm11 = vcmp.lt.s32.totalorder %v2402_v43, 4  ;;  %v2429_v41 = vsel %vm2421_vm9, %v2408_v35, %v2411_v32  ;;  %v2433_v61 = vsel %vm2421_vm9, %v2411_v32, %v2414_v7 }
 0x588   : > { %2932 = vsinq.f32 %v2263_v10  ;;  %v2735_v25 = vadd.s32 4294967294, %v2347_v49  ;;  %v2426_v15 = vsel %vm2424_vm11, %v2414_v7, 2102212464  ;;  %v2430_v63 = vsel %vm2424_vm11, %v2417_v1, 920167782 }
 0x589   : > { %vm2422_vm12 = vcmp.lt.s32.totalorder %v2402_v43, 2  ;;  %v2431_v22 = vsel %vm2423_vm10, %v2414_v7, %v2430_v63  ;;  %v2434_v24 = vsel %vm2424_vm11, %v2420_v52, 1326507024  ;;  %v2425_v23 = vsel %vm2421_vm9, %v2405_v19, %v2408_v35 }
 0x58a   : > { %vm2736_vm13 = vcmp.lt.s32.totalorder %v2735_v25, 0  ;;  %v2432_v50 = vsel %vm2422_vm12, %v2429_v41, %v2431_v22  ;;  %v2435_v17 = vsel %vm2423_vm10, %v2417_v1, %v2434_v24  ;;  %v2427_v48 = vsel %vm2423_vm10, %v2411_v32, %v2426_v15 }
 0x58b   : > { %v2350_v51 = vsel %vm2736_vm13, 0, %v2735_v25  ;;  %v2436_v37 = vsel %vm2422_vm12, %v2433_v61, %v2435_v17  ;;  %vm2267_vm15 = vweird.f32 %v4210_v44  ;;  %vm2504_vm0 = vcmp.gt.s32.totalorder %v2503_v21, 0 }
 0x58c   : > { %v2351_v28 = vsub.s32 32, %v2350_v51  ;;  %v2355_v5 = vsub.s32 4294967266, %v2350_v51  ;;  %v4457_v27 = vmul.u32.u64.low %v2437_v29, %v2436_v37  ;;  %v4458_v2 = vmul.u32.u64.high %v2437_v29, %v2436_v37, %v4457_v27 }
 0x58d   : > { %v4460_v14 = vmul.u32.u64.low %v2437_v29, %v2432_v50  ;;  %v4461_v46 = vmul.u32.u64.high %v2437_v29, %v2432_v50, %v4460_v14  ;;  %v2352_v57 = vshll.u32 %v4428_v31, %v2350_v51  ;;  %vm2270_vm1 = vcmp.lt.s32.totalorder %v4425_v59, 2 }
 0x58e   : > { %v2353_v16 = vshrl.u32 %v2335_v13, %v2351_v28  ;;  %v2356_v4 = vadd.s32 127, %v2355_v5  ;;  %v2428_v55 = vsel %vm2422_vm12, %v2425_v23, %v2427_v48  ;;  %v2500_v34 = vand.u32 8388607, %v2493_v36 }
 0x58f   : > { %v2505_v33 = vsel %vm2504_vm0, %v2503_v21, 0  ;;  %vm2274_vm2 = vcmp.eq.s32.totalorder %v4425_v59, 2  ;;  %vm4472_vm3 = vcmp.le.f32.partialorder %v2279_v39, 0.7853982  ;;  %v2365_v43 = vsub.s32 4, %v4422_v30 }
 0x590   : > { %v2354_v8 = vor.u32 %v2353_v16, %v2352_v57  ;;  %v2357_v47 = vshll.u32 %v2356_v4, 23  ;;  %v2507_v53 = vand.u32 31, %v2505_v33  ;;  %vm2446_vm4 = vc.u32 %v4458_v2, %v4460_v14 }
 0x591   : > { %v2931_v40 = vpop.eup %2930  ;;  %v2447_v56 = vadd.s32 1, %v4461_v46  ;;  %v2444_v12 = vmul.u32 %v2437_v29, %v2428_v55  ;;  %vm2271_vm5 = vcmp.eq.s32.totalorder %v4425_v59, 0  ;;  %v2501_v10 = vor.u32 8388608, %v2500_v34 }
 0x592   : > { %v2933_v35 = vpop.eup %2932  ;;  %v2275_v20 = vxor.u32 2147483648, %v2931_v40  ;;  %v2358_v6 = vor.u32 4788187, %v2357_v47  ;;  %v2508_v32 = vsub.s32 32, %v2507_v53  ;;  %v2361_v18 = vcvt.s32.f32 %v2354_v8 }
 0x593   : > { %v2272_v26 = vxor.u32 2147483648, %v2933_v35  ;;  %v2448_v39 = vsel %vm2446_vm4, %v2447_v56, %v4461_v46  ;;  %v2366_v19 = vsel %vm2281_vm14, %v2365_v43, %v4422_v30  ;;  %v2506_v41 = vshrl.u32 %v2505_v33, 5 }
 0x594   : > { %v2276_v42 = vsel %vm2274_vm2, %v2275_v20, %v2933_v35  ;;  %v2359_v1 = vand.u32 2147483647, %v2358_v6  ;;  %v2449_v13 = vadd.s32 %v2448_v39, %v2444_v12  ;;  %v2511_v29 = vshrl.u32 %v3026_v58, %v2508_v32 }
 0x595   : > { %v2273_v7 = vsel %vm2271_vm5, %v2931_v40, %v2272_v26  ;;  %v2514_v52 = vshrl.u32 %v3027_v60, %v2508_v32  ;;  %v2510_v63 = vshll.u32 %v3025_v54, %v2507_v53  ;;  %v2513_v59 = vshll.u32 %v3026_v58, %v2507_v53 }
 0x596   : > { %v2277_v49 = vsel %vm2270_vm1, %v2273_v7, %v2276_v42  ;;  %v2362_v25 = vmul.f32 %v2361_v18, %v2359_v1  ;;  %v2450_v15 = vadd.s32 536870912, %v2449_v13  ;;  %v2517_v61 = vshrl.u32 %v3028_v62, %v2508_v32 }
 0x597   : > { %v2278_v21 = vsel %vm2267_vm15, nan, %v2277_v49  ;;  %v2520_v22 = vshrl.u32 %v3029_v0, %v2508_v32  ;;  %v2516_v51 = vshll.u32 %v3027_v60, %v2507_v53  ;;  %v2519_v44 = vshll.u32 %v3028_v62, %v2507_v53 }
 0x598   : > { %2383 = vst [vmem:[%s3591_s15 + $0x30] sm:$0xff] %v2278_v21  ;;  %v2363_v30 = vxor.u32 2147483648, %v2362_v25  ;;  %v4496_v24 = vshrl.u32 %v2450_v15, 30  ;;  %v2512_v23 = vor.u32 %v2511_v29, %v2510_v63  ;;  %v2515_v50 = vor.u32 %v2514_v52, %v2513_v59 }
 0x599   : > { %v2522_v17 = vshll.u32 %v3029_v0, %v2507_v53  ;;  %v2523_v28 = vshrl.u32 %v3030_v11, %v2508_v32  ;;  %v2368_v5 = vsel %vm4472_vm3, 0, %v2366_v19  ;;  %v2521_v37 = vor.u32 %v2520_v22, %v2519_v44 }
 0x59a   : > { %v2364_v58 = vsel %vm2281_vm14, %v2363_v30, %v2362_v25  ;;  %v2452_v48 = vshll.u32 %v4496_v24, 30  ;;  %v2518_v62 = vor.u32 %v2517_v61, %v2516_v51  ;;  %vm2525_vm7 = vcmp.lt.s32.totalorder %v2506_v41, 1 }
 0x59b   : > { %v2367_v60 = vsel %vm4472_vm3, %v4241_v45, %v2364_v58  ;;  %v2524_v27 = vor.u32 %v2523_v28, %v2522_v17  ;;  %v2541_v0 = vshll.u32 %v2501_v10, 8  ;;  %v2372_v11 = vadd.s32 3, %v2368_v5 }
 0x59c   : > { %2934 = vcosq.f32 %v2367_v60  ;;  %v2453_v46 = vsub.s32 %v2449_v13, %v2452_v48  ;;  %vm2528_vm6 = vcmp.lt.s32.totalorder %v2506_v41, 4  ;;  %v2533_v57 = vsel %vm2525_vm7, %v2512_v23, %v2515_v50 }
 0x59d   : > { %2936 = vsinq.f32 %v2367_v60  ;;  %vm2526_vm8 = vcmp.lt.s32.totalorder %v2506_v41, 2  ;;  %vm2527_vm9 = vcmp.lt.s32.totalorder %v2506_v41, 3  ;;  %v2534_v4 = vsel %vm2528_vm6, %v2521_v37, 920167782 }
 0x59e   : > { %v2455_v16 = vsub.s32 0, %v2453_v46  ;;  %v2530_v55 = vsel %vm2528_vm6, %v2518_v62, 2102212464  ;;  %v2535_v34 = vsel %vm2527_vm9, %v2518_v62, %v2534_v4  ;;  %v2537_v33 = vsel %vm2525_vm7, %v2515_v50, %v2518_v62 }
 0x59f   : > { %v2538_v40 = vsel %vm2528_vm6, %v2524_v27, 1326507024  ;;  %v2509_v47 = vshrl.u32 %v3025_v54, %v2508_v32  ;;  %v2536_v53 = vsel %vm2526_vm8, %v2533_v57, %v2535_v34  ;;  %v2373_v56 = vand.u32 3, %v2372_v11 }
 0x5a0   : > { %v2738_v8 = vmin.u32 %v2455_v16, %v2453_v46  ;;  %v2539_v35 = vsel %vm2527_vm9, %v2521_v37, %v2538_v40  ;;  %v4515_v31 = vmul.u32.u64.low %v2541_v0, %v2536_v53  ;;  %v4516_v43 = vmul.u32.u64.high %v2541_v0, %v2536_v53, %v4515_v31 }
 0x5a1   : > { %v2540_v20 = vsel %vm2526_vm8, %v2537_v33, %v2539_v35  ;;  %v2529_v6 = vsel %vm2525_vm7, %v2509_v47, %v2512_v23  ;;  %v2531_v12 = vsel %vm2527_vm9, %v2515_v50, %v2530_v55  ;;  %vm2374_vm10 = vcmp.lt.s32.totalorder %v2373_v56, 2 }
 0x5a2   : > { %v2457_v26 = vclz %v2738_v8  ;;  %v4520_v42 = vmul.u32.u64.low %v2541_v0, %v2540_v20  ;;  %v4521_v39 = vmul.u32.u64.high %v2541_v0, %v2540_v20, %v4520_v42  ;;  %v2532_v54 = vsel %vm2526_vm8, %v2529_v6, %v2531_v12 }
 0x5a3   : > { %v2551_v32 = vadd.s32 1, %v4516_v43  ;;  %vm2378_vm11 = vcmp.eq.s32.totalorder %v2373_v56, 2  ;;  %v2445_v13 = vadd.s32 %v4460_v14, %v4458_v2  ;;  %v2548_v21 = vmul.u32 %v2541_v0, %v2532_v54 }
 0x5a4   : > { %v2739_v10 = vadd.s32 4294967294, %v2457_v26  ;;  %vm2550_vm12 = vc.u32 %v4521_v39, %v4515_v31  ;;  %vm2375_vm14 = vcmp.eq.s32.totalorder %v2373_v56, 0  ;;  %vm2371_vm15 = vweird.f32 %v4241_v45 }
 0x5a5   : > { %v2552_v41 = vsel %vm2550_vm12, %v2551_v32, %v4516_v43  ;;  %v2475_v48 = vsub.s32 4, %v4496_v24  ;;  %vm2391_vm0 = vcmp.lt.s32.totalorder %v4343_v38, 0  ;;  %vm2390_vm1 = vcmp.le.f32.partialorder %v2389_v9, 0.7853982 }
 0x5a6   : > { %v2935_v7 = vpop.eup %2934  ;;  %vm2740_vm13 = vcmp.lt.s32.totalorder %v2739_v10, 0  ;;  %v2553_v22 = vadd.s32 %v2552_v41, %v2548_v21  ;;  %v2549_v34 = vadd.s32 %v4515_v31, %v4521_v39  ;;  %vm2481_vm7 = vweird.f32 %v4343_v38 }
 0x5a7   : > { %v2937_v1 = vpop.eup %2936  ;;  %v2379_v18 = vxor.u32 2147483648, %v2935_v7  ;;  %v2460_v49 = vsel %vm2740_vm13, 0, %v2739_v10  ;;  %v2476_v27 = vsel %vm2391_vm0, %v2475_v48, %v4496_v24  ;;  %vm2495_vm6 = vcmp.lt.s32.totalorder %v4397_v3, 0 }
 0x5a8   : > { %v2376_v19 = vxor.u32 2147483648, %v2937_v1  ;;  %v2461_v29 = vsub.s32 32, %v2460_v49  ;;  %v2465_v52 = vsub.s32 4294967266, %v2460_v49  ;;  %v2462_v15 = vshll.u32 %v2453_v46, %v2460_v49 }
 0x5a9   : > { %v2380_v25 = vsel %vm2378_vm11, %v2379_v18, %v2937_v1  ;;  %v2554_v44 = vadd.s32 536870912, %v2553_v22  ;;  %v2478_v57 = vsel %vm2390_vm1, 0, %v2476_v27  ;;  %vm2494_vm8 = vcmp.le.f32.partialorder %v2493_v36, 0.7853982 }
 0x5aa   : > { %v2377_v63 = vsel %vm2375_vm14, %v2935_v7, %v2376_v19  ;;  %v2463_v59 = vshrl.u32 %v2445_v13, %v2461_v29  ;;  %v2466_v61 = vadd.s32 127, %v2465_v52  ;;  %v2482_v4 = vadd.s32 3, %v2478_v57 }
 0x5ab   : > { %v2381_v2 = vsel %vm2374_vm10, %v2377_v63, %v2380_v25  ;;  %v2555_v50 = vshrl.u32 %v2554_v44, 30  ;;  %vm2585_vm13 = vweird.f32 %v4397_v3 }
 0x5ac   : > { %v2382_v14 = vsel %vm2371_vm15, nan, %v2381_v2  ;;  %v2464_v30 = vor.u32 %v2463_v59, %v2462_v15  ;;  %v2467_v51 = vshll.u32 %v2466_v61, 23  ;;  %v2483_v9 = vand.u32 3, %v2482_v4 }
 0x5ad   : > { %2384 = vst [vmem:[%s3591_s15 + $0x38] sm:$0xff] %v2382_v14  ;;  %v2556_v58 = vshll.u32 %v2555_v50, 30  ;;  %v2579_v7 = vsub.s32 4, %v2555_v50 }
 0x5ae   : > { %v2468_v23 = vor.u32 4788187, %v2467_v51  ;;  %v2471_v28 = vcvt.s32.f32 %v2464_v30  ;;  %vm2488_vm3 = vcmp.eq.s32.totalorder %v2483_v9, 2  ;;  %vm2485_vm4 = vcmp.eq.s32.totalorder %v2483_v9, 0 }
 0x5af   : > { %v2557_v37 = vsub.s32 %v2553_v22, %v2556_v58  ;;  %vm2484_vm5 = vcmp.lt.s32.totalorder %v2483_v9, 2  ;;  %v2580_v13 = vsel %vm2495_vm6, %v2579_v7, %v2555_v50 }
 0x5b0   : > { %v2469_v17 = vand.u32 2147483647, %v2468_v23  ;;  %v2582_v19 = vsel %vm2494_vm8, 0, %v2580_v13 }
 0x5b1   : > { %v2559_v62 = vsub.s32 0, %v2557_v37 }
 0x5b2   : > { %v2472_v5 = vmul.f32 %v2471_v28, %v2469_v17 }
 0x5b3   : > { %v2742_v46 = vmin.u32 %v2559_v62, %v2557_v37 }
 0x5b4   : > { %v2473_v60 = vxor.u32 2147483648, %v2472_v5 }
 0x5b5   : > { %v2561_v11 = vclz %v2742_v46 }
 0x5b6   : > { %v2474_v45 = vsel %vm2391_vm0, %v2473_v60, %v2472_v5 }
 0x5b7   : > { %v2477_v0 = vsel %vm2390_vm1, %v4343_v38, %v2474_v45  ;;  %v2743_v16 = vadd.s32 4294967294, %v2561_v11  ;;  %v2586_v38 = vadd.s32 3, %v2582_v19 }
 0x5b8   : > { %2938 = vcosq.f32 %v2477_v0 }
 0x5b9   : > { %2940 = vsinq.f32 %v2477_v0  ;;  %vm2744_vm2 = vcmp.lt.s32.totalorder %v2743_v16, 0  ;;  %v2587_v29 = vand.u32 3, %v2586_v38 }
 0x5ba   : > { %v2564_v55 = vsel %vm2744_vm2, 0, %v2743_v16 }
 0x5bb   : > { %v2565_v33 = vsub.s32 32, %v2564_v55  ;;  %v2569_v40 = vsub.s32 4294967266, %v2564_v55  ;;  %v2566_v8 = vshll.u32 %v2557_v37, %v2564_v55  ;;  %vm2592_vm9 = vcmp.eq.s32.totalorder %v2587_v29, 2 }
 0x5bc   : > { %vm2589_vm10 = vcmp.eq.s32.totalorder %v2587_v29, 0  ;;  %vm2588_vm11 = vcmp.lt.s32.totalorder %v2587_v29, 2 }
 0x5bd   : > { %v2567_v47 = vshrl.u32 %v2549_v34, %v2565_v33  ;;  %v2570_v24 = vadd.s32 127, %v2569_v40 }
 0x5bf   : > { %v2568_v35 = vor.u32 %v2567_v47, %v2566_v8  ;;  %v2571_v20 = vshll.u32 %v2570_v24, 23 }
 0x5c1   : > { %v2572_v6 = vor.u32 4788187, %v2571_v20  ;;  %v2575_v39 = vcvt.s32.f32 %v2568_v35 }
 0x5c2   : > { %v2939_v53 = vpop.eup %2938 }
 0x5c3   : > { %v2941_v43 = vpop.eup %2940  ;;  %v2489_v56 = vxor.u32 2147483648, %v2939_v53  ;;  %v2573_v31 = vand.u32 2147483647, %v2572_v6 }
 0x5c4   : > { %v2486_v26 = vxor.u32 2147483648, %v2941_v43 }
 0x5c5   : > { %v2490_v12 = vsel %vm2488_vm3, %v2489_v56, %v2941_v43  ;;  %v2576_v32 = vmul.f32 %v2575_v39, %v2573_v31 }
 0x5c6   : > { %v2487_v42 = vsel %vm2485_vm4, %v2939_v53, %v2486_v26 }
 0x5c7   : > { %v2491_v10 = vsel %vm2484_vm5, %v2487_v42, %v2490_v12  ;;  %v2577_v1 = vxor.u32 2147483648, %v2576_v32 }
 0x5c8   : > { %v2492_v54 = vsel %vm2481_vm7, nan, %v2491_v10 }
 0x5c9   : > { %2597 = vst [vmem:[%s3591_s15 + $0x70] sm:$0xff] %v2492_v54  ;;  %v2578_v18 = vsel %vm2495_vm6, %v2577_v1, %v2576_v32 }
 0x5ca   : > { %v2581_v49 = vsel %vm2494_vm8, %v4397_v3, %v2578_v18 }
 0x5cb   : > { %2942 = vcosq.f32 %v2581_v49 }
 0x5cc   : > { %2944 = vsinq.f32 %v2581_v49 }
 0x5d5   : > { %v2943_v52 = vpop.eup %2942 }
 0x5d6   : > { %v2945_v21 = vpop.eup %2944  ;;  %v2593_v25 = vxor.u32 2147483648, %v2943_v52 }
 0x5d7   : > { %v2590_v15 = vxor.u32 2147483648, %v2945_v21 }
 0x5d8   : > { %v2594_v36 = vsel %vm2592_vm9, %v2593_v25, %v2945_v21 }
 0x5d9   : > { %v2591_v41 = vsel %vm2589_vm10, %v2943_v52, %v2590_v15 }
 0x5da   : > { %v2595_v63 = vsel %vm2588_vm11, %v2591_v41, %v2594_v36 }
 0x5db   : > { %v2596_v59 = vsel %vm2585_vm13, nan, %v2595_v63 }
 0x5dc   : > { %2598 = vst [vmem:[%s3591_s15 + $0x78] sm:$0xff] %v2596_v59 }
 0x5dd   : > { %2959 = shalt.err (!%p2956_p3)
}
 0x5de   : > { %s2960_s9 = scalar_lea.hbm %s4552_s26, 2048  ;;  %s2964_s13 = scalar_lea.hbm %s4607_s5, 4096 }
 0x5df   : > { %p2961_p4 = scmp.ne.s32.totalorder %s4552_s26, %s2960_s9  ;;  %p2965_p9 = scmp.lt.u32.totalorder %s4552_s26, %s4607_s5 }
 0x5e0   : > { %p2966_p10 = scmp.lt.u32.totalorder %s2964_s13, %s2960_s9  ;;  %p2968_p12 = scmp.lt.u32.totalorder %s2960_s9, %s4552_s26 }
 0x5e1   : > { %p2962_p7 = pnand %p2961_p4, %p3101_p5 }
 0x5e2   : > { %p2967_p11 = por %p2966_p10, %p2965_p9 }
 0x5e3   : > { %p2963_p8 = pneg %p2962_p7 }
 0x5e4   : > { %p2969_p13 = por %p2968_p12, %p2967_p11 }
 0x5e6   : > { %p2970_p0 = pnand %p2969_p13, %p2963_p8 }
 0x5e8   : > { %2973 = shalt.err (!%p2970_p0)
}
 0x5e9   : > { %s3032_s16 = smov 256  }
 0x5ea   : > { %2815 = dma.vmem_to_hbm [thread:$0]  (%p3101_p5), %s4555_s17, 2048, %s4552_s26, %s4560_s22, %s3032_s16, %s3032_s16, %s3011_s11  }
 0x5eb PF: > { %p2821_p1 = scmp.ge.s32.totalorder %s3008_s21, 2  ;;  %s2628_s23 = sand.u32 1, %s2996_s18  }
 0x5ec   : > { %s2629_s25 = scalar_lea.sflag [#allocation3], %s2628_s23 }
 0x5ed   : > { %p2818_p2 = pnand %p2821_p1, %p3105_p6 }
 0x5ef   : > { %2991 = dma.done.wait (!%p2818_p2), %s2629_s25, 2048  }
 0x5f0   : > { %2993 = vsyncadd (!%p2818_p2), %s2629_s25, 4294965248  ;;  %p15_p3 = scmp.ge.s32.totalorder %s3088_s24, 4   ;;  %s4638_s18 = smov %s3000_s19 }
 0x5f1   : > { %s4639_s19 = smov %s3004_s20  ;;  %s4640_s20 = smov %s3099_s27 }
 0x5f2   : > { %s4641_s21 = smov %s3088_s24  ;;  %17 = sbr.rel (!%p15_p3) target bundleno = 3 (0x3), region = 75 }
 0x5f9   :  { %2634 = vsyncpa [#allocation3], 1 }
 0x5fa   :  { %2636 = vsyncpa [#allocation3 + $0x1], 1 }

</bundles_post_ra>
